<compile_context>
chip_gen: v6e
topology: v6e:2x2x1
jax: 0.10.0
libtpu: 0.0.40
codegen_flags: <defaults>
</compile_context>

<pallas_src>
import jax
import jax.numpy as jnp
import numpy as np
from jax.experimental import pallas as pl
from jax.experimental.pallas import tpu as pltpu


def dlrm_fwd_kernel(nvalid_ref,                                   # SMEM scalar prefetch: true B
                    x_ref, ly_ref, tgt_ref,                       # streamed batch tiles
                    wb1_ref, bb1_ref, wb2_ref, bb2_ref,           # bottom MLP (VMEM resident)
                    w1x_ref, w1g_ref, bt1_ref, wt2_ref, bt2_ref,  # top MLP (VMEM resident)
                    loss_ref,                                     # (1,1,128) lane-dense partial sum
                    gflat_ref):                                   # VMEM scratch (TB, n_f*n_f)
    f32 = jnp.float32
    wb1 = wb1_ref[...]
    cdt = wb1.dtype                       # MXU operand dtype (bf16 default, f32 for validation)
    tb = x_ref.shape[0]

    # ---- bottom MLP: Linear+ReLU, Linear+ReLU (sigmoid_bot = -1) ------------
    x = x_ref[...].astype(cdt)                                         # (TB, D0)
    h = jnp.dot(x, wb1, preferred_element_type=f32) + bb1_ref[...]
    h = jnp.maximum(h, 0.0)
    xb = jnp.dot(h.astype(cdt), wb2_ref[...],
                 preferred_element_type=f32) + bb2_ref[...]
    xb = jnp.maximum(xb, 0.0)                                          # (TB, emb) f32

    # ---- 'dot' feature interaction: ONE Gram over T = [dense | embeddings] --
    # The dense-vs-emb cross column is part of the Gram (no broadcast-multiply
    # + XLU reduction path); the strictly-lower-triangle pair selection is
    # folded host-side into the zero-padded flat weight w1g.
    t_feat = jnp.concatenate([xb.astype(cdt)[:, None, :], ly_ref[...]], axis=1)  # (TB, n_f, emb)
    n_f = t_feat.shape[1]
    gram = jnp.einsum('bge,bhe->bgh', t_feat, t_feat,
                      preferred_element_type=f32)                                # (TB, n_f, n_f)

    # Flatten the Gram lane-contiguously into VMEM scratch (n_f small static
    # stores), then ONE full-K MXU matmul against the host-flattened pair
    # weights (replaces the previous per-row tiny-K matmul loop).
    for g in range(n_f):
        gflat_ref[:, g * n_f:(g + 1) * n_f] = gram[:, g, :].astype(cdt)

    h2 = jnp.dot(xb.astype(cdt), w1x_ref[...], preferred_element_type=f32) + bt1_ref[...]
    h2 = h2 + jnp.dot(gflat_ref[...], w1g_ref[...], preferred_element_type=f32)
    h2 = jnp.maximum(h2, 0.0)

    # ---- top MLP layer 2 (+ Sigmoid folded into the logits-form BCE) --------
    logits = jnp.dot(h2.astype(cdt), wt2_ref[...],
                     preferred_element_type=f32) + bt2_ref[...]                  # (TB, 1)

    # valid-row mask computed in-kernel (no streamed (TB,1) mask input)
    rows = pl.program_id(0) * tb + jax.lax.broadcasted_iota(jnp.int32, (tb, 1), 0)
    valid = (rows < nvalid_ref[0]).astype(f32)

    # BCELoss(sigmoid(z), t): log p = -softplus(-z), log(1-p) = -softplus(z),
    # both clamped at -100 exactly like torch.nn.BCELoss.  (log1p would be a
    # hair more accurate for large |z|; plain log kept for guaranteed lowering,
    # difference is far below the -100 clamp scale.)
    t = tgt_ref[...]
    lse = jnp.log(1.0 + jnp.exp(-jnp.abs(logits)))
    logp = jnp.maximum(-(jnp.maximum(-logits, 0.0) + lse), -100.0)
    log1mp = jnp.maximum(-(jnp.maximum(logits, 0.0) + lse), -100.0)
    per = -(t * logp + (1.0 - t) * log1mp) * valid                               # (TB, 1)

    # Lane-dense per-block partial sum; mean over the true B is taken in JAX so
    # the batch grid axis stays "parallel" (megacore-splittable on v7x).
    loss_ref[...] = jnp.full(loss_ref.shape, jnp.sum(per), dtype=f32)


def _round_up(x, m):
    return ((x + m - 1) // m) * m


def _vmem_capacity_bytes():
    """Physical per-core VMEM; conservative 64 MiB (v7x per-TC) fallback."""
    try:
        return int(pltpu.get_tpu_info().vmem_capacity_bytes)
    except Exception:
        return 64 * 1024 * 1024


def dlrm_forward(dense_x, ly, target, params, *, block_b=None,
                 compute_dtype=jnp.bfloat16):
    """Fused DLRM forward returning the scalar mean BCE loss.

    dense_x: (B, D0); ly: (B, n_tables, emb); target: (B, 1);
    params = (wb1, bb1, wb2, bb2, w1x, w1g, bt1, wt2, bt2), weights stored (in, out).
    """
    (wb1, bb1, wb2, bb2, w1x, w1g, bt1, wt2, bt2) = params
    b, d0 = dense_x.shape
    _, n_tables, emb = ly.shape
    n_f = n_tables + 1
    assert wb2.shape[1] == emb, "bottom MLP must end at emb_size for 'dot' interaction"
    assert w1g.shape[0] == n_f * n_f

    cdt = compute_dtype
    vmem = _vmem_capacity_bytes()

    # Generation-aware batch tile: bigger on 128 MiB parts (v5e/v6e), smaller on
    # v7x (64 MiB per TensorCore); capped so double-buffered streamed tiles fit.
    if block_b is None:
        block_b = 1024 if vmem > (96 << 20) else 512
    row_bytes = (d0 + n_tables * emb) * jnp.dtype(cdt).itemsize + 4
    max_rows = max((vmem // 4) // (2 * row_bytes), 8)
    block_b = int(min(block_b, max_rows))

    tb = min(_round_up(b, 8), _round_up(block_b, 8))
    if b > 8 and _round_up(b, tb) // tb < 2:
        tb = _round_up((b + 1) // 2, 8)     # >= 2 grid steps -> both v7x TCs engaged
    bp = _round_up(b, tb)
    n_blocks = bp // tb
    pad = bp - b

    # One cast pass (no-op when already in compute dtype); pad only when the
    # tail tile is ragged (zero rows -> finite logits, masked in-kernel).
    dx = dense_x if dense_x.dtype == cdt else dense_x.astype(cdt)
    lyx = ly if ly.dtype == cdt else ly.astype(cdt)
    tgt = target if target.dtype == jnp.float32 else target.astype(jnp.float32)
    if pad:
        dx = jnp.pad(dx, ((0, pad), (0, 0)))
        lyx = jnp.pad(lyx, ((0, pad), (0, 0), (0, 0)))
        tgt = jnp.pad(tgt, ((0, pad), (0, 0)))

    # MXU operands in compute dtype; biases stay f32 (added post f32 accumulation).
    weights = (wb1.astype(cdt), bb1, wb2.astype(cdt), bb2,
               w1x.astype(cdt), w1g.astype(cdt), bt1, wt2.astype(cdt), bt2)

    stream2 = lambda i, nb: (i, 0)
    stream3 = lambda i, nb: (i, 0, 0)
    resident = lambda i, nb: (0, 0)

    in_specs = [
        pl.BlockSpec((tb, d0), stream2),               # dense features tile
        pl.BlockSpec((tb, n_tables, emb), stream3),    # embedding activations tile
        pl.BlockSpec((tb, 1), stream2),                # target tile
    ]
    in_specs += [pl.BlockSpec(w.shape, resident) for w in weights]

    grid_spec = pltpu.PrefetchScalarGridSpec(
        num_scalar_prefetch=1,
        grid=(n_blocks,),
        in_specs=in_specs,
        out_specs=pl.BlockSpec((1, 1, 128), lambda i, nb: (i, 0, 0)),
        scratch_shapes=[pltpu.VMEM((tb, n_f * n_f), cdt)],
    )

    partial = pl.pallas_call(
        dlrm_fwd_kernel,
        out_shape=jax.ShapeDtypeStruct((n_blocks, 1, 128), jnp.float32),
        grid_spec=grid_spec,
        compiler_params=pltpu.CompilerParams(
            dimension_semantics=("parallel",),
            vmem_limit_bytes=int(min(vmem * 3 // 4, 100 * 1024 * 1024))),
    )(jnp.asarray([b], jnp.int32), dx, lyx, tgt, *weights)

    return jnp.sum(partial[:, 0, 0]) / b


def init_mlp_params(key, ln):
    """create_mlp init: W ~ N(0, sqrt(2/(m+n))), b ~ N(0, sqrt(1/m)); stored (in, out)."""
    params = []
    for i in range(len(ln) - 1):
        n, m = int(ln[i]), int(ln[i + 1])
        key, kw, kb = jax.random.split(key, 3)
        w = jax.random.normal(kw, (m, n), jnp.float32) * np.sqrt(2.0 / (m + n))
        b = jax.random.normal(kb, (m,), jnp.float32) * np.sqrt(1.0 / m)
        params.append((w.T, b.reshape(1, m)))
    return params, key


def fold_interaction_into_top_w1(wt1, d, n_tables):
    """Split the first top-MLP weight into the dense block w1x (d, h1) and a
    zero-padded flat pair weight w1g (n_f*n_f, h1) that absorbs the
    strictly-lower-triangle pair ordering of interact_features, including the
    dense-vs-emb cross terms (feature 0 = dense).  Host-side, one-time."""
    n_f = 1 + n_tables
    h1 = wt1.shape[1]
    wt1_np = np.asarray(wt1, np.float32)
    w1x = wt1_np[:d]
    pair_rows = wt1_np[d:]
    assert pair_rows.shape[0] == n_f * (n_f - 1) // 2
    w1g = np.zeros((n_f * n_f, h1), np.float32)
    k = 0
    for i in range(n_f):
        for j in range(i):                  # strictly-lower triangle, original order
            w1g[i * n_f + j] = pair_rows[k]
            k += 1
    return jnp.asarray(w1x), jnp.asarray(w1g)


def reference_forward(dense_x, ly, target, bot_params, top_params):
    """Pure-JAX f32 reference following the original PyTorch module math."""
    (wb1, bb1), (wb2, bb2) = bot_params
    (wt1, bt1), (wt2, bt2) = top_params
    hp = jax.lax.Precision.HIGHEST
    mm = lambda a, w: jnp.dot(a, w, precision=hp)
    x = jnp.maximum(mm(dense_x, wb1) + bb1, 0.0)
    x = jnp.maximum(mm(x, wb2) + bb2, 0.0)
    feats = [x] + [ly[:, t, :] for t in range(ly.shape[1])]
    n_f = len(feats)
    z_cols = [jnp.sum(feats[i] * feats[j], axis=-1, keepdims=True)
              for i in range(n_f) for j in range(i)]
    r = jnp.concatenate([x] + z_cols, axis=1)
    h2 = jnp.maximum(mm(r, wt1) + bt1, 0.0)
    p = jax.nn.sigmoid(mm(h2, wt2) + bt2)
    logp = jnp.maximum(jnp.log(p), -100.0)
    log1mp = jnp.maximum(jnp.log(1.0 - p), -100.0)
    return jnp.mean(-(target * logp + (1.0 - target) * log1mp))


if __name__ == "__main__":
    # Small but grid-exercising shapes: 256 rows streamed as (at least) two tiles.
    B = 256
    emb_size = 16
    n_tables = 3
    n_rows = 64
    ln_bot = [16, 32, emb_size]                   # bottom MLP must end at emb_size
    n_f = 1 + n_tables
    ln_top = [ln_bot[-1] + n_f * (n_f - 1) // 2, 32, 1]   # 16 + 6 = 22

    key = jax.random.PRNGKey(0)
    key, kx, kt, ki, ke = jax.random.split(key, 5)
    dense_x = jax.random.normal(kx, (B, ln_bot[0]), jnp.float32)
    target = (jax.random.uniform(kt, (B, 1)) > 0.5).astype(jnp.float32)
    lS_i = jax.random.randint(ki, (n_tables, B), 0, n_rows)
    emb_tables = jax.random.normal(ke, (n_tables, n_rows, emb_size), jnp.float32) * 0.1

    bot_params, key = init_mlp_params(key, ln_bot)
    top_params, key = init_mlp_params(key, ln_top)
    (wb1, bb1), (wb2, bb2) = bot_params
    (wt1, bt1), (wt2, bt2) = top_params
    w1x, w1g = fold_interaction_into_top_w1(wt1, ln_bot[-1], n_tables)
    params = (wb1, bb1, wb2, bb2, w1x, w1g, bt1, wt2, bt2)

    # Embedding gather (apply_emb equivalent) as a plain JAX gather, batch-major.
    ly = jnp.take_along_axis(emb_tables, lS_i[:, :, None], axis=1)   # (n_tables, B, emb)
    ly = jnp.transpose(ly, (1, 0, 2))                                # (B, n_tables, emb)

    ref = reference_forward(dense_x, ly, target, bot_params, top_params)

    # f32 MXU path: validates the restructuring (fused Gram, flattened pair
    # weights, logits-form BCE, in-kernel valid mask) against the reference.
    loss_f32 = dlrm_forward(dense_x, ly, target, params, block_b=128,
                            compute_dtype=jnp.float32)
    jax.block_until_ready(loss_f32)
    assert jnp.isfinite(loss_f32), "f32 loss is not finite"
    assert jnp.allclose(loss_f32, ref, rtol=1e-2, atol=1e-4), (loss_f32, ref)

    # bf16 MXU path (performance default, generation-aware tiling).
    loss_bf16 = dlrm_forward(dense_x, ly, target, params,
                             compute_dtype=jnp.bfloat16)
    jax.block_until_ready(loss_bf16)
    assert jnp.isfinite(loss_bf16), "bf16 loss is not finite"
    assert jnp.allclose(loss_bf16, ref, rtol=8e-2, atol=5e-3), (loss_bf16, ref)

    print("KERNEL_OK")
</pallas_src>

<mosaic_0001>
module attributes {stable_mosaic.version = 11 : i64} {
  func.func @dlrm_fwd_kernel(%arg0: i32, %arg1: memref<1xi32, #tpu.memory_space<smem>>, %arg2: memref<128x16xf32, #tpu.memory_space<vmem>>, %arg3: memref<128x3x16xf32, #tpu.memory_space<vmem>>, %arg4: memref<128x1xf32, #tpu.memory_space<vmem>>, %arg5: memref<16x32xf32, #tpu.memory_space<vmem>>, %arg6: memref<1x32xf32, #tpu.memory_space<vmem>>, %arg7: memref<32x16xf32, #tpu.memory_space<vmem>>, %arg8: memref<1x16xf32, #tpu.memory_space<vmem>>, %arg9: memref<16x32xf32, #tpu.memory_space<vmem>>, %arg10: memref<16x32xf32, #tpu.memory_space<vmem>>, %arg11: memref<1x32xf32, #tpu.memory_space<vmem>>, %arg12: memref<32x1xf32, #tpu.memory_space<vmem>>, %arg13: memref<1x1xf32, #tpu.memory_space<vmem>>, %arg14: memref<1x1x128xf32, #tpu.memory_space<vmem>>, %arg15: memref<128x16xf32, #tpu.memory_space<vmem>>) attributes {dimension_semantics = [#tpu.dimension_semantics<parallel>], iteration_bounds = array<i64: 2>, scalar_prefetch = 1 : i64, scratch_operands = 1 : i64, tpu.core_type = #tpu.core_type<tc>, window_params = [{transform_indices = @transform_0, window_bounds = array<i64: 128, 16>}, {transform_indices = @transform_1, window_bounds = array<i64: 128, 3, 16>}, {transform_indices = @transform_2, window_bounds = array<i64: 128, 1>}, {pipeline_mode = #tpu.pipeline_mode<synchronous>, transform_indices = @transform_3, window_bounds = array<i64: 16, 32>}, {pipeline_mode = #tpu.pipeline_mode<synchronous>, transform_indices = @transform_4, window_bounds = array<i64: 1, 32>}, {pipeline_mode = #tpu.pipeline_mode<synchronous>, transform_indices = @transform_5, window_bounds = array<i64: 32, 16>}, {pipeline_mode = #tpu.pipeline_mode<synchronous>, transform_indices = @transform_6, window_bounds = array<i64: 1, 16>}, {pipeline_mode = #tpu.pipeline_mode<synchronous>, transform_indices = @transform_7, window_bounds = array<i64: 16, 32>}, {pipeline_mode = #tpu.pipeline_mode<synchronous>, transform_indices = @transform_8, window_bounds = array<i64: 16, 32>}, {pipeline_mode = #tpu.pipeline_mode<synchronous>, transform_indices = @transform_9, window_bounds = array<i64: 1, 32>}, {pipeline_mode = #tpu.pipeline_mode<synchronous>, transform_indices = @transform_10, window_bounds = array<i64: 32, 1>}, {pipeline_mode = #tpu.pipeline_mode<synchronous>, transform_indices = @transform_11, window_bounds = array<i64: 1, 1>}, {transform_indices = @transform_12, window_bounds = array<i64: 1, 1, 128>}]} {
    %c0 = arith.constant 0 : index
    %c0_0 = arith.constant 0 : index
    %0 = vector.load %arg5[%c0, %c0_0] : memref<16x32xf32, #tpu.memory_space<vmem>>, vector<16x32xf32>
    %c0_1 = arith.constant 0 : index
    %c0_2 = arith.constant 0 : index
    %1 = vector.load %arg2[%c0_1, %c0_2] : memref<128x16xf32, #tpu.memory_space<vmem>>, vector<128x16xf32>
    %cst = arith.constant dense<0.000000e+00> : vector<128x32xf32>
    %2 = tpu.matmul %1, %0, %cst {dimension_numbers = #tpu.dot_dimension_numbers<[1], [0], [0], [1], [0, 0, 1, 1], [], []>} : vector<128x16xf32>, vector<16x32xf32>, vector<128x32xf32> -> vector<128x32xf32>
    %c0_3 = arith.constant 0 : index
    %c0_4 = arith.constant 0 : index
    %3 = vector.load %arg6[%c0_3, %c0_4] : memref<1x32xf32, #tpu.memory_space<vmem>>, vector<1x32xf32>
    %4 = vector.broadcast %3 : vector<1x32xf32> to vector<128x32xf32>
    %5 = arith.addf %2, %4 : vector<128x32xf32>
    %cst_5 = arith.constant 0.000000e+00 : f32
    %6 = vector.broadcast %cst_5 : f32 to vector<128x32xf32>
    %7 = arith.maximumf %5, %6 : vector<128x32xf32>
    %c0_6 = arith.constant 0 : index
    %c0_7 = arith.constant 0 : index
    %8 = vector.load %arg7[%c0_6, %c0_7] : memref<32x16xf32, #tpu.memory_space<vmem>>, vector<32x16xf32>
    %cst_8 = arith.constant dense<0.000000e+00> : vector<128x16xf32>
    %9 = tpu.matmul %7, %8, %cst_8 {dimension_numbers = #tpu.dot_dimension_numbers<[1], [0], [0], [1], [0, 0, 1, 1], [], []>} : vector<128x32xf32>, vector<32x16xf32>, vector<128x16xf32> -> vector<128x16xf32>
    %c0_9 = arith.constant 0 : index
    %c0_10 = arith.constant 0 : index
    %10 = vector.load %arg8[%c0_9, %c0_10] : memref<1x16xf32, #tpu.memory_space<vmem>>, vector<1x16xf32>
    %11 = vector.broadcast %10 : vector<1x16xf32> to vector<128x16xf32>
    %12 = arith.addf %9, %11 : vector<128x16xf32>
    %cst_11 = arith.constant 0.000000e+00 : f32
    %13 = vector.broadcast %cst_11 : f32 to vector<128x16xf32>
    %14 = arith.maximumf %12, %13 : vector<128x16xf32>
    %15 = vector.shape_cast %14 : vector<128x16xf32> to vector<128x1x16xf32>
    %c0_12 = arith.constant 0 : index
    %c0_13 = arith.constant 0 : index
    %c0_14 = arith.constant 0 : index
    %16 = vector.load %arg3[%c0_12, %c0_13, %c0_14] : memref<128x3x16xf32, #tpu.memory_space<vmem>>, vector<128x3x16xf32>
    %17 = tpu.concatenate %15, %16 in 1 : vector<128x1x16xf32>, vector<128x3x16xf32> -> vector<128x4x16xf32>
    "tpu.trace_start"() <{level = 10 : i32, message = "bge,bhe->bgh"}> : () -> ()
    %cst_15 = arith.constant dense<0.000000e+00> : vector<128x4x4xf32>
    %18 = tpu.matmul %17, %17, %cst_15 {dimension_numbers = #tpu.dot_dimension_numbers<[2], [2], [1], [1], [0, 0, 0, 1, 1, 1], [0], [0]>} : vector<128x4x16xf32>, vector<128x4x16xf32>, vector<128x4x4xf32> -> vector<128x4x4xf32>
    "tpu.trace_stop"() : () -> ()
    %19 = vector.extract_strided_slice %18 {offsets = [0, 0, 0], sizes = [128, 1, 4], strides = [1, 1, 1]} : vector<128x4x4xf32> to vector<128x1x4xf32>
    %20 = vector.shape_cast %19 : vector<128x1x4xf32> to vector<128x4xf32>
    %c0_16 = arith.constant 0 : index
    %c0_17 = arith.constant 0 : index
    %21 = vector.load %arg15[%c0_16, %c0_17] : memref<128x16xf32, #tpu.memory_space<vmem>>, vector<128x4xf32>
    tpu.vector_store %arg15[%c0_16, %c0_17], %20 {strides = array<i32>} : memref<128x16xf32, #tpu.memory_space<vmem>>, vector<128x4xf32>,
    %22 = vector.extract_strided_slice %18 {offsets = [0, 1, 0], sizes = [128, 1, 4], strides = [1, 1, 1]} : vector<128x4x4xf32> to vector<128x1x4xf32>
    %23 = vector.shape_cast %22 : vector<128x1x4xf32> to vector<128x4xf32>
    %c0_18 = arith.constant 0 : index
    %c4 = arith.constant 4 : index
    %24 = vector.load %arg15[%c0_18, %c4] : memref<128x16xf32, #tpu.memory_space<vmem>>, vector<128x4xf32>
    tpu.vector_store %arg15[%c0_18, %c4], %23 {strides = array<i32>} : memref<128x16xf32, #tpu.memory_space<vmem>>, vector<128x4xf32>,
    %25 = vector.extract_strided_slice %18 {offsets = [0, 2, 0], sizes = [128, 1, 4], strides = [1, 1, 1]} : vector<128x4x4xf32> to vector<128x1x4xf32>
    %26 = vector.shape_cast %25 : vector<128x1x4xf32> to vector<128x4xf32>
    %c0_19 = arith.constant 0 : index
    %c8 = arith.constant 8 : index
    %27 = vector.load %arg15[%c0_19, %c8] : memref<128x16xf32, #tpu.memory_space<vmem>>, vector<128x4xf32>
    tpu.vector_store %arg15[%c0_19, %c8], %26 {strides = array<i32>} : memref<128x16xf32, #tpu.memory_space<vmem>>, vector<128x4xf32>,
    %28 = vector.extract_strided_slice %18 {offsets = [0, 3, 0], sizes = [128, 1, 4], strides = [1, 1, 1]} : vector<128x4x4xf32> to vector<128x1x4xf32>
    %29 = vector.shape_cast %28 : vector<128x1x4xf32> to vector<128x4xf32>
    %c0_20 = arith.constant 0 : index
    %c12 = arith.constant 12 : index
    %30 = vector.load %arg15[%c0_20, %c12] : memref<128x16xf32, #tpu.memory_space<vmem>>, vector<128x4xf32>
    tpu.vector_store %arg15[%c0_20, %c12], %29 {strides = array<i32>} : memref<128x16xf32, #tpu.memory_space<vmem>>, vector<128x4xf32>,
    %c0_21 = arith.constant 0 : index
    %c0_22 = arith.constant 0 : index
    %31 = vector.load %arg9[%c0_21, %c0_22] : memref<16x32xf32, #tpu.memory_space<vmem>>, vector<16x32xf32>
    %cst_23 = arith.constant dense<0.000000e+00> : vector<128x32xf32>
    %32 = tpu.matmul %14, %31, %cst_23 {dimension_numbers = #tpu.dot_dimension_numbers<[1], [0], [0], [1], [0, 0, 1, 1], [], []>} : vector<128x16xf32>, vector<16x32xf32>, vector<128x32xf32> -> vector<128x32xf32>
    %c0_24 = arith.constant 0 : index
    %c0_25 = arith.constant 0 : index
    %33 = vector.load %arg11[%c0_24, %c0_25] : memref<1x32xf32, #tpu.memory_space<vmem>>, vector<1x32xf32>
    %34 = vector.broadcast %33 : vector<1x32xf32> to vector<128x32xf32>
    %35 = arith.addf %32, %34 : vector<128x32xf32>
    %c0_26 = arith.constant 0 : index
    %c0_27 = arith.constant 0 : index
    %36 = vector.load %arg15[%c0_26, %c0_27] : memref<128x16xf32, #tpu.memory_space<vmem>>, vector<128x16xf32>
    %c0_28 = arith.constant 0 : index
    %c0_29 = arith.constant 0 : index
    %37 = vector.load %arg10[%c0_28, %c0_29] : memref<16x32xf32, #tpu.memory_space<vmem>>, vector<16x32xf32>
    %cst_30 = arith.constant dense<0.000000e+00> : vector<128x32xf32>
    %38 = tpu.matmul %36, %37, %cst_30 {dimension_numbers = #tpu.dot_dimension_numbers<[1], [0], [0], [1], [0, 0, 1, 1], [], []>} : vector<128x16xf32>, vector<16x32xf32>, vector<128x32xf32> -> vector<128x32xf32>
    %39 = arith.addf %35, %38 : vector<128x32xf32>
    %cst_31 = arith.constant 0.000000e+00 : f32
    %40 = vector.broadcast %cst_31 : f32 to vector<128x32xf32>
    %41 = arith.maximumf %39, %40 : vector<128x32xf32>
    %c0_32 = arith.constant 0 : index
    %c0_33 = arith.constant 0 : index
    %42 = vector.load %arg12[%c0_32, %c0_33] : memref<32x1xf32, #tpu.memory_space<vmem>>, vector<32x1xf32>
    %cst_34 = arith.constant dense<0.000000e+00> : vector<128x1xf32>
    %43 = tpu.matmul %41, %42, %cst_34 {dimension_numbers = #tpu.dot_dimension_numbers<[1], [0], [0], [1], [0, 0, 1, 1], [], []>} : vector<128x32xf32>, vector<32x1xf32>, vector<128x1xf32> -> vector<128x1xf32>
    %c0_35 = arith.constant 0 : index
    %c0_36 = arith.constant 0 : index
    %44 = vector.load %arg13[%c0_35, %c0_36] : memref<1x1xf32, #tpu.memory_space<vmem>>, vector<1x1xf32>
    %45 = vector.broadcast %44 : vector<1x1xf32> to vector<128x1xf32>
    %46 = arith.addf %43, %45 : vector<128x1xf32>
    %c128_i32 = arith.constant 128 : i32
    %47 = arith.muli %arg0, %c128_i32 : i32
    %48 = tpu.iota {dimensions = array<i32: 0>} : vector<128x1xi32>
    %49 = vector.broadcast %47 : i32 to vector<128x1xi32>
    %50 = arith.addi %49, %48 : vector<128x1xi32>
    %c0_37 = arith.constant 0 : index
    %51 = memref.load %arg1[%c0_37] : memref<1xi32, #tpu.memory_space<smem>>
    %52 = vector.broadcast %51 : i32 to vector<128x1xi32>
    %53 = arith.cmpi slt, %50, %52 : vector<128x1xi32>
    %54 = arith.extui %53 : vector<128x1xi1> to vector<128x1xi32>
    %55 = arith.sitofp %54 : vector<128x1xi32> to vector<128x1xf32>
    %c0_38 = arith.constant 0 : index
    %c0_39 = arith.constant 0 : index
    %56 = vector.load %arg4[%c0_38, %c0_39] : memref<128x1xf32, #tpu.memory_space<vmem>>, vector<128x1xf32>
    %57 = math.absf %46 : vector<128x1xf32>
    %cst_40 = arith.constant 0.000000e+00 : f32
    %58 = vector.broadcast %cst_40 : f32 to vector<128x1xf32>
    %59 = arith.subf %58, %57 : vector<128x1xf32>
    %60 = math.exp %59 : vector<128x1xf32>
    %cst_41 = arith.constant 1.000000e+00 : f32
    %61 = vector.broadcast %cst_41 : f32 to vector<128x1xf32>
    %62 = arith.addf %61, %60 : vector<128x1xf32>
    %63 = math.log %62 : vector<128x1xf32>
    %cst_42 = arith.constant 0.000000e+00 : f32
    %64 = vector.broadcast %cst_42 : f32 to vector<128x1xf32>
    %65 = arith.subf %64, %46 : vector<128x1xf32>
    %cst_43 = arith.constant 0.000000e+00 : f32
    %66 = vector.broadcast %cst_43 : f32 to vector<128x1xf32>
    %67 = arith.maximumf %65, %66 : vector<128x1xf32>
    %68 = arith.addf %67, %63 : vector<128x1xf32>
    %cst_44 = arith.constant 0.000000e+00 : f32
    %69 = vector.broadcast %cst_44 : f32 to vector<128x1xf32>
    %70 = arith.subf %69, %68 : vector<128x1xf32>
    %cst_45 = arith.constant -1.000000e+02 : f32
    %71 = vector.broadcast %cst_45 : f32 to vector<128x1xf32>
    %72 = arith.maximumf %70, %71 : vector<128x1xf32>
    %cst_46 = arith.constant 0.000000e+00 : f32
    %73 = vector.broadcast %cst_46 : f32 to vector<128x1xf32>
    %74 = arith.maximumf %46, %73 : vector<128x1xf32>
    %75 = arith.addf %74, %63 : vector<128x1xf32>
    %cst_47 = arith.constant 0.000000e+00 : f32
    %76 = vector.broadcast %cst_47 : f32 to vector<128x1xf32>
    %77 = arith.subf %76, %75 : vector<128x1xf32>
    %cst_48 = arith.constant -1.000000e+02 : f32
    %78 = vector.broadcast %cst_48 : f32 to vector<128x1xf32>
    %79 = arith.maximumf %77, %78 : vector<128x1xf32>
    %80 = arith.mulf %56, %72 : vector<128x1xf32>
    %cst_49 = arith.constant 1.000000e+00 : f32
    %81 = vector.broadcast %cst_49 : f32 to vector<128x1xf32>
    %82 = arith.subf %81, %56 : vector<128x1xf32>
    %83 = arith.mulf %82, %79 : vector<128x1xf32>
    %84 = arith.addf %80, %83 : vector<128x1xf32>
    %cst_50 = arith.constant 0.000000e+00 : f32
    %85 = vector.broadcast %cst_50 : f32 to vector<128x1xf32>
    %86 = arith.subf %85, %84 : vector<128x1xf32>
    %87 = arith.mulf %86, %55 : vector<128x1xf32>
    %88 = vector.shape_cast %87 : vector<128x1xf32> to vector<1x128x1xf32>
    %cst_51 = arith.constant dense<0.000000e+00> : vector<1xf32>
    %89 = vector.multi_reduction <add>, %88, %cst_51 [1, 2] : vector<1x128x1xf32> to vector<1xf32>
    %90 = vector.shape_cast %89 : vector<1xf32> to vector<1x1x1xf32>
    %91 = vector.extract %90[0, 0, 0] : f32 from vector<1x1x1xf32>
    %92 = vector.broadcast %91 : f32 to vector<1x1x128xf32>
    %c0_52 = arith.constant 0 : index
    %c0_53 = arith.constant 0 : index
    %c0_54 = arith.constant 0 : index
    %93 = vector.load %arg14[%c0_52, %c0_53, %c0_54] : memref<1x1x128xf32, #tpu.memory_space<vmem>>, vector<1x1x128xf32>
    tpu.vector_store %arg14[%c0_52, %c0_53, %c0_54], %92 {strides = array<i32>} : memref<1x1x128xf32, #tpu.memory_space<vmem>>, vector<1x1x128xf32>,
    return
  }
  func.func @transform_0(%arg0: i32, %arg1: memref<1xi32, #tpu.memory_space<smem>>) -> (i32, i32) {
    %c0_i32 = arith.constant 0 : i32
    %c0_i32_0 = arith.constant 0 : i32
    return %arg0, %c0_i32 : i32, i32
  }
  func.func @transform_1(%arg0: i32, %arg1: memref<1xi32, #tpu.memory_space<smem>>) -> (i32, i32, i32) {
    %c0_i32 = arith.constant 0 : i32
    %c0_i32_0 = arith.constant 0 : i32
    %c0_i32_1 = arith.constant 0 : i32
    return %arg0, %c0_i32, %c0_i32_0 : i32, i32, i32
  }
  func.func @transform_2(%arg0: i32, %arg1: memref<1xi32, #tpu.memory_space<smem>>) -> (i32, i32) {
    %c0_i32 = arith.constant 0 : i32
    %c0_i32_0 = arith.constant 0 : i32
    return %arg0, %c0_i32 : i32, i32
  }
  func.func @transform_3(%arg0: i32, %arg1: memref<1xi32, #tpu.memory_space<smem>>) -> (i32, i32) {
    %c0_i32 = arith.constant 0 : i32
    %c0_i32_0 = arith.constant 0 : i32
    %c0_i32_1 = arith.constant 0 : i32
    return %c0_i32, %c0_i32_0 : i32, i32
  }
  func.func @transform_4(%arg0: i32, %arg1: memref<1xi32, #tpu.memory_space<smem>>) -> (i32, i32) {
    %c0_i32 = arith.constant 0 : i32
    %c0_i32_0 = arith.constant 0 : i32
    %c0_i32_1 = arith.constant 0 : i32
    return %c0_i32, %c0_i32_0 : i32, i32
  }
  func.func @transform_5(%arg0: i32, %arg1: memref<1xi32, #tpu.memory_space<smem>>) -> (i32, i32) {
    %c0_i32 = arith.constant 0 : i32
    %c0_i32_0 = arith.constant 0 : i32
    %c0_i32_1 = arith.constant 0 : i32
    return %c0_i32, %c0_i32_0 : i32, i32
  }
  func.func @transform_6(%arg0: i32, %arg1: memref<1xi32, #tpu.memory_space<smem>>) -> (i32, i32) {
    %c0_i32 = arith.constant 0 : i32
    %c0_i32_0 = arith.constant 0 : i32
    %c0_i32_1 = arith.constant 0 : i32
    return %c0_i32, %c0_i32_0 : i32, i32
  }
  func.func @transform_7(%arg0: i32, %arg1: memref<1xi32, #tpu.memory_space<smem>>) -> (i32, i32) {
    %c0_i32 = arith.constant 0 : i32
    %c0_i32_0 = arith.constant 0 : i32
    %c0_i32_1 = arith.constant 0 : i32
    return %c0_i32, %c0_i32_0 : i32, i32
  }
  func.func @transform_8(%arg0: i32, %arg1: memref<1xi32, #tpu.memory_space<smem>>) -> (i32, i32) {
    %c0_i32 = arith.constant 0 : i32
    %c0_i32_0 = arith.constant 0 : i32
    %c0_i32_1 = arith.constant 0 : i32
    return %c0_i32, %c0_i32_0 : i32, i32
  }
  func.func @transform_9(%arg0: i32, %arg1: memref<1xi32, #tpu.memory_space<smem>>) -> (i32, i32) {
    %c0_i32 = arith.constant 0 : i32
    %c0_i32_0 = arith.constant 0 : i32
    %c0_i32_1 = arith.constant 0 : i32
    return %c0_i32, %c0_i32_0 : i32, i32
  }
  func.func @transform_10(%arg0: i32, %arg1: memref<1xi32, #tpu.memory_space<smem>>) -> (i32, i32) {
    %c0_i32 = arith.constant 0 : i32
    %c0_i32_0 = arith.constant 0 : i32
    %c0_i32_1 = arith.constant 0 : i32
    return %c0_i32, %c0_i32_0 : i32, i32
  }
  func.func @transform_11(%arg0: i32, %arg1: memref<1xi32, #tpu.memory_space<smem>>) -> (i32, i32) {
    %c0_i32 = arith.constant 0 : i32
    %c0_i32_0 = arith.constant 0 : i32
    %c0_i32_1 = arith.constant 0 : i32
    return %c0_i32, %c0_i32_0 : i32, i32
  }
  func.func @transform_12(%arg0: i32, %arg1: memref<1xi32, #tpu.memory_space<smem>>) -> (i32, i32, i32) {
    %c0_i32 = arith.constant 0 : i32
    %c0_i32_0 = arith.constant 0 : i32
    %c0_i32_1 = arith.constant 0 : i32
    return %arg0, %c0_i32, %c0_i32_0 : i32, i32, i32
  }
}

</mosaic_0001>

<bundles_post_ra>
// kernel: tpu_custom_call.1
= control target key start
LH: loop header
LB: loop body
LE: loop exit
PB: predicated region body
PF: predicated region fallthrough
CT: control target
= control target key end

     0   :  { %s18217_s0 = inlined_call_operand.<no memory space> [shape: s32[1], index: 0, kind: input, shape index: {}]   ;;  %s18218_s1 = inlined_call_operand.vmem [shape: f32[256,16], index: 1, kind: input, shape index: {}]   ;;  %s18219_s2 = inlined_call_operand.vmem [shape: f32[256,3,16], index: 2, kind: input, shape index: {}]   ;;  %s18220_s3 = inlined_call_operand.vmem [shape: f32[256,1], index: 3, kind: input, shape index: {}]   ;;  %s18221_s4 = inlined_call_operand.vmem [shape: f32[16,32], index: 4, kind: input, shape index: {}]   ;;  %s18222_s5 = inlined_call_operand.vmem [shape: f32[1,32], index: 5, kind: input, shape index: {}]   ;;  %s18223_s6 = inlined_call_operand.vmem [shape: f32[32,16], index: 6, kind: input, shape index: {}]   ;;  %s18224_s7 = inlined_call_operand.vmem [shape: f32[1,16], index: 7, kind: input, shape index: {}]   ;;  %s18225_s8 = inlined_call_operand.vmem [shape: f32[16,32], index: 8, kind: input, shape index: {}]   ;;  %s18226_s9 = inlined_call_operand.vmem [shape: f32[16,32], index: 9, kind: input, shape index: {}]   ;;  %s18227_s10 = inlined_call_operand.vmem [shape: f32[1,32], index: 10, kind: input, shape index: {}]   ;;  %s18228_s11 = inlined_call_operand.vmem [shape: f32[32,1], index: 11, kind: input, shape index: {}]   ;;  %s18229_s12 = inlined_call_operand.<no memory space> [shape: f32[1,1], index: 12, kind: input, shape index: {}]   ;;  %s18230_s13 = inlined_call_operand.hbm [shape: f32[2,1,128], index: 13, kind: output, shape index: {}]  }
   0x1   :  { %18234 = sst [smem:[#allocation9_spill]] %s18218_s1  ;;  %v19_v0 = vstv %s18229_s12 }
   0x2   :  { %18235 = sst [smem:[#allocation10_spill]] %s18219_s2  ;;  %20 = vst [vmem:[#allocation5] sm:$0x1] %v19_v0 }
   0x3   :  { %18236 = sst [smem:[#allocation11_spill]] %s18220_s3 }
   0x4   :  { %18 = sst [smem:[#allocation4]] %s18217_s0 }
   0x5   :  { %21 = vsyncpa [#allocation7], 0 }
   0x6   :  { %23 = vsyncpa [#allocation7 + $0x1], 0  ;;  %s15762_s29 = smov 0   ;;  %s15764_s30 = smov 0  }
   0x7   :  { %s15766_s14 = smov 0   ;;  %s15768_s15 = smov 0  }
   0x8 LB: > { %s15783_s0 = sadd.s32 4294967295, %s15677_s15   ;;  %s13989_s12 = sadd.s32 4294967294, %s15677_s15   ;;  %s15677_s15 = sphi %s15768_s15, %s18247_s15   ;;  %s15673_s14 = sphi %s15766_s14, %s18246_s14   ;;  %s15669_s30 = sphi %s15764_s30, %s18245_s30   ;;  %s15665_s29 = sphi %s15762_s29, %s18244_s29  }
   0x9   : > { %s15787_s16 = sadd.s32 1, %s15677_s15   ;;  %s303_s17 = sadd.s32 1, %s15673_s14 }
   0xa   : > { %s300_s18 = ssub.s32 %s15677_s15, %s15787_s16  ;;  %p313_p0 = scmp.ne.s32.totalorder %s15673_s14, %s15669_s30 }
   0xb   : > { %p301_p1 = scmp.eq.s32.totalorder %s300_s18, 0  ;;  %p314_p2 = scmp.eq.s32.totalorder %s15783_s0, 1 }
   0xc   : > { %p319_p3 = scmp.ne.s32.totalorder %s15669_s30, %s15665_s29  ;;  %p320_p4 = scmp.eq.s32.totalorder %s13989_s12, 1 }
   0xd   : > { %s15798_s19 = scalar_select %p301_p1, %s15673_s14, %s303_s17  }
   0xe   : > { %p15800_p5 = por %p314_p2, %p313_p0  ;;  %p15804_p6 = por %p320_p4, %p319_p3 }
   0xf   : > { %p13992_p7 = scmp.ge.s32.totalorder %s15677_s15, 1  ;;  %p392_p8 = scmp.lt.s32.totalorder %s15677_s15, 3 }
  0x11   : > { %p393_p9 = pnand %p13992_p7, %p392_p8 }
  0x12   : > { %s15817_s26 = sshll.u32 (!%p393_p9), %s15783_s0, 4  ;;  %s18239_s1 = sld [smem:[#allocation9_spill]] (!%p393_p9) }
  0x13   : > { %396 = sbr.rel (%p393_p9) target bundleno = 1691 (0x69b), region = 68  ;;  %p444_p10 = scmp.lt.s32.totalorder (!%p393_p9), %s15817_s26, 31 }
  0x14   : > { %s18240_s2 = sld [smem:[#allocation10_spill]] (!%p393_p9)  ;;  %s18232_s12 = smov (!%p393_p9), 12  }
  0x15   : > { %s15683_s17 = smov (!%p393_p9), 8   ;;  %s18241_s23 = smov (!%p393_p9), 12  }
  0x16   : > { %s18243_s3 = sld [smem:[#allocation11_spill]] (!%p393_p9) }
  0x18   : > { %v462_v1 = vld [vmem:[%s18221_s4 + $0x8] sm:$0xff]  ;;  %v461_v2 = vld [vmem:[%s18221_s4] sm:$0xff]  ;;  %v699_v3 = vld [vmem:[%s18223_s6 + $0x18] sm:$0xff]  ;;  %s15827_s18 = scalar_select %p444_p10, %s15817_s26, 31  ;;  %vm486_vm0 = vcmask 130048   ;;  %vm707_vm1 = vcmask 261120  }
  0x19   : > { %14709 = vmatprep.subr.mxu0 %v462_v1  ;;  %15497 = vmatprep.subr.mxu1 %v699_v3  ;;  %v698_v4 = vld [vmem:[%s18223_s6 + $0x10] sm:$0xff]  ;;  %v697_v21 = vld [vmem:[%s18223_s6 + $0x8] sm:$0xff]  ;;  %v696_v22 = vld [vmem:[%s18223_s6] sm:$0xff]  ;;  %vm15680_vm2 = vmmov 0   ;;  %vm2357_vm3 = vcmask 1040384   ;;  %vm11959_vm4 = vcmask 1041409  }
  0x1a   : > { %14710 = vmatpush3.msra.mxu0 %v462_v1  ;;  %15501 = vmatpush3.msra.mxu1 %v699_v3  ;;  %s18231_s22 = sshll.u32 %s15827_s18, 3  ;;  %v13999_v23 = vld [vmem:[%s18222_s5] ss:$0 sm:$0xff]  ;;  %vm11962_vm5 = vcmask 1042434   ;;  %vm11965_vm6 = vcmask 1043459   ;;  %vm11968_vm7 = vcmask 1044484  }
  0x1b   : > { %14711 = vmatprep.subr.mxu0 %v461_v2  ;;  %15498 = vmatprep.subr.mxu1 %v698_v4  ;;  %s15835_s25 = scalar_lea.vmem %s18239_s1, %s18231_s22  ;;  %vm11971_vm8 = vcmask 1045509   ;;  %vm11974_vm9 = vcmask 1046534   ;;  %vm11977_vm10 = vcmask 1047559   ;;  %vm12205_vm11 = vcmask 31744  }
  0x1c   : > { %14712 = vmatpush3.msra.mxu0 %v461_v2  ;;  %15502 = vmatpush3.msra.mxu1 %v698_v4  ;;  %v463_v5 = vld [vmem:[%s15835_s25] sm:$0xff]  ;;  %v464_v6 = vld [vmem:[%s15835_s25 + $0x8] sm:$0xff]  ;;  %v465_v7 = vld [vmem:[%s15835_s25 + $0x10] sm:$0xff]  ;;  %vm12384_vm12 = vcmask 64545   ;;  %vm12566_vm13 = vcmask 97346   ;;  %vm12748_vm14 = vcmask 130147  }
  0x1d   : > { %14737 = vmatprep.subr.mxu0 %v699_v3  ;;  %14713 = vmatprep.mubr.msk.f32.mxu0 %vm486_vm0, %v463_v5  ;;  %v466_v8 = vld [vmem:[%s15835_s25 + $0x18] sm:$0xff]  ;;  %v467_v9 = vld [vmem:[%s15835_s25 + $0x20] sm:$0xff]  ;;  %v468_v10 = vld [vmem:[%s15835_s25 + $0x28] sm:$0xff]  ;;  %vm12386_vm15 = vcmask 64544  }
  0x1e   : > { %14714 = vmatmul.mubr.msk.f32.vlgmr.msra.gmra.mxu0 %vm486_vm0, %v464_v6  ;;  %v469_v11 = vld [vmem:[%s15835_s25 + $0x30] sm:$0xff]  ;;  %v470_v12 = vld [vmem:[%s15835_s25 + $0x38] sm:$0xff]  ;;  %v471_v13 = vld [vmem:[%s15835_s25 + $0x40] sm:$0xff]  ;;  %15499 = vmatprep.subr.mxu1 %v697_v21 }
  0x1f   : > { %14716 = vmatprep.mubr.msk.f32.mxu0 %vm486_vm0, %v465_v7  ;;  %14738 = vmatpush3.msra.mxu0 %v699_v3  ;;  %v472_v14 = vld [vmem:[%s15835_s25 + $0x48] sm:$0xff]  ;;  %v473_v15 = vld [vmem:[%s15835_s25 + $0x50] sm:$0xff]  ;;  %v474_v16 = vld [vmem:[%s15835_s25 + $0x58] sm:$0xff] }
  0x20   : > { %14739 = vmatprep.subr.mxu0 %v698_v4  ;;  %v475_v17 = vld [vmem:[%s15835_s25 + $0x60] sm:$0xff]  ;;  %v476_v18 = vld [vmem:[%s15835_s25 + $0x68] sm:$0xff]  ;;  %v477_v19 = vld [vmem:[%s15835_s25 + $0x70] sm:$0xff]  ;;  %15503 = vmatpush3.msra.mxu1 %v697_v21 }
  0x21   : > { %14740 = vmatpush3.msra.mxu0 %v698_v4  ;;  %v478_v20 = vld [vmem:[%s15835_s25 + $0x78] sm:$0xff]  ;;  %15500 = vmatprep.subr.mxu1 %v696_v22  ;;  %s15901_s25 = sshll.u32 %s15783_s0, 7  ;;  %s15684_s0 = smov 4  }
  0x22   : > { %14717 = vmatmul.mubr.msk.f32.gmra.mxu0 %vm486_vm0, %v466_v8  ;;  %14741 = vmatprep.subr.mxu0 %v697_v21  ;;  %v15679_v8 = vmov 0.0   ;;  %p450_p11 = scmp.lt.s32.totalorder %s15901_s25, 255 }
  0x23   : > { %14719 = vmatprep.mubr.msk.f32.mxu0 %vm486_vm0, %v467_v9  ;;  %14742 = vmatpush3.msra.mxu0 %v697_v21  ;;  %v15681_v9 = vmov 1966171168  }
  0x24   : > { %14743 = vmatprep.subr.mxu0 %v696_v22  ;;  %15504 = vmatpush3.msra.mxu1 %v696_v22  ;;  %s451_s27 = scalar_select %p450_p11, %s15901_s25, 255 }
  0x25   : > { %14744 = vmatpush3.msra.mxu0 %v696_v22  ;;  %14779 = vmatprep.subr.mxu1 %v15679_v8 }
  0x26   : > { %14720 = vmatmul.mubr.msk.f32.gmra.mxu0 %vm486_vm0, %v468_v10  ;;  %14769 = vmatprep.subr.mxu0 %v15679_v8  ;;  %v935_v10 = vunpack.c.l.s4 %v15681_v9  ;;  %s13996_s28 = sshll.u32 %s451_s27, 2  ;;  %s13436_s27 = sld [smem:[#allocation4]] }
  0x27   : > { %14722 = vmatprep.mubr.msk.f32.mxu0 %vm486_vm0, %v469_v11  ;;  %v937_v11 = vlaneseq  ;;  %s15916_s24 = scalar_lea.vmem %s18240_s2, %s13996_s28 }
  0x28   : > { %v1847_v21 = vld [vmem:[%s15916_s24 + $0x8] sm:$0x7] }
  0x2a   : > { %14723 = vmatmul.mubr.msk.f32.gmra.mxu0 %vm486_vm0, %v470_v12 }
  0x2b   : > { %14725 = vmatprep.mubr.msk.f32.mxu0 %vm486_vm0, %v471_v13  ;;  %v15908_v13 = vld [vmem:[%s18224_s7] ss:$0 sm:$0xff] }
  0x2e   : > { %14726 = vmatmul.mubr.msk.f32.gmra.mxu0 %vm486_vm0, %v472_v14  ;;  %v936_v14 = vunpack.c.0.s8 %v935_v10  ;;  %v1857_v10 = vld [vmem:[%s15916_s24 + $0x30] sm:$0x7] }
  0x2f   : > { %14728 = vmatprep.mubr.msk.f32.mxu0 %vm486_vm0, %v473_v15  ;;  %v15910_v15 = vshrl.u32 %v937_v11, 7 }
  0x32   : > { %14729 = vmatmul.mubr.msk.f32.gmra.mxu0 %vm486_vm0, %v474_v16 }
  0x33   : > { %14731 = vmatprep.mubr.msk.f32.mxu0 %vm486_vm0, %v475_v17 }
  0x36   : > { %14732 = vmatmul.mubr.msk.f32.gmra.mxu0 %vm486_vm0, %v476_v18 }
  0x37   : > { %14734 = vmatprep.mubr.msk.f32.mxu0 %vm486_vm0, %v477_v19  ;;  %v1845_v19 = vld [vmem:[%s15916_s24] sm:$0x7] }
  0x3a   : > { %14735 = vmatmul.mubr.msk.f32.gmra.mxu0 %vm486_vm0, %v478_v20  ;;  %v15922_v20 = vsub.s32 %v936_v14, %v15910_v15 }
  0xde   : > { %v14715_v24 = vpop.f32.mrf.mxu0 }
  0xdf   : > { %v607_v25 = vadd.f32 %v14715_v24, %v13999_v23  ;;  %v2101_v24 = vrot.slane %v1845_v19, 7 }
  0xe0   : > { %v601_v26 = vpop.f32.mrf.mxu0 }
  0xe1   : > { %v602_v27 = vadd.f32 %v13999_v23, %v601_v26  ;;  %v681_v31 = vmax.f32 %v607_v25, 0.0  ;;  %v2103_v25 = vrot.slane %v1847_v21, 7  ;;  %v1846_v26 = vld [vmem:[%s15916_s24 + $0x4] sm:$0x7] }
  0xe2   : > { %v14718_v28 = vpop.f32.mrf.mxu0 }
  0xe3   : > { %v680_v29 = vmax.f32 %v602_v27, 0.0  ;;  %v617_v30 = vadd.f32 %v14718_v28, %v13999_v23 }
  0xe4   : > { %v611_v32 = vpop.f32.mrf.mxu0 }
  0xe5   : > { %14745 = vmatprep.mubr.msk.f32.mxu0 %vm707_vm1, %v680_v29  ;;  %v612_v33 = vadd.f32 %v13999_v23, %v611_v32  ;;  %v683_v34 = vmax.f32 %v617_v30, 0.0 }
  0xe6   : > { %14746 = vmatmul.mubr.msk.f32.vlgmr.msra.gmra.mxu0 %vm707_vm1, %v681_v31  ;;  %v14721_v35 = vpop.f32.mrf.mxu0  ;;  %v1849_v31 = vld [vmem:[%s15916_s24 + $0x10] sm:$0x7] }
  0xe7   : > { %v682_v36 = vmax.f32 %v612_v33, 0.0  ;;  %v627_v37 = vadd.f32 %v14721_v35, %v13999_v23  ;;  %v2102_v35 = vrot.slane %v1846_v26, 7 }
  0xe8   : > { %v621_v38 = vpop.f32.mrf.mxu0 }
  0xe9   : > { %14748 = vmatprep.mubr.msk.f32.mxu0 %vm707_vm1, %v682_v36  ;;  %v622_v39 = vadd.f32 %v13999_v23, %v621_v38  ;;  %v685_v40 = vmax.f32 %v627_v37, 0.0  ;;  %v1848_v36 = vld [vmem:[%s15916_s24 + $0xc] sm:$0x7] }
  0xea   : > { %14749 = vmatmul.mubr.msk.f32.gmra.mxu0 %vm707_vm1, %v683_v34  ;;  %v14724_v41 = vpop.f32.mrf.mxu0 }
  0xeb   : > { %v684_v42 = vmax.f32 %v622_v39, 0.0  ;;  %v637_v43 = vadd.f32 %v14724_v41, %v13999_v23  ;;  %v1851_v41 = vld [vmem:[%s15916_s24 + $0x18] sm:$0x7] }
  0xec   : > { %v631_v44 = vpop.f32.mrf.mxu0 }
  0xed   : > { %14751 = vmatprep.mubr.msk.f32.mxu0 %vm707_vm1, %v684_v42  ;;  %v632_v45 = vadd.f32 %v13999_v23, %v631_v44  ;;  %v687_v46 = vmax.f32 %v637_v43, 0.0 }
  0xee   : > { %14752 = vmatmul.mubr.msk.f32.gmra.mxu0 %vm707_vm1, %v685_v40  ;;  %v14727_v47 = vpop.f32.mrf.mxu0  ;;  %v2105_v40 = vrot.slane %v1849_v31, 7 }
  0xef   : > { %v686_v48 = vmax.f32 %v632_v45, 0.0  ;;  %v647_v49 = vadd.f32 %v14727_v47, %v13999_v23  ;;  %14771 = vmatprep.mubr.msk.f32.mxu0 %vm15680_vm2, %v15679_v8  ;;  %v2104_v45 = vrot.slane %v1848_v36, 7 }
  0xf0   : > { %v641_v50 = vpop.f32.mrf.mxu0 }
  0xf1   : > { %14754 = vmatprep.mubr.msk.f32.mxu1 %vm707_vm1, %v686_v48  ;;  %v642_v51 = vadd.f32 %v13999_v23, %v641_v50  ;;  %v689_v52 = vmax.f32 %v647_v49, 0.0 }
  0xf2   : > { %14755 = vmatmul.mubr.msk.f32.vlgmr.msra.gmra.mxu1 %vm707_vm1, %v687_v46  ;;  %v14730_v53 = vpop.f32.mrf.mxu0  ;;  %v1850_v46 = vld [vmem:[%s15916_s24 + $0x14] sm:$0x7] }
  0xf3   : > { %v688_v54 = vmax.f32 %v642_v51, 0.0  ;;  %v657_v55 = vadd.f32 %v14730_v53, %v13999_v23  ;;  %v2107_v51 = vrot.slane %v1851_v41, 7 }
  0xf4   : > { %v651_v56 = vpop.f32.mrf.mxu0 }
  0xf5   : > { %14757 = vmatprep.mubr.msk.f32.mxu1 %vm707_vm1, %v688_v54  ;;  %v652_v57 = vadd.f32 %v13999_v23, %v651_v56  ;;  %v691_v58 = vmax.f32 %v657_v55, 0.0  ;;  %v2106_v55 = vrot.slane %v1850_v46, 7  ;;  %v1852_v56 = vld [vmem:[%s15916_s24 + $0x1c] sm:$0x7] }
  0xf6   : > { %14758 = vmatmul.mubr.msk.f32.gmra.mxu1 %vm707_vm1, %v689_v52  ;;  %v14733_v59 = vpop.f32.mrf.mxu0  ;;  %v1853_v52 = vld [vmem:[%s15916_s24 + $0x20] sm:$0x7] }
  0xf7   : > { %v690_v60 = vmax.f32 %v652_v57, 0.0  ;;  %v667_v61 = vadd.f32 %v14733_v59, %v13999_v23 }
  0xf8   : > { %v661_v62 = vpop.f32.mrf.mxu0 }
  0xf9   : > { %14760 = vmatprep.mubr.msk.f32.mxu1 %vm707_vm1, %v690_v60  ;;  %v662_v63 = vadd.f32 %v13999_v23, %v661_v62  ;;  %v693_v0 = vmax.f32 %v667_v61, 0.0  ;;  %v2109_v61 = vrot.slane %v1853_v52, 7 }
  0xfa   : > { %14761 = vmatmul.mubr.msk.f32.gmra.mxu1 %vm707_vm1, %v691_v58  ;;  %v14736_v1 = vpop.f32.mrf.mxu0 }
  0xfb   : > { %v692_v2 = vmax.f32 %v662_v63, 0.0  ;;  %v677_v3 = vadd.f32 %v14736_v1, %v13999_v23  ;;  %v1855_v63 = vld [vmem:[%s15916_s24 + $0x28] sm:$0x7] }
  0xfc   : > { %v671_v4 = vpop.f32.mrf.mxu0  ;;  %v2111_v9 = vrot.slane %v1855_v63, 7  ;;  %v1867_v63 = vld [vmem:[%s15916_s24 + $0x58] sm:$0x7] }
  0xfd   : > { %v672_v5 = vadd.f32 %v13999_v23, %v671_v4  ;;  %14763 = vmatprep.mubr.msk.f32.mxu1 %vm707_vm1, %v692_v2  ;;  %v695_v6 = vmax.f32 %v677_v3, 0.0  ;;  %v2108_v2 = vrot.slane %v1852_v56, 7  ;;  %v1854_v4 = vld [vmem:[%s15916_s24 + $0x24] sm:$0x7] }
  0xfe   : > { %14764 = vmatmul.mubr.msk.f32.gmra.mxu1 %vm707_vm1, %v693_v0 }
  0xff   : > { %v694_v7 = vmax.f32 %v672_v5, 0.0 }
 0x101   : > { %14766 = vmatprep.mubr.msk.f32.mxu1 %vm707_vm1, %v694_v7 }
 0x102   : > { %14767 = vmatmul.mubr.msk.f32.gmra.mxu1 %vm707_vm1, %v695_v6 }
 0x103   : > { %14781 = vmatprep.mubr.msk.f32.mxu1 %vm15680_vm2, %v15679_v8 }
 0x1a6   : > { %v14747_v12 = vpop.f32.mrf.mxu0 }
 0x1a7   : > { %v828_v27 = vadd.f32 %v14747_v12, %v15908_v13 }
 0x1a8   : > { %v822_v16 = vpop.f32.mrf.mxu0 }
 0x1a9   : > { %v823_v17 = vadd.f32 %v15908_v13, %v822_v16  ;;  %v15938_v37 = vmax.f32 %v828_v27, 0.0  ;;  %v2110_v16 = vrot.slane %v1854_v4, 7  ;;  %v1866_v4 = vld [vmem:[%s15916_s24 + $0x54] sm:$0x7] }
 0x1aa   : > { %v15952_v47 = vpop.f32.mrf.mxu0 }
 0x1ab   : > { %v15918_v18 = vmax.f32 %v823_v17, 0.0  ;;  %v989_v48 = vrot.slane %v15938_v37, %v15922_v20  ;;  %v982_v58 = vcombine.high %v15938_v37, %v15938_v37  ;;  %v1856_v17 = vld [vmem:[%s15916_s24 + $0x2c] sm:$0x7] }
 0x1ac   : > { %v832_v57 = vpop.f32.mrf.mxu0 }
 0x1ad   : > { %v933_v22 = vcombine.high %v15918_v18, %v15918_v18  ;;  %v940_v23 = vrot.slane %v15918_v18, %v15922_v20  ;;  %v1005_v59 = vrot.slane %v989_v48, %v15922_v20  ;;  %v997_v62 = vcombine.high %v989_v48, %v989_v48 }
 0x1ae   : > { %v833_v3 = vadd.f32 %v15908_v13, %v832_v57  ;;  %v996_v5 = vrot.slane %v982_v58, %v15922_v20  ;;  %v1864_v58 = vld [vmem:[%s15916_s24 + $0x4c] sm:$0x7] }
 0x1af   : > { %v947_v28 = vrot.slane %v933_v22, %v15922_v20  ;;  %v948_v29 = vcombine.high %v940_v23, %v940_v23  ;;  %v956_v30 = vrot.slane %v940_v23, %v15922_v20  ;;  %v1027_v6 = vcombine.high %v1005_v59, %v1005_v59 }
 0x1b0   : > { %v2366_v7 = vsel %vm2357_vm3, %v1005_v59, %v2109_v61  ;;  %v1019_v11 = vrot.slane %v997_v62, %v15922_v20  ;;  %v16001_v14 = vmax.f32 %v833_v3, 0.0  ;;  %v1012_v19 = vrot.slane %v996_v5, %v15922_v20 }
 0x1b1   : > { %v2358_v32 = vsel %vm2357_vm3, %v956_v30, %v2101_v24  ;;  %v978_v33 = vcombine.high %v956_v30, %v956_v30  ;;  %v970_v34 = vrot.slane %v948_v29, %v15922_v20  ;;  %v963_v39 = vrot.slane %v947_v28, %v15922_v20  ;;  %v1859_v24 = vld [vmem:[%s15916_s24 + $0x38] sm:$0x7]  ;;  %v1858_v29 = vld [vmem:[%s15916_s24 + $0x34] sm:$0x7]  ;;  %v1861_v30 = vld [vmem:[%s15916_s24 + $0x40] sm:$0x7] }
 0x1b2   : > { %14770 = vmatpush3.xpose.msk.msra.mxu0 %vm486_vm0, %v2358_v32  ;;  %v949_v42 = vcombine.high %v947_v28, %v947_v28  ;;  %v2368_v21 = vsel %vm2357_vm3, %v1027_v6, %v2111_v9  ;;  %v2113_v22 = vrot.slane %v1857_v10, 7  ;;  %v998_v23 = vcombine.high %v996_v5, %v996_v5  ;;  %v16091_v5 = vpop.f32.mrf.mxu0 }
 0x1b3   : > { %v2360_v38 = vsel %vm2357_vm3, %v978_v33, %v2103_v25  ;;  %14774 = vmatprep.subr.mxu0 %v15679_v8  ;;  %v2359_v43 = vsel %vm2357_vm3, %v970_v34, %v2102_v35  ;;  %v980_v44 = vcombine.high %v970_v34, %v970_v34  ;;  %v2362_v49 = vsel %vm2357_vm3, %v963_v39, %v2105_v40  ;;  %v1860_v40 = vld [vmem:[%s15916_s24 + $0x3c] sm:$0x7] }
 0x1b4   : > { %14780 = vmatpush3.xpose.msk.msra.mxu1 %vm486_vm0, %v2360_v38  ;;  %v979_v50 = vcombine.high %v963_v39, %v963_v39  ;;  %v977_v54 = vrot.slane %v949_v42, %v15922_v20  ;;  %v1038_v25 = vrot.slane %v16001_v14, %v15922_v20  ;;  %v2367_v26 = vsel %vm2357_vm3, %v1019_v11, %v2110_v16 }
 0x1b5   : > { %14772 = vmatmul.mubr.msk.f32.vlgmr.msra.gmra.mxu0 %vm486_vm0, %v2358_v32  ;;  %14789 = vmatprep.subr.mxu1 %v15679_v8  ;;  %v2361_v53 = vsel %vm2357_vm3, %v980_v44, %v2104_v45  ;;  %v1029_v27 = vcombine.high %v1019_v11, %v1019_v11  ;;  %v2112_v28 = vrot.slane %v1856_v17, 7  ;;  %v2370_v31 = vsel %vm2357_vm3, %v1012_v19, %v2113_v22  ;;  %v1863_v44 = vld [vmem:[%s15916_s24 + $0x48] sm:$0x7]  ;;  %v1869_v11 = vld [vmem:[%s15916_s24 + $0x60] sm:$0x7] }
 0x1b6   : > { %14775 = vmatpush3.xpose.msk.msra.mxu0 %vm486_vm0, %v2359_v43  ;;  %14776 = vmatprep.mubr.msk.f32.mxu0 %vm15680_vm2, %v15679_v8  ;;  %v2364_v60 = vsel %vm2357_vm3, %v979_v50, %v2107_v51  ;;  %v2363_v0 = vsel %vm2357_vm3, %v977_v54, %v2106_v55  ;;  %v981_v1 = vcombine.high %v977_v54, %v977_v54  ;;  %v2115_v33 = vrot.slane %v1859_v24, 7  ;;  %v1862_v50 = vld [vmem:[%s15916_s24 + $0x44] sm:$0x7]  ;;  %v1865_v55 = vld [vmem:[%s15916_s24 + $0x50] sm:$0x7] }
 0x1b7   : > { %14782 = vmatmul.mubr.msk.f32.vlgmr.msra.gmra.mxu1 %vm486_vm0, %v2360_v38  ;;  %14784 = vmatprep.subr.mxu0 %v15679_v8  ;;  %v1028_v32 = vcombine.high %v1012_v19, %v1012_v19  ;;  %v2114_v34 = vrot.slane %v1858_v29, 7  ;;  %v1054_v35 = vrot.slane %v1038_v25, %v15922_v20  ;;  %v2369_v36 = vsel %vm2357_vm3, %v1029_v27, %v2112_v28  ;;  %v1868_v19 = vld [vmem:[%s15916_s24 + $0x5c] sm:$0x7]  ;;  %v1871_v27 = vld [vmem:[%s15916_s24 + $0x68] sm:$0x7] }
 0x1b8   : > { %14790 = vmatpush3.xpose.msk.msra.mxu1 %vm486_vm0, %v2362_v49  ;;  %14791 = vmatprep.mubr.msk.f32.mxu1 %vm15680_vm2, %v15679_v8  ;;  %v2365_v12 = vsel %vm2357_vm3, %v981_v1, %v2108_v2  ;;  %v1026_v38 = vrot.slane %v998_v23, %v15922_v20  ;;  %v2117_v39 = vrot.slane %v1861_v30, 7  ;;  %v1031_v41 = vcombine.high %v16001_v14, %v16001_v14 }
 0x1b9   : > { %14777 = vmatmul.mubr.msk.f32.vlgmr.msra.gmra.mxu0 %vm486_vm0, %v2359_v43  ;;  %14799 = vmatprep.subr.mxu1 %v15679_v8  ;;  %v2372_v42 = vsel %vm2357_vm3, %v1028_v32, %v2115_v33  ;;  %v1046_v43 = vcombine.high %v1038_v25, %v1038_v25  ;;  %v838_v51 = vadd.f32 %v15952_v47, %v15908_v13  ;;  %v2119_v54 = vrot.slane %v1863_v44, 7  ;;  %v1870_v32 = vld [vmem:[%s15916_s24 + $0x64] sm:$0x7] }
 0x1ba   : > { %14785 = vmatpush3.xpose.msk.msra.mxu0 %vm486_vm0, %v2361_v53  ;;  %14786 = vmatprep.mubr.msk.f32.mxu0 %vm15680_vm2, %v15679_v8  ;;  %v2371_v45 = vsel %vm2357_vm3, %v1026_v38, %v2114_v34  ;;  %v2374_v46 = vsel %vm2357_vm3, %v1054_v35, %v2117_v39  ;;  %v1030_v48 = vcombine.high %v1026_v38, %v1026_v38  ;;  %v2118_v57 = vrot.slane %v1862_v50, 7  ;;  %v1873_v38 = vld [vmem:[%s15916_s24 + $0x70] sm:$0x7] }
 0x1bb   : > { %14792 = vmatmul.mubr.msk.f32.vlgmr.msra.gmra.mxu1 %vm486_vm0, %v2362_v49  ;;  %14794 = vmatprep.subr.mxu0 %v15679_v8  ;;  %v2116_v49 = vrot.slane %v1860_v40, 7  ;;  %v1045_v52 = vrot.slane %v1031_v41, %v15922_v20  ;;  %v1068_v56 = vrot.slane %v1046_v43, %v15922_v20  ;;  %v16074_v59 = vmax.f32 %v838_v51, 0.0  ;;  %v1872_v43 = vld [vmem:[%s15916_s24 + $0x6c] sm:$0x7] }
 0x1bc   : > { %14800 = vmatpush3.xpose.msk.msra.mxu1 %vm486_vm0, %v2364_v60  ;;  %14801 = vmatprep.mubr.msk.f32.mxu1 %vm15680_vm2, %v15679_v8  ;;  %v2121_v62 = vrot.slane %v1865_v55, 7  ;;  %v2120_v3 = vrot.slane %v1864_v58, 7  ;;  %v2123_v10 = vrot.slane %v1867_v63, 7  ;;  %v2122_v17 = vrot.slane %v1866_v4, 7  ;;  %v1877_v55 = vld [vmem:[%s15916_s24 + $0x80] sm:$0x7] }
 0x1bd   : > { %14787 = vmatmul.mubr.msk.f32.vlgmr.msra.gmra.mxu0 %vm486_vm0, %v2361_v53  ;;  %14809 = vmatprep.subr.mxu1 %v15679_v8  ;;  %v1076_v53 = vcombine.high %v1054_v35, %v1054_v35  ;;  %v2373_v47 = vsel %vm2357_vm3, %v1030_v48, %v2116_v49  ;;  %v1061_v61 = vrot.slane %v1045_v52, %v15922_v20  ;;  %v2125_v25 = vrot.slane %v1869_v11, 7  ;;  %v1875_v49 = vld [vmem:[%s15916_s24 + $0x78] sm:$0x7]  ;;  %v1879_v4 = vld [vmem:[%s15916_s24 + $0x88] sm:$0x7] }
 0x1be   : > { %14795 = vmatpush3.xpose.msk.msra.mxu0 %vm486_vm0, %v2363_v0  ;;  %14796 = vmatprep.mubr.msk.f32.mxu0 %vm15680_vm2, %v15679_v8  ;;  %v2375_v1 = vsel %vm2357_vm3, %v1068_v56, %v2118_v57  ;;  %v1078_v2 = vcombine.high %v1068_v56, %v1068_v56  ;;  %v1087_v6 = vrot.slane %v16074_v59, %v15922_v20  ;;  %v2124_v30 = vrot.slane %v1868_v19, 7  ;;  %v1878_v11 = vld [vmem:[%s15916_s24 + $0x84] sm:$0x7] }
 0x1bf   : > { %14802 = vmatmul.mubr.msk.f32.vlgmr.msra.gmra.mxu1 %vm486_vm0, %v2364_v60  ;;  %14804 = vmatprep.subr.mxu0 %v15679_v8  ;;  %v2376_v60 = vsel %vm2357_vm3, %v1076_v53, %v2119_v54  ;;  %v1077_v9 = vcombine.high %v1061_v61, %v1061_v61  ;;  %v1080_v22 = vcombine.high %v16074_v59, %v16074_v59  ;;  %v2128_v53 = vrot.slane %v1872_v43, 7  ;;  %v1874_v54 = vld [vmem:[%s15916_s24 + $0x74] sm:$0x7] }
 0x1c0   : > { %14810 = vmatpush3.xpose.msk.msra.mxu1 %vm486_vm0, %v2366_v7  ;;  %14811 = vmatprep.mubr.msk.f32.mxu1 %vm15680_vm2, %v15679_v8  ;;  %v1103_v23 = vrot.slane %v1087_v6, %v15922_v20  ;;  %v2131_v57 = vrot.slane %v1875_v49, 7  ;;  %v2130_v58 = vrot.slane %v1874_v54, 7  ;;  %v2133_v63 = vrot.slane %v1877_v55, 7  ;;  %v1887_v54 = vld [vmem:[%s15916_s24 + $0xa8] sm:$0x7] }
 0x1c1   : > { %14797 = vmatmul.mubr.msk.f32.vlgmr.msra.gmra.mxu0 %vm486_vm0, %v2363_v0  ;;  %14819 = vmatprep.subr.mxu1 %v15679_v8  ;;  %v1047_v0 = vcombine.high %v1045_v52, %v1045_v52  ;;  %v2380_v24 = vsel %vm2357_vm3, %v1077_v9, %v2123_v10  ;;  %v1094_v33 = vrot.slane %v1080_v22, %v15922_v20  ;;  %v2135_v19 = vrot.slane %v1879_v4, 7 }
 0x1c2   : > { %14805 = vmatpush3.xpose.msk.msra.mxu0 %vm486_vm0, %v2365_v12  ;;  %14806 = vmatprep.mubr.msk.f32.mxu0 %vm15680_vm2, %v15679_v8  ;;  %v1125_v34 = vcombine.high %v1103_v23, %v1103_v23  ;;  %v2382_v35 = vsel %vm2357_vm3, %v1103_v23, %v2125_v25  ;;  %v2134_v23 = vrot.slane %v1878_v11, 7 }
 0x1c3   : > { %14812 = vmatmul.mubr.msk.f32.vlgmr.msra.gmra.mxu1 %vm486_vm0, %v2366_v7  ;;  %14814 = vmatprep.subr.mxu0 %v15679_v8  ;;  %v2378_v7 = vsel %vm2357_vm3, %v1061_v61, %v2121_v62  ;;  %v1075_v16 = vrot.slane %v1047_v0, %v15922_v20  ;;  %v1110_v44 = vrot.slane %v1094_v33, %v15922_v20  ;;  %v1876_v0 = vld [vmem:[%s15916_s24 + $0x7c] sm:$0x7] }
 0x1c4   : > { %14820 = vmatpush3.xpose.msk.msra.mxu1 %vm486_vm0, %v2368_v21  ;;  %14821 = vmatprep.mubr.msk.f32.mxu1 %vm15680_vm2, %v15679_v8  ;;  %v1096_v48 = vcombine.high %v1094_v33, %v1094_v33  ;;  %v2132_v10 = vrot.slane %v1876_v0, 7  ;;  %v1889_v0 = vld [vmem:[%s15916_s24 + $0xb0] sm:$0x7] }
 0x1c5   : > { %14807 = vmatmul.mubr.msk.f32.vlgmr.msra.gmra.mxu0 %vm486_vm0, %v2365_v12  ;;  %14829 = vmatprep.subr.mxu1 %v15679_v8  ;;  %v2377_v12 = vsel %vm2357_vm3, %v1078_v2, %v2120_v3  ;;  %v2379_v28 = vsel %vm2357_vm3, %v1075_v16, %v2122_v17  ;;  %v1079_v29 = vcombine.high %v1075_v16, %v1075_v16 }
 0x1c6   : > { %14815 = vmatpush3.xpose.msk.msra.mxu0 %vm486_vm0, %v2367_v26  ;;  %14816 = vmatprep.mubr.msk.f32.mxu0 %vm15680_vm2, %v15679_v8  ;;  %v1126_v56 = vcombine.high %v1110_v44, %v1110_v44  ;;  %v1124_v62 = vrot.slane %v1096_v48, %v15922_v20 }
 0x1c7   : > { %14822 = vmatmul.mubr.msk.f32.vlgmr.msra.gmra.mxu1 %vm486_vm0, %v2368_v21  ;;  %14824 = vmatprep.subr.mxu0 %v15679_v8  ;;  %v842_v21 = vpop.f32.mrf.mxu0  ;;  %v2381_v40 = vsel %vm2357_vm3, %v1079_v29, %v2124_v30  ;;  %v1883_v29 = vld [vmem:[%s15916_s24 + $0x98] sm:$0x7] }
 0x1c8   : > { %14830 = vmatpush3.xpose.msk.msra.mxu1 %vm486_vm0, %v2370_v31  ;;  %14831 = vmatprep.mubr.msk.f32.mxu1 %vm15680_vm2, %v15679_v8  ;;  %v2388_v2 = vsel %vm2357_vm3, %v1126_v56, %v2131_v57  ;;  %v1128_v9 = vcombine.high %v1124_v62, %v1124_v62 }
 0x1c9   : > { %14817 = vmatmul.mubr.msk.f32.vlgmr.msra.gmra.mxu0 %vm486_vm0, %v2367_v26  ;;  %14839 = vmatprep.subr.mxu1 %v15679_v8  ;;  %v1095_v26 = vcombine.high %v1087_v6, %v1087_v6  ;;  %v2387_v6 = vsel %vm2357_vm3, %v1124_v62, %v2130_v58  ;;  %v1886_v58 = vld [vmem:[%s15916_s24 + $0xa4] sm:$0x7] }
 0x1ca   : > { %14825 = vmatpush3.xpose.msk.msra.mxu0 %vm486_vm0, %v2369_v36  ;;  %14826 = vmatprep.mubr.msk.f32.mxu0 %vm15680_vm2, %v15679_v8  ;;  %v2142_v4 = vrot.slane %v1886_v58, 7 }
 0x1cb   : > { %14832 = vmatmul.mubr.msk.f32.vlgmr.msra.gmra.mxu1 %vm486_vm0, %v2370_v31  ;;  %14834 = vmatprep.subr.mxu0 %v15679_v8  ;;  %v843_v31 = vadd.f32 %v15908_v13, %v842_v21  ;;  %v1117_v39 = vrot.slane %v1095_v26, %v15922_v20  ;;  %v1881_v21 = vld [vmem:[%s15916_s24 + $0x90] sm:$0x7] }
 0x1cc   : > { %14840 = vmatpush3.xpose.msk.msra.mxu1 %vm486_vm0, %v2372_v42  ;;  %14841 = vmatprep.mubr.msk.f32.mxu1 %vm15680_vm2, %v15679_v8 }
 0x1cd   : > { %14827 = vmatmul.mubr.msk.f32.vlgmr.msra.gmra.mxu0 %vm486_vm0, %v2369_v36  ;;  %14849 = vmatprep.subr.mxu1 %v15679_v8  ;;  %v2127_v36 = vrot.slane %v1871_v27, 7  ;;  %v16140_v41 = vmax.f32 %v843_v31, 0.0  ;;  %v1127_v52 = vcombine.high %v1117_v39, %v1117_v39 }
 0x1ce   : > { %14835 = vmatpush3.xpose.msk.msra.mxu0 %vm486_vm0, %v2371_v45  ;;  %14836 = vmatprep.mubr.msk.f32.mxu0 %vm15680_vm2, %v15679_v8 }
 0x1cf   : > { %14842 = vmatmul.mubr.msk.f32.vlgmr.msra.gmra.mxu1 %vm486_vm0, %v2372_v42  ;;  %14844 = vmatprep.subr.mxu0 %v15679_v8  ;;  %v2126_v42 = vrot.slane %v1870_v32, 7  ;;  %v1136_v50 = vrot.slane %v16140_v41, %v15922_v20  ;;  %v2385_v61 = vsel %vm2357_vm3, %v1127_v52, %v2128_v53 }
 0x1d0   : > { %14850 = vmatpush3.xpose.msk.msra.mxu1 %vm486_vm0, %v2374_v46  ;;  %14851 = vmatprep.mubr.msk.f32.mxu1 %vm15680_vm2, %v15679_v8 }
 0x1d1   : > { %14837 = vmatmul.mubr.msk.f32.vlgmr.msra.gmra.mxu0 %vm486_vm0, %v2371_v45  ;;  %14859 = vmatprep.subr.mxu1 %v15679_v8  ;;  %v2384_v45 = vsel %vm2357_vm3, %v1125_v34, %v2127_v36  ;;  %v2383_v51 = vsel %vm2357_vm3, %v1117_v39, %v2126_v42  ;;  %v1144_v3 = vcombine.high %v1136_v50, %v1136_v50  ;;  %v1882_v34 = vld [vmem:[%s15916_s24 + $0x94] sm:$0x7]  ;;  %v1885_v42 = vld [vmem:[%s15916_s24 + $0xa0] sm:$0x7] }
 0x1d2   : > { %14845 = vmatpush3.xpose.msk.msra.mxu0 %vm486_vm0, %v2373_v47  ;;  %14846 = vmatprep.mubr.msk.f32.mxu0 %vm15680_vm2, %v15679_v8  ;;  %v2141_v52 = vrot.slane %v1885_v42, 7 }
 0x1d3   : > { %14852 = vmatmul.mubr.msk.f32.vlgmr.msra.gmra.mxu1 %vm486_vm0, %v2374_v46  ;;  %14854 = vmatprep.subr.mxu0 %v15679_v8  ;;  %v2129_v46 = vrot.slane %v1873_v38, 7  ;;  %v1166_v22 = vrot.slane %v1144_v3, %v15922_v20 }
 0x1d4   : > { %14860 = vmatpush3.xpose.msk.msra.mxu1 %vm486_vm0, %v2376_v60  ;;  %14861 = vmatprep.mubr.msk.f32.mxu1 %vm15680_vm2, %v15679_v8 }
 0x1d5   : > { %14847 = vmatmul.mubr.msk.f32.vlgmr.msra.gmra.mxu0 %vm486_vm0, %v2373_v47  ;;  %14869 = vmatprep.subr.mxu1 %v15679_v8  ;;  %v2386_v47 = vsel %vm2357_vm3, %v1110_v44, %v2129_v46  ;;  %v2391_v31 = vsel %vm2357_vm3, %v1166_v22, %v2134_v23  ;;  %v1176_v32 = vcombine.high %v1166_v22, %v1166_v22  ;;  %v1884_v46 = vld [vmem:[%s15916_s24 + $0x9c] sm:$0x7]  ;;  %v1893_v22 = vld [vmem:[%s15916_s24 + $0xc0] sm:$0x7] }
 0x1d6   : > { %14855 = vmatpush3.xpose.msk.msra.mxu0 %vm486_vm0, %v2375_v1  ;;  %14856 = vmatprep.mubr.msk.f32.mxu0 %vm15680_vm2, %v15679_v8  ;;  %v2140_v56 = vrot.slane %v1884_v46, 7 }
 0x1d7   : > { %14862 = vmatmul.mubr.msk.f32.vlgmr.msra.gmra.mxu1 %vm486_vm0, %v2376_v60  ;;  %14864 = vmatprep.subr.mxu0 %v15679_v8  ;;  %v1152_v60 = vrot.slane %v1136_v50, %v15922_v20 }
 0x1d8   : > { %14870 = vmatpush3.xpose.msk.msra.mxu1 %vm486_vm0, %v2378_v7  ;;  %14871 = vmatprep.mubr.msk.f32.mxu1 %vm15680_vm2, %v15679_v8 }
 0x1d9   : > { %14857 = vmatmul.mubr.msk.f32.vlgmr.msra.gmra.mxu0 %vm486_vm0, %v2375_v1  ;;  %14879 = vmatprep.subr.mxu1 %v15679_v8  ;;  %v1129_v1 = vcombine.high %v16140_v41, %v16140_v41  ;;  %v1174_v17 = vcombine.high %v1152_v60, %v1152_v60 }
 0x1da   : > { %14865 = vmatpush3.xpose.msk.msra.mxu0 %vm486_vm0, %v2377_v12  ;;  %14866 = vmatprep.mubr.msk.f32.mxu0 %vm15680_vm2, %v15679_v8 }
 0x1db   : > { %14872 = vmatmul.mubr.msk.f32.vlgmr.msra.gmra.mxu1 %vm486_vm0, %v2378_v7  ;;  %14874 = vmatprep.subr.mxu0 %v15679_v8  ;;  %v2390_v7 = vsel %vm2357_vm3, %v1152_v60, %v2133_v63  ;;  %v1143_v16 = vrot.slane %v1129_v1, %v15922_v20  ;;  %v2392_v26 = vsel %vm2357_vm3, %v1174_v17, %v2135_v19  ;;  %v2143_v63 = vrot.slane %v1887_v54, 7 }
 0x1dc   : > { %14880 = vmatpush3.xpose.msk.msra.mxu1 %vm486_vm0, %v2380_v24  ;;  %14881 = vmatprep.mubr.msk.f32.mxu1 %vm15680_vm2, %v15679_v8 }
 0x1dd   : > { %14867 = vmatmul.mubr.msk.f32.vlgmr.msra.gmra.mxu0 %vm486_vm0, %v2377_v12  ;;  %14889 = vmatprep.subr.mxu1 %v15679_v8  ;;  %v848_v12 = vadd.f32 %v16091_v5, %v15908_v13  ;;  %v2389_v5 = vsel %vm2357_vm3, %v1128_v9, %v2132_v10  ;;  %v1159_v27 = vrot.slane %v1143_v16, %v15922_v20  ;;  %v2145_v10 = vrot.slane %v1889_v0, 7 }
 0x1de   : > { %14875 = vmatpush3.xpose.msk.msra.mxu0 %vm486_vm0, %v2379_v28  ;;  %14876 = vmatprep.mubr.msk.f32.mxu0 %vm15680_vm2, %v15679_v8  ;;  %v1145_v30 = vcombine.high %v1143_v16, %v1143_v16 }
 0x1df   : > { %14882 = vmatmul.mubr.msk.f32.vlgmr.msra.gmra.mxu1 %vm486_vm0, %v2380_v24  ;;  %14884 = vmatprep.subr.mxu0 %v15679_v8  ;;  %v1880_v24 = vld [vmem:[%s15916_s24 + $0x8c] sm:$0x7]  ;;  %v16213_v25 = vmax.f32 %v848_v12, 0.0  ;;  %v1175_v39 = vcombine.high %v1159_v27, %v1159_v27  ;;  %v1891_v12 = vld [vmem:[%s15916_s24 + $0xb8] sm:$0x7] }
 0x1e0   : > { %14890 = vmatpush3.xpose.msk.msra.mxu1 %vm486_vm0, %v2382_v35  ;;  %14891 = vmatprep.mubr.msk.f32.mxu1 %vm15680_vm2, %v15679_v8  ;;  %v2136_v33 = vrot.slane %v1880_v24, 7  ;;  %v1173_v44 = vrot.slane %v1145_v30, %v15922_v20 }
 0x1e1   : > { %14877 = vmatmul.mubr.msk.f32.vlgmr.msra.gmra.mxu0 %vm486_vm0, %v2379_v28  ;;  %14899 = vmatprep.subr.mxu1 %v15679_v8  ;;  %v2137_v28 = vrot.slane %v1881_v21, 7  ;;  %v1185_v36 = vrot.slane %v16213_v25, %v15922_v20  ;;  %v1178_v49 = vcombine.high %v16213_v25, %v16213_v25 }
 0x1e2   : > { %14885 = vmatpush3.xpose.msk.msra.mxu0 %vm486_vm0, %v2381_v40  ;;  %14886 = vmatprep.mubr.msk.f32.mxu0 %vm15680_vm2, %v15679_v8  ;;  %v2393_v43 = vsel %vm2357_vm3, %v1176_v32, %v2136_v33  ;;  %v1892_v32 = vld [vmem:[%s15916_s24 + $0xbc] sm:$0x7] }
 0x1e3   : > { %14892 = vmatmul.mubr.msk.f32.vlgmr.msra.gmra.mxu1 %vm486_vm0, %v2382_v35  ;;  %14894 = vmatprep.subr.mxu0 %v15679_v8  ;;  %v16230_v35 = vpop.f32.mrf.mxu1  ;;  %v2394_v38 = vsel %vm2357_vm3, %v1159_v27, %v2137_v28  ;;  %v1201_v50 = vrot.slane %v1185_v36, %v15922_v20  ;;  %v1193_v53 = vcombine.high %v1185_v36, %v1185_v36 }
 0x1e4   : > { %14900 = vmatpush3.xpose.msk.msra.mxu1 %vm486_vm0, %v2384_v45  ;;  %14901 = vmatprep.mubr.msk.f32.mxu1 %vm15680_vm2, %v15679_v8  ;;  %v1192_v60 = vrot.slane %v1178_v49, %v15922_v20 }
 0x1e5   : > { %14887 = vmatmul.mubr.msk.f32.vlgmr.msra.gmra.mxu0 %vm486_vm0, %v2381_v40  ;;  %14909 = vmatprep.subr.mxu1 %v15679_v8  ;;  %v2139_v40 = vrot.slane %v1883_v29, 7  ;;  %v852_v48 = vpop.f32.mrf.mxu1  ;;  %v2398_v62 = vsel %vm2357_vm3, %v1201_v50, %v2141_v52  ;;  %v1215_v1 = vrot.slane %v1193_v53, %v15922_v20  ;;  %v1896_v53 = vld [vmem:[%s15916_s24 + $0xcc] sm:$0x7] }
 0x1e6   : > { %14895 = vmatpush3.xpose.msk.msra.mxu0 %vm486_vm0, %v2383_v51  ;;  %14896 = vmatprep.mubr.msk.f32.mxu0 %vm15680_vm2, %v15679_v8  ;;  %v853_v57 = vadd.f32 %v15908_v13, %v852_v48  ;;  %v1194_v11 = vcombine.high %v1192_v60, %v1192_v60 }
 0x1e7   : > { %14902 = vmatmul.mubr.msk.f32.vlgmr.msra.gmra.mxu1 %vm486_vm0, %v2384_v45  ;;  %14904 = vmatprep.subr.mxu0 %v15679_v8  ;;  %v2138_v45 = vrot.slane %v1882_v34, 7  ;;  %v2399_v17 = vsel %vm2357_vm3, %v1215_v1, %v2142_v4  ;;  %v1225_v19 = vcombine.high %v1215_v1, %v1215_v1  ;;  %v16369_v0 = vpop.f32.mrf.mxu1 }
 0x1e8   : > { %14910 = vmatpush3.xpose.msk.msra.mxu1 %vm486_vm0, %v2386_v47  ;;  %14911 = vmatprep.mubr.msk.f32.mxu1 %vm15680_vm2, %v15679_v8  ;;  %v16279_v3 = vmax.f32 %v853_v57, 0.0  ;;  %v1222_v27 = vrot.slane %v1194_v11, %v15922_v20  ;;  %v1899_v57 = vld [vmem:[%s15916_s24 + $0xd8] sm:$0x7] }
 0x1e9   : > { %14897 = vmatmul.mubr.msk.f32.vlgmr.msra.gmra.mxu0 %vm486_vm0, %v2383_v51  ;;  %14919 = vmatprep.subr.mxu1 %v15679_v8  ;;  %v2396_v51 = vsel %vm2357_vm3, %v1175_v39, %v2139_v40  ;;  %v2395_v55 = vsel %vm2357_vm3, %v1173_v44, %v2138_v45  ;;  %v858_v45 = vadd.f32 %v16230_v35, %v15908_v13 }
 0x1ea   : > { %14905 = vmatpush3.xpose.msk.msra.mxu0 %vm486_vm0, %v2385_v61  ;;  %14906 = vmatprep.mubr.msk.f32.mxu0 %vm15680_vm2, %v15679_v8  ;;  %v1234_v16 = vrot.slane %v16279_v3, %v15922_v20  ;;  %v1227_v33 = vcombine.high %v16279_v3, %v16279_v3  ;;  %v1226_v42 = vcombine.high %v1222_v27, %v1222_v27 }
 0x1eb   : > { %14912 = vmatmul.mubr.msk.f32.vlgmr.msra.gmra.mxu1 %vm486_vm0, %v2386_v47  ;;  %14914 = vmatprep.subr.mxu0 %v15679_v8  ;;  %v1177_v47 = vcombine.high %v1173_v44, %v1173_v44  ;;  %v1894_v44 = vld [vmem:[%s15916_s24 + $0xc4] sm:$0x7]  ;;  %v16352_v54 = vmax.f32 %v858_v45, 0.0 }
 0x1ec   : > { %14920 = vmatpush3.xpose.msk.msra.mxu1 %vm486_vm0, %v2388_v2  ;;  %14921 = vmatprep.mubr.msk.f32.mxu1 %vm15680_vm2, %v15679_v8  ;;  %v1250_v29 = vrot.slane %v1234_v16, %v15922_v20  ;;  %v1242_v39 = vcombine.high %v1234_v16, %v1234_v16  ;;  %v1241_v46 = vrot.slane %v1227_v33, %v15922_v20  ;;  %v2150_v52 = vrot.slane %v1894_v44, 7  ;;  %v862_v16 = vpop.f32.mrf.mxu1 }
 0x1ed   : > { %14907 = vmatmul.mubr.msk.f32.vlgmr.msra.gmra.mxu0 %vm486_vm0, %v2385_v61  ;;  %14929 = vmatprep.subr.mxu1 %v15679_v8  ;;  %v1223_v61 = vcombine.high %v1201_v50, %v1201_v50  ;;  %v1897_v50 = vld [vmem:[%s15916_s24 + $0xd0] sm:$0x7]  ;;  %v1283_v1 = vrot.slane %v16352_v54, %v15922_v20 }
 0x1ee   : > { %14915 = vmatpush3.xpose.msk.msra.mxu0 %vm486_vm0, %v2387_v6  ;;  %14916 = vmatprep.mubr.msk.f32.mxu0 %vm15680_vm2, %v15679_v8  ;;  %v1272_v48 = vcombine.high %v1250_v29, %v1250_v29  ;;  %v1243_v58 = vcombine.high %v1241_v46, %v1241_v46 }
 0x1ef   : > { %14922 = vmatmul.mubr.msk.f32.vlgmr.msra.gmra.mxu1 %vm486_vm0, %v2388_v2  ;;  %14924 = vmatprep.subr.mxu0 %v15679_v8  ;;  %v2397_v2 = vsel %vm2357_vm3, %v1177_v47, %v2140_v56  ;;  %v2400_v9 = vsel %vm2357_vm3, %v1223_v61, %v2143_v63  ;;  %v1257_v47 = vrot.slane %v1241_v46, %v15922_v20  ;;  %v2153_v56 = vrot.slane %v1897_v50, 7  ;;  %v1898_v63 = vld [vmem:[%s15916_s24 + $0xd4] sm:$0x7]  ;;  %v1907_v46 = vld [vmem:[%s15916_s24 + $0xf8] sm:$0x7] }
 0x1f0   : > { %14930 = vmatpush3.xpose.msk.msra.mxu1 %vm486_vm0, %v2390_v7  ;;  %14931 = vmatprep.mubr.msk.f32.mxu1 %vm15680_vm2, %v15679_v8  ;;  %v2154_v11 = vrot.slane %v1898_v63, 7 }
 0x1f1   : > { %14917 = vmatmul.mubr.msk.f32.vlgmr.msra.gmra.mxu0 %vm486_vm0, %v2387_v6  ;;  %14939 = vmatprep.subr.mxu1 %v15679_v8  ;;  %v1888_v6 = vld [vmem:[%s15916_s24 + $0xac] sm:$0x7]  ;;  %v1273_v4 = vcombine.high %v1257_v47, %v1257_v47 }
 0x1f2   : > { %14925 = vmatpush3.xpose.msk.msra.mxu0 %vm486_vm0, %v2389_v5  ;;  %14926 = vmatprep.mubr.msk.f32.mxu0 %vm15680_vm2, %v15679_v8  ;;  %v2144_v21 = vrot.slane %v1888_v6, 7  ;;  %v2155_v6 = vrot.slane %v1899_v57, 7 }
 0x1f3   : > { %14932 = vmatmul.mubr.msk.f32.vlgmr.msra.gmra.mxu1 %vm486_vm0, %v2390_v7  ;;  %14934 = vmatprep.subr.mxu0 %v15679_v8  ;;  %v1208_v7 = vrot.slane %v1192_v60, %v15922_v20 }
 0x1f4   : > { %14940 = vmatpush3.xpose.msk.msra.mxu1 %vm486_vm0, %v2392_v26  ;;  %14941 = vmatprep.mubr.msk.f32.mxu1 %vm15680_vm2, %v15679_v8  ;;  %v2401_v30 = vsel %vm2357_vm3, %v1225_v19, %v2144_v21  ;;  %v1299_v19 = vrot.slane %v1283_v1, %v15922_v20  ;;  %v2412_v21 = vsel %vm2357_vm3, %v1273_v4, %v2155_v6  ;;  %v1911_v4 = vld [vmem:[%s15916_s24 + $0x108] sm:$0x7] }
 0x1f5   : > { %14927 = vmatmul.mubr.msk.f32.vlgmr.msra.gmra.mxu0 %vm486_vm0, %v2389_v5  ;;  %14949 = vmatprep.subr.mxu1 %v15679_v8  ;;  %v1890_v5 = vld [vmem:[%s15916_s24 + $0xb4] sm:$0x7]  ;;  %v2402_v23 = vsel %vm2357_vm3, %v1208_v7, %v2145_v10  ;;  %v1224_v24 = vcombine.high %v1208_v7, %v1208_v7  ;;  %v1901_v7 = vld [vmem:[%s15916_s24 + $0xe0] sm:$0x7]  ;;  %v1271_v10 = vrot.slane %v1243_v58, %v15922_v20 }
 0x1f6   : > { %14935 = vmatpush3.xpose.msk.msra.mxu0 %vm486_vm0, %v2391_v31  ;;  %14936 = vmatprep.mubr.msk.f32.mxu0 %vm15680_vm2, %v15679_v8  ;;  %v2146_v28 = vrot.slane %v1890_v5, 7  ;;  %v2157_v5 = vrot.slane %v1901_v7, 7 }
 0x1f7   : > { %14942 = vmatmul.mubr.msk.f32.vlgmr.msra.gmra.mxu1 %vm486_vm0, %v2392_v26  ;;  %14944 = vmatprep.subr.mxu0 %v15679_v8  ;;  %v2147_v26 = vrot.slane %v1891_v12, 7  ;;  %v1900_v12 = vld [vmem:[%s15916_s24 + $0xdc] sm:$0x7] }
 0x1f8   : > { %14950 = vmatpush3.xpose.msk.msra.mxu1 %vm486_vm0, %v2394_v38  ;;  %14951 = vmatprep.mubr.msk.f32.mxu1 %vm15680_vm2, %v15679_v8  ;;  %v2403_v36 = vsel %vm2357_vm3, %v1222_v27, %v2146_v28  ;;  %v2156_v27 = vrot.slane %v1900_v12, 7  ;;  %v863_v28 = vadd.f32 %v15908_v13, %v862_v16  ;;  %v1905_v13 = vld [vmem:[%s15916_s24 + $0xf0] sm:$0x7]  ;;  %v16477_v12 = vld [vmem:[%s18224_s7] ss:$0 sm:$0xff] }
 0x1f9   : > { %14937 = vmatmul.mubr.msk.f32.vlgmr.msra.gmra.mxu0 %vm486_vm0, %v2391_v31  ;;  %14959 = vmatprep.subr.mxu1 %v15679_v8  ;;  %v2149_v31 = vrot.slane %v1893_v22, 7  ;;  %v2404_v34 = vsel %vm2357_vm3, %v1224_v24, %v2147_v26  ;;  %v1291_v22 = vcombine.high %v1283_v1, %v1283_v1  ;;  %v2411_v24 = vsel %vm2357_vm3, %v1271_v10, %v2154_v11  ;;  %v1910_v11 = vld [vmem:[%s15916_s24 + $0x104] sm:$0x7] }
 0x1fa   : > { %14945 = vmatpush3.xpose.msk.msra.mxu0 %vm486_vm0, %v2393_v43  ;;  %14946 = vmatprep.mubr.msk.f32.mxu0 %vm15680_vm2, %v15679_v8  ;;  %v1275_v26 = vcombine.high %v1271_v10, %v1271_v10  ;;  %v2161_v44 = vrot.slane %v1905_v13, 7  ;;  %v868_v16 = vadd.f32 %v16477_v12, %v16369_v0 }
 0x1fb   : > { %14952 = vmatmul.mubr.msk.f32.vlgmr.msra.gmra.mxu1 %vm486_vm0, %v2394_v38  ;;  %14954 = vmatprep.subr.mxu0 %v15679_v8  ;;  %v1895_v38 = vld [vmem:[%s15916_s24 + $0xc8] sm:$0x7]  ;;  %v2406_v40 = vsel %vm2357_vm3, %v1250_v29, %v2149_v31  ;;  %v1902_v29 = vld [vmem:[%s15916_s24 + $0xe4] sm:$0x7]  ;;  %v1321_v31 = vcombine.high %v1299_v19, %v1299_v19 }
 0x1fc   : > { %14960 = vmatpush3.xpose.msk.msra.mxu1 %vm486_vm0, %v2396_v51  ;;  %14961 = vmatprep.mubr.msk.f32.mxu1 %vm15680_vm2, %v15679_v8  ;;  %v2151_v49 = vrot.slane %v1895_v38, 7  ;;  %v16418_v38 = vmax.f32 %v863_v28, 0.0 }
 0x1fd   : > { %14947 = vmatmul.mubr.msk.f32.vlgmr.msra.gmra.mxu0 %vm486_vm0, %v2393_v43  ;;  %14969 = vmatprep.subr.mxu1 %v15679_v8  ;;  %v2148_v43 = vrot.slane %v1892_v32, 7  ;;  %v2414_v32 = vsel %vm2357_vm3, %v1299_v19, %v2157_v5  ;;  %v1913_v5 = vld [vmem:[%s15916_s24 + $0x110] sm:$0x7] }
 0x1fe   : > { %14955 = vmatpush3.xpose.msk.msra.mxu0 %vm486_vm0, %v2395_v55  ;;  %14956 = vmatprep.mubr.msk.f32.mxu0 %vm15680_vm2, %v15679_v8  ;;  %v1325_v63 = vcombine.high %v16418_v38, %v16418_v38 }
 0x1ff   : > { %14962 = vmatmul.mubr.msk.f32.vlgmr.msra.gmra.mxu1 %vm486_vm0, %v2396_v51  ;;  %14964 = vmatprep.subr.mxu0 %v15679_v8  ;;  %v2405_v35 = vsel %vm2357_vm3, %v1226_v42, %v2148_v43  ;;  %v1264_v51 = vrot.slane %v1242_v39, %v15922_v20  ;;  %v2158_v39 = vrot.slane %v1902_v29, 7  ;;  %v2169_v29 = vrot.slane %v1913_v5, 7  ;;  %v1923_v5 = vld [vmem:[%s15916_s24 + $0x138] sm:$0x7] }
 0x200   : > { %14970 = vmatpush3.xpose.msk.msra.mxu1 %vm486_vm0, %v2398_v62  ;;  %14971 = vmatprep.mubr.msk.f32.mxu1 %vm15680_vm2, %v15679_v8 }
 0x201   : > { %14957 = vmatmul.mubr.msk.f32.vlgmr.msra.gmra.mxu0 %vm486_vm0, %v2395_v55  ;;  %14979 = vmatprep.subr.mxu1 %v15679_v8  ;;  %v2408_v55 = vsel %vm2357_vm3, %v1272_v48, %v2151_v49  ;;  %v2407_v60 = vsel %vm2357_vm3, %v1264_v51, %v2150_v52  ;;  %v1274_v61 = vcombine.high %v1264_v51, %v1264_v51  ;;  %v1906_v51 = vld [vmem:[%s15916_s24 + $0xf4] sm:$0x7]  ;;  %v1909_v52 = vld [vmem:[%s15916_s24 + $0x100] sm:$0x7] }
 0x202   : > { %14965 = vmatpush3.xpose.msk.msra.mxu0 %vm486_vm0, %v2397_v2  ;;  %14966 = vmatprep.mubr.msk.f32.mxu0 %vm15680_vm2, %v15679_v8  ;;  %v1332_v48 = vrot.slane %v16418_v38, %v15922_v20  ;;  %v2162_v57 = vrot.slane %v1906_v51, 7 }
 0x203   : > { %14972 = vmatmul.mubr.msk.f32.vlgmr.msra.gmra.mxu1 %vm486_vm0, %v2398_v62  ;;  %14974 = vmatprep.subr.mxu0 %v15679_v8  ;;  %v2152_v62 = vrot.slane %v1896_v53, 7 }
 0x204   : > { %14980 = vmatpush3.xpose.msk.msra.mxu1 %vm486_vm0, %v2400_v9  ;;  %14981 = vmatprep.mubr.msk.f32.mxu1 %vm15680_vm2, %v15679_v8  ;;  %v1348_v58 = vrot.slane %v1332_v48, %v15922_v20  ;;  %v1340_v6 = vcombine.high %v1332_v48, %v1332_v48 }
 0x205   : > { %14967 = vmatmul.mubr.msk.f32.vlgmr.msra.gmra.mxu0 %vm486_vm0, %v2397_v2  ;;  %14989 = vmatprep.subr.mxu1 %v15679_v8  ;;  %v2410_v2 = vsel %vm2357_vm3, %v1257_v47, %v2153_v56  ;;  %v2163_v47 = vrot.slane %v1907_v46, 7 }
 0x206   : > { %14975 = vmatpush3.xpose.msk.msra.mxu0 %vm486_vm0, %v2399_v17  ;;  %14976 = vmatprep.mubr.msk.f32.mxu0 %vm15680_vm2, %v15679_v8  ;;  %v1370_v19 = vcombine.high %v1348_v58, %v1348_v58 }
 0x207   : > { %14982 = vmatmul.mubr.msk.f32.vlgmr.msra.gmra.mxu1 %vm486_vm0, %v2400_v9  ;;  %14984 = vmatprep.subr.mxu0 %v15679_v8  ;;  %v2409_v9 = vsel %vm2357_vm3, %v1274_v61, %v2152_v62  ;;  %v2165_v61 = vrot.slane %v1909_v52, 7  ;;  %v1908_v62 = vld [vmem:[%s15916_s24 + $0xfc] sm:$0x7] }
 0x208   : > { %14990 = vmatpush3.xpose.msk.msra.mxu1 %vm486_vm0, %v2402_v23  ;;  %14991 = vmatprep.mubr.msk.f32.mxu1 %vm15680_vm2, %v15679_v8  ;;  %v2164_v10 = vrot.slane %v1908_v62, 7 }
 0x209   : > { %14977 = vmatmul.mubr.msk.f32.vlgmr.msra.gmra.mxu0 %vm486_vm0, %v2399_v17  ;;  %14999 = vmatprep.subr.mxu1 %v15679_v8  ;;  %v1276_v17 = vcombine.high %v16352_v54, %v16352_v54  ;;  %v2422_v7 = vsel %vm2357_vm3, %v1348_v58, %v2165_v61  ;;  %v1918_v61 = vld [vmem:[%s15916_s24 + $0x124] sm:$0x7] }
 0x20a   : > { %14985 = vmatpush3.xpose.msk.msra.mxu0 %vm486_vm0, %v2401_v30  ;;  %14986 = vmatprep.mubr.msk.f32.mxu0 %vm15680_vm2, %v15679_v8 }
 0x20b   : > { %14992 = vmatmul.mubr.msk.f32.vlgmr.msra.gmra.mxu1 %vm486_vm0, %v2402_v23  ;;  %14994 = vmatprep.subr.mxu0 %v15679_v8  ;;  %v1903_v23 = vld [vmem:[%s15916_s24 + $0xe8] sm:$0x7] }
 0x20c   : > { %15000 = vmatpush3.xpose.msk.msra.mxu1 %vm486_vm0, %v2404_v34  ;;  %15001 = vmatprep.mubr.msk.f32.mxu1 %vm15680_vm2, %v15679_v8  ;;  %v2159_v33 = vrot.slane %v1903_v23, 7  ;;  %v2166_v23 = vrot.slane %v1910_v11, 7  ;;  %v1920_v11 = vld [vmem:[%s15916_s24 + $0x12c] sm:$0x7] }
 0x20d   : > { %14987 = vmatmul.mubr.msk.f32.vlgmr.msra.gmra.mxu0 %vm486_vm0, %v2401_v30  ;;  %15009 = vmatprep.subr.mxu1 %v15679_v8  ;;  %v1290_v30 = vrot.slane %v1276_v17, %v15922_v20  ;;  %v1339_v17 = vrot.slane %v1325_v63, %v15922_v20 }
 0x20e   : > { %14995 = vmatpush3.xpose.msk.msra.mxu0 %vm486_vm0, %v2403_v36  ;;  %14996 = vmatprep.mubr.msk.f32.mxu0 %vm15680_vm2, %v15679_v8  ;;  %v2416_v43 = vsel %vm2357_vm3, %v1321_v31, %v2159_v33 }
 0x20f   : > { %15002 = vmatmul.mubr.msk.f32.vlgmr.msra.gmra.mxu1 %vm486_vm0, %v2404_v34  ;;  %15004 = vmatprep.subr.mxu0 %v15679_v8  ;;  %v1313_v34 = vrot.slane %v1291_v22, %v15922_v20  ;;  %v1306_v42 = vrot.slane %v1290_v30, %v15922_v20  ;;  %v1292_v45 = vcombine.high %v1290_v30, %v1290_v30  ;;  %v1915_v30 = vld [vmem:[%s15916_s24 + $0x118] sm:$0x7] }
 0x210   : > { %15010 = vmatpush3.xpose.msk.msra.mxu1 %vm486_vm0, %v2406_v40  ;;  %15011 = vmatprep.mubr.msk.f32.mxu1 %vm15680_vm2, %v15679_v8  ;;  %v1362_v22 = vrot.slane %v1340_v6, %v15922_v20  ;;  %v1355_v28 = vrot.slane %v1339_v17, %v15922_v20  ;;  %v1341_v31 = vcombine.high %v1339_v17, %v1339_v17 }
 0x211   : > { %14997 = vmatmul.mubr.msk.f32.vlgmr.msra.gmra.mxu0 %vm486_vm0, %v2403_v36  ;;  %15019 = vmatprep.subr.mxu1 %v15679_v8  ;;  %v2413_v36 = vsel %vm2357_vm3, %v1275_v26, %v2156_v27  ;;  %v2415_v49 = vsel %vm2357_vm3, %v1313_v34, %v2158_v39  ;;  %v1323_v50 = vcombine.high %v1313_v34, %v1313_v34  ;;  %v16496_v26 = vmax.f32 %v868_v16, 0.0  ;;  %v1914_v34 = vld [vmem:[%s15916_s24 + $0x114] sm:$0x7] }
 0x212   : > { %15005 = vmatpush3.xpose.msk.msra.mxu0 %vm486_vm0, %v2405_v35  ;;  %15006 = vmatprep.mubr.msk.f32.mxu0 %vm15680_vm2, %v15679_v8  ;;  %v2418_v53 = vsel %vm2357_vm3, %v1306_v42, %v2161_v44  ;;  %v1320_v56 = vrot.slane %v1292_v45, %v15922_v20  ;;  %v1372_v33 = vcombine.high %v1362_v22, %v1362_v22  ;;  %v1917_v44 = vld [vmem:[%s15916_s24 + $0x120] sm:$0x7]  ;;  %v2170_v48 = vrot.slane %v1914_v34, 7 }
 0x213   : > { %15012 = vmatmul.mubr.msk.f32.vlgmr.msra.gmra.mxu1 %vm486_vm0, %v2406_v40  ;;  %15014 = vmatprep.subr.mxu0 %v15679_v8  ;;  %v1904_v40 = vld [vmem:[%s15916_s24 + $0xec] sm:$0x7]  ;;  %v1381_v39 = vrot.slane %v16496_v26, %v15922_v20  ;;  %v1369_v46 = vrot.slane %v1341_v31, %v15922_v20  ;;  %v2179_v31 = vrot.slane %v1923_v5, 7 }
 0x214   : > { %15020 = vmatpush3.xpose.msk.msra.mxu1 %vm486_vm0, %v2408_v55  ;;  %15021 = vmatprep.mubr.msk.f32.mxu1 %vm15680_vm2, %v15679_v8 }
 0x215   : > { %15007 = vmatmul.mubr.msk.f32.vlgmr.msra.gmra.mxu0 %vm486_vm0, %v2405_v35  ;;  %15029 = vmatprep.subr.mxu1 %v15679_v8  ;;  %v2160_v35 = vrot.slane %v1904_v40, 7  ;;  %v2426_v40 = vsel %vm2357_vm3, %v1355_v28, %v2169_v29  ;;  %v1397_v51 = vrot.slane %v1381_v39, %v15922_v20 }
 0x216   : > { %15015 = vmatpush3.xpose.msk.msra.mxu0 %vm486_vm0, %v2407_v60  ;;  %15016 = vmatprep.mubr.msk.f32.mxu0 %vm15680_vm2, %v15679_v8 }
 0x217   : > { %15022 = vmatmul.mubr.msk.f32.vlgmr.msra.gmra.mxu1 %vm486_vm0, %v2408_v55  ;;  %15024 = vmatprep.subr.mxu0 %v15679_v8  ;;  %v1322_v55 = vcombine.high %v1306_v42, %v1306_v42  ;;  %v1371_v42 = vcombine.high %v1355_v28, %v1355_v28  ;;  %v1419_v63 = vcombine.high %v1397_v51, %v1397_v51  ;;  %v1925_v28 = vld [vmem:[%s15916_s24 + $0x140] sm:$0x7] }
 0x218   : > { %15030 = vmatpush3.xpose.msk.msra.mxu1 %vm486_vm0, %v2410_v2  ;;  %15031 = vmatprep.mubr.msk.f32.mxu1 %vm15680_vm2, %v15679_v8 }
 0x219   : > { %15017 = vmatmul.mubr.msk.f32.vlgmr.msra.gmra.mxu0 %vm486_vm0, %v2407_v60  ;;  %15039 = vmatprep.subr.mxu1 %v15679_v8  ;;  %v2417_v60 = vsel %vm2357_vm3, %v1323_v50, %v2160_v35  ;;  %v2420_v1 = vsel %vm2357_vm3, %v1322_v55, %v2163_v47  ;;  %v1374_v35 = vcombine.high %v16496_v26, %v16496_v26  ;;  %v1919_v47 = vld [vmem:[%s15916_s24 + $0x128] sm:$0x7] }
 0x21a   : > { %15025 = vmatpush3.xpose.msk.msra.mxu0 %vm486_vm0, %v2409_v9  ;;  %15026 = vmatprep.mubr.msk.f32.mxu0 %vm15680_vm2, %v15679_v8  ;;  %v1389_v55 = vcombine.high %v1381_v39, %v1381_v39  ;;  %v2181_v39 = vrot.slane %v1925_v28, 7 }
 0x21b   : > { %15032 = vmatmul.mubr.msk.f32.vlgmr.msra.gmra.mxu1 %vm486_vm0, %v2410_v2  ;;  %15034 = vmatprep.subr.mxu0 %v15679_v8  ;;  %v2419_v2 = vsel %vm2357_vm3, %v1320_v56, %v2162_v57  ;;  %v1373_v57 = vcombine.high %v1369_v46, %v1369_v46  ;;  %v1388_v62 = vrot.slane %v1374_v35, %v15922_v20  ;;  %v1926_v35 = vld [vmem:[%s15916_s24 + $0x144] sm:$0x7] }
 0x21c   : > { %15040 = vmatpush3.xpose.msk.msra.mxu1 %vm486_vm0, %v2412_v21  ;;  %15041 = vmatprep.mubr.msk.f32.mxu1 %vm15680_vm2, %v15679_v8  ;;  %v1411_v6 = vrot.slane %v1389_v55, %v15922_v20 }
 0x21d   : > { %15027 = vmatmul.mubr.msk.f32.vlgmr.msra.gmra.mxu0 %vm486_vm0, %v2409_v9  ;;  %15049 = vmatprep.subr.mxu1 %v15679_v8  ;;  %v1324_v9 = vcombine.high %v1320_v56, %v1320_v56  ;;  %v2427_v56 = vsel %vm2357_vm3, %v1369_v46, %v2170_v48  ;;  %v1404_v16 = vrot.slane %v1388_v62, %v15922_v20 }
 0x21e   : > { %15035 = vmatpush3.xpose.msk.msra.mxu0 %vm486_vm0, %v2411_v24  ;;  %15036 = vmatprep.mubr.msk.f32.mxu0 %vm15680_vm2, %v15679_v8 }
 0x21f   : > { %15042 = vmatmul.mubr.msk.f32.vlgmr.msra.gmra.mxu1 %vm486_vm0, %v2412_v21  ;;  %15044 = vmatprep.subr.mxu0 %v15679_v8  ;;  %v2167_v21 = vrot.slane %v1911_v4, 7  ;;  %v2421_v0 = vsel %vm2357_vm3, %v1324_v9, %v2164_v10  ;;  %v1921_v4 = vld [vmem:[%s15916_s24 + $0x130] sm:$0x7]  ;;  %v2174_v10 = vrot.slane %v1918_v61, 7 }
 0x220   : > { %15050 = vmatpush3.xpose.msk.msra.mxu1 %vm486_vm0, %v2414_v32  ;;  %15051 = vmatprep.mubr.msk.f32.mxu1 %vm15680_vm2, %v15679_v8 }
 0x221   : > { %15037 = vmatmul.mubr.msk.f32.vlgmr.msra.gmra.mxu0 %vm486_vm0, %v2411_v24  ;;  %15059 = vmatprep.subr.mxu1 %v15679_v8  ;;  %v1912_v24 = vld [vmem:[%s15916_s24 + $0x10c] sm:$0x7]  ;;  %v2424_v27 = vsel %vm2357_vm3, %v1370_v19, %v2167_v21  ;;  %v2177_v19 = vrot.slane %v1921_v4, 7  ;;  %v1390_v21 = vcombine.high %v1388_v62, %v1388_v62 }
 0x222   : > { %15045 = vmatpush3.xpose.msk.msra.mxu0 %vm486_vm0, %v2413_v36  ;;  %15046 = vmatprep.mubr.msk.f32.mxu0 %vm15680_vm2, %v15679_v8  ;;  %v2168_v13 = vrot.slane %v1912_v24, 7  ;;  %v2176_v24 = vrot.slane %v1920_v11, 7 }
 0x223   : > { %15052 = vmatmul.mubr.msk.f32.vlgmr.msra.gmra.mxu1 %vm486_vm0, %v2414_v32  ;;  %15054 = vmatprep.subr.mxu0 %v15679_v8  ;;  %v2423_v32 = vsel %vm2357_vm3, %v1362_v22, %v2166_v23  ;;  %v2431_v22 = vsel %vm2357_vm3, %v1411_v6, %v2174_v10  ;;  %v1421_v23 = vcombine.high %v1411_v6, %v1411_v6  ;;  %v1930_v10 = vld [vmem:[%s15916_s24 + $0x154] sm:$0x7] }
 0x224   : > { %15060 = vmatpush3.xpose.msk.msra.mxu1 %vm486_vm0, %v2416_v43  ;;  %15061 = vmatprep.mubr.msk.f32.mxu1 %vm15680_vm2, %v15679_v8  ;;  %v2425_v45 = vsel %vm2357_vm3, %v1372_v33, %v2168_v13  ;;  %v2434_v29 = vsel %vm2357_vm3, %v1404_v16, %v2177_v19  ;;  %v1418_v34 = vrot.slane %v1390_v21, %v15922_v20  ;;  %v1933_v21 = vld [vmem:[%s15916_s24 + $0x160] sm:$0x7] }
 0x225   : > { %15047 = vmatmul.mubr.msk.f32.vlgmr.msra.gmra.mxu0 %vm486_vm0, %v2413_v36  ;;  %15069 = vmatprep.subr.mxu1 %v15679_v8  ;;  %v16513_v36 = vpop.f32.mrf.mxu1  ;;  %v2433_v13 = vsel %vm2357_vm3, %v1421_v23, %v2176_v24  ;;  %v2186_v23 = vrot.slane %v1930_v10, 7 }
 0x226   : > { %15055 = vmatpush3.xpose.msk.msra.mxu0 %vm486_vm0, %v2415_v49  ;;  %15056 = vmatprep.mubr.msk.f32.mxu0 %vm15680_vm2, %v15679_v8 }
 0x227   : > { %15062 = vmatmul.mubr.msk.f32.vlgmr.msra.gmra.mxu1 %vm486_vm0, %v2416_v43  ;;  %15064 = vmatprep.subr.mxu0 %v15679_v8  ;;  %v2171_v43 = vrot.slane %v1915_v30, 7  ;;  %v872_v50 = vpop.f32.mrf.mxu1  ;;  %v1420_v30 = vcombine.high %v1404_v16, %v1404_v16 }
 0x228   : > { %15070 = vmatpush3.xpose.msk.msra.mxu1 %vm486_vm0, %v2418_v53  ;;  %15071 = vmatprep.mubr.msk.f32.mxu1 %vm15680_vm2, %v15679_v8 }
 0x229   : > { %15057 = vmatmul.mubr.msk.f32.vlgmr.msra.gmra.mxu0 %vm486_vm0, %v2415_v49  ;;  %15079 = vmatprep.subr.mxu1 %v15679_v8  ;;  %v1916_v49 = vld [vmem:[%s15916_s24 + $0x11c] sm:$0x7]  ;;  %v2428_v52 = vsel %vm2357_vm3, %v1371_v42, %v2171_v43  ;;  %v2436_v43 = vsel %vm2357_vm3, %v1420_v30, %v2179_v31  ;;  %v16661_v5 = vpop.f32.mrf.mxu1  ;;  %v2189_v30 = vrot.slane %v1933_v21, 7 }
 0x22a   : > { %15065 = vmatpush3.xpose.msk.msra.mxu0 %vm486_vm0, %v2417_v60  ;;  %15066 = vmatprep.mubr.msk.f32.mxu0 %vm15680_vm2, %v15679_v8  ;;  %v2172_v58 = vrot.slane %v1916_v49, 7  ;;  %v1422_v49 = vcombine.high %v1418_v34, %v1418_v34 }
 0x22b   : > { %15072 = vmatmul.mubr.msk.f32.vlgmr.msra.gmra.mxu1 %vm486_vm0, %v2418_v53  ;;  %15074 = vmatprep.subr.mxu0 %v15679_v8  ;;  %v2173_v53 = vrot.slane %v1917_v44, 7  ;;  %v882_v31 = vpop.f32.mrf.mxu1 }
 0x22c   : > { %15080 = vmatpush3.xpose.msk.msra.mxu1 %vm486_vm0, %v2420_v1  ;;  %15081 = vmatprep.mubr.msk.f32.mxu1 %vm15680_vm2, %v15679_v8 }
 0x22d   : > { %15067 = vmatmul.mubr.msk.f32.vlgmr.msra.gmra.mxu0 %vm486_vm0, %v2417_v60  ;;  %15089 = vmatprep.subr.mxu1 %v15679_v8  ;;  %v873_v60 = vadd.f32 %v16477_v12, %v872_v50 }
 0x22e   : > { %15075 = vmatpush3.xpose.msk.msra.mxu0 %vm486_vm0, %v2419_v2  ;;  %15076 = vmatprep.mubr.msk.f32.mxu0 %vm15680_vm2, %v15679_v8 }
 0x22f   : > { %15082 = vmatmul.mubr.msk.f32.vlgmr.msra.gmra.mxu1 %vm486_vm0, %v2420_v1  ;;  %15084 = vmatprep.subr.mxu0 %v15679_v8  ;;  %v2430_v1 = vsel %vm2357_vm3, %v1397_v51, %v2173_v53  ;;  %v16562_v9 = vmax.f32 %v873_v60, 0.0  ;;  %v878_v51 = vadd.f32 %v16477_v12, %v16513_v36 }
 0x230   : > { %15090 = vmatpush3.xpose.msk.msra.mxu1 %vm486_vm0, %v2422_v7  ;;  %15091 = vmatprep.mubr.msk.f32.mxu1 %vm15680_vm2, %v15679_v8 }
 0x231   : > { %15077 = vmatmul.mubr.msk.f32.vlgmr.msra.gmra.mxu0 %vm486_vm0, %v2419_v2  ;;  %15099 = vmatprep.subr.mxu1 %v15679_v8  ;;  %v2175_v2 = vrot.slane %v1919_v47, 7  ;;  %v1423_v42 = vcombine.high %v16562_v9, %v16562_v9  ;;  %v1929_v47 = vld [vmem:[%s15916_s24 + $0x150] sm:$0x7]  ;;  %v16635_v60 = vmax.f32 %v878_v51, 0.0  ;;  %v1936_v51 = vld [vmem:[%s15916_s24 + $0x16c] sm:$0x7] }
 0x232   : > { %15085 = vmatpush3.xpose.msk.msra.mxu0 %vm486_vm0, %v2421_v0  ;;  %15086 = vmatprep.mubr.msk.f32.mxu0 %vm15680_vm2, %v15679_v8 }
 0x233   : > { %15092 = vmatmul.mubr.msk.f32.vlgmr.msra.gmra.mxu1 %vm486_vm0, %v2422_v7  ;;  %15094 = vmatprep.subr.mxu0 %v15679_v8  ;;  %v2429_v7 = vsel %vm2357_vm3, %v1373_v57, %v2172_v58  ;;  %v2432_v17 = vsel %vm2357_vm3, %v1419_v63, %v2175_v2  ;;  %v2182_v57 = vrot.slane %v1926_v35, 7  ;;  %v1928_v58 = vld [vmem:[%s15916_s24 + $0x14c] sm:$0x7]  ;;  %v2185_v63 = vrot.slane %v1929_v47, 7 }
 0x234   : > { %15100 = vmatpush3.xpose.msk.msra.mxu1 %vm486_vm0, %v2424_v27  ;;  %15101 = vmatprep.mubr.msk.f32.mxu1 %vm15680_vm2, %v15679_v8  ;;  %v1479_v11 = vrot.slane %v16635_v60, %v15922_v20  ;;  %v1472_v24 = vcombine.high %v16635_v60, %v16635_v60 }
 0x235   : > { %15087 = vmatmul.mubr.msk.f32.vlgmr.msra.gmra.mxu0 %vm486_vm0, %v2421_v0  ;;  %15109 = vmatprep.subr.mxu1 %v15679_v8  ;;  %v1430_v0 = vrot.slane %v16562_v9, %v15922_v20 }
 0x236   : > { %15095 = vmatpush3.xpose.msk.msra.mxu0 %vm486_vm0, %v2423_v32  ;;  %15096 = vmatprep.mubr.msk.f32.mxu0 %vm15680_vm2, %v15679_v8  ;;  %v1495_v28 = vrot.slane %v1479_v11, %v15922_v20 }
 0x237   : > { %15102 = vmatmul.mubr.msk.f32.vlgmr.msra.gmra.mxu1 %vm486_vm0, %v2424_v27  ;;  %15104 = vmatprep.subr.mxu0 %v15679_v8  ;;  %v1922_v27 = vld [vmem:[%s15916_s24 + $0x134] sm:$0x7]  ;;  %v1446_v33 = vrot.slane %v1430_v0, %v15922_v20  ;;  %v1438_v44 = vcombine.high %v1430_v0, %v1430_v0 }
 0x238   : > { %15110 = vmatpush3.xpose.msk.msra.mxu1 %vm486_vm0, %v2426_v40  ;;  %15111 = vmatprep.mubr.msk.f32.mxu1 %vm15680_vm2, %v15679_v8 }
 0x239   : > { %15097 = vmatmul.mubr.msk.f32.vlgmr.msra.gmra.mxu0 %vm486_vm0, %v2423_v32  ;;  %15119 = vmatprep.subr.mxu1 %v15679_v8  ;;  %v2178_v32 = vrot.slane %v1922_v27, 7  ;;  %v2438_v48 = vsel %vm2357_vm3, %v1446_v33, %v2181_v39  ;;  %v1468_v53 = vcombine.high %v1446_v33, %v1446_v33  ;;  %v1932_v27 = vld [vmem:[%s15916_s24 + $0x15c] sm:$0x7]  ;;  %v1487_v33 = vcombine.high %v1479_v11, %v1479_v11 }
 0x23a   : > { %15105 = vmatpush3.xpose.msk.msra.mxu0 %vm486_vm0, %v2425_v45  ;;  %15106 = vmatprep.mubr.msk.f32.mxu0 %vm15680_vm2, %v15679_v8  ;;  %v2188_v39 = vrot.slane %v1932_v27, 7 }
 0x23b   : > { %15112 = vmatmul.mubr.msk.f32.vlgmr.msra.gmra.mxu1 %vm486_vm0, %v2426_v40  ;;  %15114 = vmatprep.subr.mxu0 %v15679_v8  ;;  %v1924_v40 = vld [vmem:[%s15916_s24 + $0x13c] sm:$0x7]  ;;  %v2435_v46 = vsel %vm2357_vm3, %v1418_v34, %v2178_v32  ;;  %v1935_v32 = vld [vmem:[%s15916_s24 + $0x168] sm:$0x7] }
 0x23c   : > { %15120 = vmatpush3.xpose.msk.msra.mxu1 %vm486_vm0, %v2428_v52  ;;  %15121 = vmatprep.mubr.msk.f32.mxu1 %vm15680_vm2, %v15679_v8  ;;  %v2180_v50 = vrot.slane %v1924_v40, 7  ;;  %v1486_v40 = vrot.slane %v1472_v24, %v15922_v20 }
 0x23d   : > { %15107 = vmatmul.mubr.msk.f32.vlgmr.msra.gmra.mxu0 %vm486_vm0, %v2425_v45  ;;  %15129 = vmatprep.subr.mxu1 %v15679_v8  ;;  %v1927_v45 = vld [vmem:[%s15916_s24 + $0x148] sm:$0x7] }
 0x23e   : > { %15115 = vmatpush3.xpose.msk.msra.mxu0 %vm486_vm0, %v2427_v56  ;;  %15116 = vmatprep.mubr.msk.f32.mxu0 %vm15680_vm2, %v15679_v8  ;;  %v2183_v55 = vrot.slane %v1927_v45, 7  ;;  %v2437_v36 = vsel %vm2357_vm3, %v1422_v49, %v2180_v50  ;;  %v883_v45 = vadd.f32 %v16477_v12, %v882_v31  ;;  %v1509_v49 = vrot.slane %v1487_v33, %v15922_v20  ;;  %v1942_v31 = vld [vmem:[%s15916_s24 + $0x184] sm:$0x7] }
 0x23f   : > { %15122 = vmatmul.mubr.msk.f32.vlgmr.msra.gmra.mxu1 %vm486_vm0, %v2428_v52  ;;  %15124 = vmatprep.subr.mxu0 %v15679_v8  ;;  %v1437_v52 = vrot.slane %v1423_v42, %v15922_v20  ;;  %v1934_v42 = vld [vmem:[%s15916_s24 + $0x164] sm:$0x7] }
 0x240   : > { %15130 = vmatpush3.xpose.msk.msra.mxu1 %vm486_vm0, %v2430_v1  ;;  %15131 = vmatprep.mubr.msk.f32.mxu1 %vm15680_vm2, %v15679_v8  ;;  %v2440_v61 = vsel %vm2357_vm3, %v1468_v53, %v2183_v55  ;;  %v2190_v35 = vrot.slane %v1934_v42, 7  ;;  %v16706_v53 = vmax.f32 %v883_v45, 0.0  ;;  %v2198_v45 = vrot.slane %v1942_v31, 7 }
 0x241   : > { %15117 = vmatmul.mubr.msk.f32.vlgmr.msra.gmra.mxu0 %vm486_vm0, %v2427_v56  ;;  %15139 = vmatprep.subr.mxu1 %v15679_v8  ;;  %v1460_v56 = vrot.slane %v1438_v44, %v15922_v20  ;;  %v1453_v62 = vrot.slane %v1437_v52, %v15922_v20  ;;  %v1439_v2 = vcombine.high %v1437_v52, %v1437_v52 }
 0x242   : > { %15125 = vmatpush3.xpose.msk.msra.mxu0 %vm486_vm0, %v2429_v7  ;;  %15126 = vmatprep.mubr.msk.f32.mxu0 %vm15680_vm2, %v15679_v8  ;;  %v2446_v44 = vsel %vm2357_vm3, %v1495_v28, %v2189_v30  ;;  %v1502_v52 = vrot.slane %v1486_v40, %v15922_v20 }
 0x243   : > { %15132 = vmatmul.mubr.msk.f32.vlgmr.msra.gmra.mxu1 %vm486_vm0, %v2430_v1  ;;  %15134 = vmatprep.subr.mxu0 %v15679_v8  ;;  %v1931_v1 = vld [vmem:[%s15916_s24 + $0x158] sm:$0x7]  ;;  %v2439_v4 = vsel %vm2357_vm3, %v1460_v56, %v2182_v57  ;;  %v1470_v6 = vcombine.high %v1460_v56, %v1460_v56  ;;  %v2442_v16 = vsel %vm2357_vm3, %v1453_v62, %v2185_v63 }
 0x244   : > { %15140 = vmatpush3.xpose.msk.msra.mxu1 %vm486_vm0, %v2432_v17  ;;  %15141 = vmatprep.mubr.msk.f32.mxu1 %vm15680_vm2, %v15679_v8  ;;  %v2187_v19 = vrot.slane %v1931_v1, 7  ;;  %v1488_v56 = vcombine.high %v1486_v40, %v1486_v40  ;;  %v2447_v57 = vsel %vm2357_vm3, %v1509_v49, %v2190_v35  ;;  %v1528_v63 = vrot.slane %v16706_v53, %v15922_v20 }
 0x245   : > { %15127 = vmatmul.mubr.msk.f32.vlgmr.msra.gmra.mxu0 %vm486_vm0, %v2429_v7  ;;  %15149 = vmatprep.subr.mxu1 %v15679_v8  ;;  %v2184_v7 = vrot.slane %v1928_v58, 7  ;;  %v1519_v58 = vcombine.high %v1509_v49, %v1509_v49 }
 0x246   : > { %15135 = vmatpush3.xpose.msk.msra.mxu0 %vm486_vm0, %v2431_v22  ;;  %15136 = vmatprep.mubr.msk.f32.mxu0 %vm15680_vm2, %v15679_v8  ;;  %v1516_v11 = vrot.slane %v1488_v56, %v15922_v20  ;;  %v1544_v21 = vrot.slane %v1528_v63, %v15922_v20  ;;  %v1536_v27 = vcombine.high %v1528_v63, %v1528_v63  ;;  %v16794_v56 = vld [vmem:[%s15916_s24 + $0x194] sm:$0x7] }
 0x247   : > { %15142 = vmatmul.mubr.msk.f32.vlgmr.msra.gmra.mxu1 %vm486_vm0, %v2432_v17  ;;  %15144 = vmatprep.subr.mxu0 %v15679_v8  ;;  %v1469_v17 = vcombine.high %v1453_v62, %v1453_v62  ;;  %v2441_v0 = vsel %vm2357_vm3, %v1470_v6, %v2184_v7  ;;  %v1938_v62 = vld [vmem:[%s15916_s24 + $0x174] sm:$0x7]  ;;  %v1941_v6 = vld [vmem:[%s15916_s24 + $0x180] sm:$0x7]  ;;  %v888_v7 = vadd.f32 %v16477_v12, %v16661_v5 }
 0x248   : > { %15150 = vmatpush3.xpose.msk.msra.mxu1 %vm486_vm0, %v2434_v29  ;;  %15151 = vmatprep.mubr.msk.f32.mxu1 %vm15680_vm2, %v15679_v8  ;;  %v1520_v30 = vcombine.high %v1516_v11, %v1516_v11 }
 0x249   : > { %15137 = vmatmul.mubr.msk.f32.vlgmr.msra.gmra.mxu0 %vm486_vm0, %v2431_v22  ;;  %15159 = vmatprep.subr.mxu1 %v15679_v8  ;;  %v1467_v22 = vrot.slane %v1439_v2, %v15922_v20  ;;  %v1518_v2 = vcombine.high %v1502_v52, %v1502_v52  ;;  %v16751_v24 = vmax.f32 %v888_v7, 0.0 }
 0x24a   : > { %15145 = vmatpush3.xpose.msk.msra.mxu0 %vm486_vm0, %v2433_v13  ;;  %15146 = vmatprep.mubr.msk.f32.mxu0 %vm15680_vm2, %v15679_v8 }
 0x24b   : > { %15152 = vmatmul.mubr.msk.f32.vlgmr.msra.gmra.mxu1 %vm486_vm0, %v2434_v29  ;;  %15154 = vmatprep.subr.mxu0 %v15679_v8  ;;  %v2444_v29 = vsel %vm2357_vm3, %v1469_v17, %v2187_v19  ;;  %v1471_v34 = vcombine.high %v1467_v22, %v1467_v22  ;;  %v1940_v17 = vld [vmem:[%s15916_s24 + $0x17c] sm:$0x7]  ;;  %v1521_v19 = vcombine.high %v16706_v53, %v16706_v53 }
 0x24c   : > { %15160 = vmatpush3.xpose.msk.msra.mxu1 %vm486_vm0, %v2436_v43  ;;  %15161 = vmatprep.mubr.msk.f32.mxu1 %vm15680_vm2, %v15679_v8  ;;  %v1570_v40 = vcombine.high %v16751_v24, %v16751_v24 }
 0x24d   : > { %15147 = vmatmul.mubr.msk.f32.vlgmr.msra.gmra.mxu0 %vm486_vm0, %v2433_v13  ;;  %15169 = vmatprep.subr.mxu1 %v15679_v8  ;;  %v2443_v13 = vsel %vm2357_vm3, %v1467_v22, %v2186_v23  ;;  %v2445_v50 = vsel %vm2357_vm3, %v1471_v34, %v2188_v39  ;;  %v2196_v22 = vrot.slane %v1940_v17, 7  ;;  %v1943_v23 = vld [vmem:[%s15916_s24 + $0x188] sm:$0x7]  ;;  %v1945_v39 = vld [vmem:[%s15916_s24 + $0x190] sm:$0x7] }
 0x24e   : > { %15155 = vmatpush3.xpose.msk.msra.mxu0 %vm486_vm0, %v2435_v46  ;;  %15156 = vmatprep.mubr.msk.f32.mxu0 %vm15680_vm2, %v15679_v8  ;;  %v2199_v34 = vrot.slane %v1943_v23, 7 }
 0x24f   : > { %15162 = vmatmul.mubr.msk.f32.vlgmr.msra.gmra.mxu1 %vm486_vm0, %v2436_v43  ;;  %15164 = vmatprep.subr.mxu0 %v15679_v8  ;;  %v1517_v43 = vcombine.high %v1495_v28, %v1495_v28  ;;  %v14768_v28 = vpop.f32.mrf.mxu1 }
 0x250   : > { %15170 = vmatpush3.xpose.msk.msra.mxu1 %vm486_vm0, %v2438_v48  ;;  %15171 = vmatprep.mubr.msk.f32.mxu1 %vm15680_vm2, %v15679_v8 }
 0x251   : > { %15157 = vmatmul.mubr.msk.f32.vlgmr.msra.gmra.mxu0 %vm486_vm0, %v2435_v46  ;;  %15179 = vmatprep.subr.mxu1 %v15679_v8  ;;  %v2191_v46 = vrot.slane %v1935_v32, 7  ;;  %v1535_v32 = vrot.slane %v1521_v19, %v15922_v20  ;;  %v892_v42 = vpop.f32.mrf.mxu1  ;;  %v2202_v19 = vrot.slane %v16794_v56, 7 }
 0x252   : > { %15165 = vmatpush3.xpose.msk.msra.mxu0 %vm486_vm0, %v2437_v36  ;;  %15166 = vmatprep.mubr.msk.f32.mxu0 %vm15680_vm2, %v15679_v8 }
 0x253   : > { %15172 = vmatmul.mubr.msk.f32.vlgmr.msra.gmra.mxu1 %vm486_vm0, %v2438_v48  ;;  %15174 = vmatprep.subr.mxu0 %v15679_v8  ;;  %v1937_v48 = vld [vmem:[%s15916_s24 + $0x170] sm:$0x7]  ;;  %v2448_v55 = vsel %vm2357_vm3, %v1517_v43, %v2191_v46  ;;  %v2453_v43 = vsel %vm2357_vm3, %v1520_v30, %v2196_v22  ;;  %v1577_v46 = vrot.slane %v16751_v24, %v15922_v20 }
 0x254   : > { %15180 = vmatpush3.xpose.msk.msra.mxu1 %vm486_vm0, %v2440_v61  ;;  %15181 = vmatprep.mubr.msk.f32.mxu1 %vm15680_vm2, %v15679_v8  ;;  %v2193_v47 = vrot.slane %v1937_v48, 7  ;;  %v1944_v48 = vld [vmem:[%s15916_s24 + $0x18c] sm:$0x7]  ;;  %v1537_v49 = vcombine.high %v1535_v32, %v1535_v32  ;;  %v1551_v35 = vrot.slane %v1535_v32, %v15922_v20 }
 0x255   : > { %15167 = vmatmul.mubr.msk.f32.vlgmr.msra.gmra.mxu0 %vm486_vm0, %v2437_v36  ;;  %15189 = vmatprep.subr.mxu1 %v15679_v8  ;;  %v1939_v36 = vld [vmem:[%s15916_s24 + $0x178] sm:$0x7]  ;;  %v1585_v63 = vcombine.high %v1577_v46, %v1577_v46 }
 0x256   : > { %15175 = vmatpush3.xpose.msk.msra.mxu0 %vm486_vm0, %v2439_v4  ;;  %15176 = vmatprep.mubr.msk.f32.mxu0 %vm15680_vm2, %v15679_v8  ;;  %v2450_v1 = vsel %vm2357_vm3, %v1502_v52, %v2193_v47  ;;  %v1947_v52 = vld [vmem:[%s15916_s24 + $0x198] sm:$0x7]  ;;  %v898_v47 = vadd.f32 %v16477_v12, %v14768_v28  ;;  %v1565_v17 = vrot.slane %v1537_v49, %v15922_v20 }
 0x257   : > { %15182 = vmatmul.mubr.msk.f32.vlgmr.msra.gmra.mxu1 %vm486_vm0, %v2440_v61  ;;  %15184 = vmatprep.subr.mxu0 %v15679_v8  ;;  %v2192_v61 = vrot.slane %v1936_v51, 7  ;;  %v2201_v51 = vrot.slane %v1945_v39, 7  ;;  %v16837_v30 = vrot.slane %v1585_v63, %v15922_v20 }
 0x258   : > { %15190 = vmatpush3.xpose.msk.msra.mxu1 %vm486_vm0, %v2442_v16  ;;  %15191 = vmatprep.mubr.msk.f32.mxu1 %vm15680_vm2, %v15679_v8  ;;  %v1569_v39 = vcombine.high %v1565_v17, %v1565_v17  ;;  %v2459_v49 = vsel %vm2357_vm3, %v1565_v17, %v2202_v19 }
 0x259   : > { %15177 = vmatmul.mubr.msk.f32.vlgmr.msra.gmra.mxu0 %vm486_vm0, %v2439_v4  ;;  %15199 = vmatprep.subr.mxu1 %v15679_v8  ;;  %v2195_v4 = vrot.slane %v1939_v36, 7  ;;  %v2449_v10 = vsel %vm2357_vm3, %v1519_v58, %v2192_v61  ;;  %v893_v36 = vadd.f32 %v16477_v12, %v892_v42 }
 0x25a   : > { %15185 = vmatpush3.xpose.msk.msra.mxu0 %vm486_vm0, %v2441_v0  ;;  %15186 = vmatprep.mubr.msk.f32.mxu0 %vm15680_vm2, %v15679_v8 }
 0x25b   : > { %15192 = vmatmul.mubr.msk.f32.vlgmr.msra.gmra.mxu1 %vm486_vm0, %v2442_v16  ;;  %15194 = vmatprep.subr.mxu0 %v15679_v8  ;;  %v2194_v16 = vrot.slane %v1938_v62, 7  ;;  %v2452_v5 = vsel %vm2357_vm3, %v1518_v2, %v2195_v4  ;;  %v2200_v62 = vrot.slane %v1944_v48, 7  ;;  %v2203_v2 = vrot.slane %v1947_v52, 7 }
 0x25c   : > { %15200 = vmatpush3.xpose.msk.msra.mxu1 %vm486_vm0, %v2444_v29  ;;  %15201 = vmatprep.mubr.msk.f32.mxu1 %vm15680_vm2, %v15679_v8 }
 0x25d   : > { %15187 = vmatmul.mubr.msk.f32.vlgmr.msra.gmra.mxu0 %vm486_vm0, %v2441_v0  ;;  %15209 = vmatprep.subr.mxu1 %v15679_v8  ;;  %v2197_v0 = vrot.slane %v1941_v6, 7  ;;  %v16812_v6 = vld [vmem:[%s15916_s24 + $0x19c] sm:$0x7] }
 0x25e   : > { %15195 = vmatpush3.xpose.msk.msra.mxu0 %vm486_vm0, %v2443_v13  ;;  %15196 = vmatprep.mubr.msk.f32.mxu0 %vm15680_vm2, %v15679_v8  ;;  %v2204_v28 = vrot.slane %v16812_v6, 7  ;;  %v1953_v6 = vld [vmem:[%s15916_s24 + $0x1b0] sm:$0x7] }
 0x25f   : > { %15202 = vmatmul.mubr.msk.f32.vlgmr.msra.gmra.mxu1 %vm486_vm0, %v2444_v29  ;;  %15204 = vmatprep.subr.mxu0 %v15679_v8  ;;  %v2451_v29 = vsel %vm2357_vm3, %v1516_v11, %v2194_v16  ;;  %v2454_v33 = vsel %vm2357_vm3, %v1544_v21, %v2197_v0  ;;  %v2458_v11 = vsel %vm2357_vm3, %v1551_v35, %v2201_v51  ;;  %v16826_v0 = vmax.f32 %v898_v47, 0.0  ;;  %v1950_v47 = vld [vmem:[%s15916_s24 + $0x1a4] sm:$0x7] }
 0x260   : > { %15210 = vmatpush3.xpose.msk.msra.mxu1 %vm486_vm0, %v2446_v44  ;;  %15211 = vmatprep.mubr.msk.f32.mxu1 %vm15680_vm2, %v15679_v8  ;;  %v1567_v16 = vcombine.high %v1551_v35, %v1551_v35  ;;  %v2206_v19 = vrot.slane %v1950_v47, 7 }
 0x261   : > { %15197 = vmatmul.mubr.msk.f32.vlgmr.msra.gmra.mxu0 %vm486_vm0, %v2443_v13  ;;  %15219 = vmatprep.subr.mxu1 %v15679_v8  ;;  %v1566_v13 = vcombine.high %v1544_v21, %v1544_v21  ;;  %v16819_v21 = vmax.f32 %v893_v36, 0.0 }
 0x262   : > { %15205 = vmatpush3.xpose.msk.msra.mxu0 %vm486_vm0, %v2445_v50  ;;  %15206 = vmatprep.mubr.msk.f32.mxu0 %vm15680_vm2, %v15679_v8 }
 0x263   : > { %15212 = vmatmul.mubr.msk.f32.vlgmr.msra.gmra.mxu1 %vm486_vm0, %v2446_v44  ;;  %15214 = vmatprep.subr.mxu0 %v15679_v8  ;;  %v1558_v44 = vrot.slane %v1536_v27, %v15922_v20  ;;  %v16850_v42 = vrot.slane %v16819_v21, %v15922_v20 }
 0x264   : > { %15220 = vmatpush3.xpose.msk.msra.mxu1 %vm486_vm0, %v2448_v55  ;;  %15221 = vmatprep.mubr.msk.f32.mxu1 %vm15680_vm2, %v15679_v8 }
 0x265   : > { %15207 = vmatmul.mubr.msk.f32.vlgmr.msra.gmra.mxu0 %vm486_vm0, %v2445_v50  ;;  %15229 = vmatprep.subr.mxu1 %v15679_v8  ;;  %v2456_v50 = vsel %vm2357_vm3, %v1566_v13, %v2199_v34  ;;  %v2455_v61 = vsel %vm2357_vm3, %v1558_v44, %v2198_v45  ;;  %v1568_v12 = vcombine.high %v1558_v44, %v1558_v44 }
 0x266   : > { %15215 = vmatpush3.xpose.msk.msra.mxu0 %vm486_vm0, %v2447_v57  ;;  %15216 = vmatprep.mubr.msk.f32.mxu0 %vm15680_vm2, %v15679_v8  ;;  %v2460_v34 = vsel %vm2357_vm3, %v1567_v16, %v2203_v2 }
 0x267   : > { %15222 = vmatmul.mubr.msk.f32.vlgmr.msra.gmra.mxu1 %vm486_vm0, %v2448_v55  ;;  %15224 = vmatprep.subr.mxu0 %v15679_v8  ;;  %v16786_v55 = vld [vmem:[%s15916_s24 + $0x1a0] sm:$0x7]  ;;  %v2457_v27 = vsel %vm2357_vm3, %v1568_v12, %v2200_v62  ;;  %v2461_v12 = vsel %vm2357_vm3, %v1569_v39, %v2204_v28 }
 0x268   : > { %15230 = vmatpush3.xpose.msk.msra.mxu1 %vm486_vm0, %v2450_v1  ;;  %15231 = vmatprep.mubr.msk.f32.mxu1 %vm15680_vm2, %v15679_v8  ;;  %v2205_v4 = vrot.slane %v16786_v55, 7 }
 0x269   : > { %15217 = vmatmul.mubr.msk.f32.vlgmr.msra.gmra.mxu0 %vm486_vm0, %v2447_v57  ;;  %15239 = vmatprep.subr.mxu1 %v15679_v8  ;;  %v16797_v57 = vrot.slane %v1570_v40, %v15922_v20  ;;  %v1951_v40 = vld [vmem:[%s15916_s24 + $0x1a8] sm:$0x7] }
 0x26a   : > { %15225 = vmatpush3.xpose.msk.msra.mxu0 %vm486_vm0, %v2449_v10  ;;  %15226 = vmatprep.mubr.msk.f32.mxu0 %vm15680_vm2, %v15679_v8  ;;  %v2207_v55 = vrot.slane %v1951_v40, 7  ;;  %v2209_v40 = vrot.slane %v1953_v6, 7 }
 0x26b   : > { %15232 = vmatmul.mubr.msk.f32.vlgmr.msra.gmra.mxu1 %vm486_vm0, %v2450_v1  ;;  %15234 = vmatprep.subr.mxu0 %v15679_v8  ;;  %v16805_v1 = vrot.slane %v1577_v46, %v15922_v20 }
 0x26c   : > { %15240 = vmatpush3.xpose.msk.msra.mxu1 %vm486_vm0, %v2452_v5  ;;  %15241 = vmatprep.mubr.msk.f32.mxu1 %vm15680_vm2, %v15679_v8 }
 0x26d   : > { %15227 = vmatmul.mubr.msk.f32.vlgmr.msra.gmra.mxu0 %vm486_vm0, %v2449_v10  ;;  %15249 = vmatprep.subr.mxu1 %v15679_v8  ;;  %v1615_v32 = vcombine.high %v16805_v1, %v16805_v1  ;;  %v2462_v52 = vsel %vm2357_vm3, %v16805_v1, %v2205_v4 }
 0x26e   : > { %15235 = vmatpush3.xpose.msk.msra.mxu0 %vm486_vm0, %v2451_v29  ;;  %15236 = vmatprep.mubr.msk.f32.mxu0 %vm15680_vm2, %v15679_v8 }
 0x26f   : > { %15242 = vmatmul.mubr.msk.f32.vlgmr.msra.gmra.mxu1 %vm486_vm0, %v2452_v5  ;;  %15244 = vmatprep.subr.mxu0 %v15679_v8  ;;  %v1586_v5 = vcombine.high %v16797_v57, %v16797_v57 }
 0x270   : > { %15250 = vmatpush3.xpose.msk.msra.mxu1 %vm486_vm0, %v2454_v33  ;;  %15251 = vmatprep.mubr.msk.f32.mxu1 %vm15680_vm2, %v15679_v8 }
 0x271   : > { %15237 = vmatmul.mubr.msk.f32.vlgmr.msra.gmra.mxu0 %vm486_vm0, %v2451_v29  ;;  %15259 = vmatprep.subr.mxu1 %v15679_v8  ;;  %v16834_v29 = vrot.slane %v16797_v57, %v15922_v20 }
 0x272   : > { %15245 = vmatpush3.xpose.msk.msra.mxu0 %vm486_vm0, %v2453_v43  ;;  %15246 = vmatprep.mubr.msk.f32.mxu0 %vm15680_vm2, %v15679_v8 }
 0x273   : > { %15252 = vmatmul.mubr.msk.f32.vlgmr.msra.gmra.mxu1 %vm486_vm0, %v2454_v33  ;;  %15254 = vmatprep.subr.mxu0 %v15679_v8 }
 0x274   : > { %15260 = vmatpush3.xpose.msk.msra.mxu1 %vm486_vm0, %v2456_v50  ;;  %15261 = vmatprep.mubr.msk.f32.mxu1 %vm15680_vm2, %v15679_v8 }
 0x275   : > { %v16799_v58 = vpop.f32.mrf.mxu0  ;;  %15247 = vmatmul.mubr.msk.f32.vlgmr.msra.gmra.mxu0 %vm486_vm0, %v2453_v43  ;;  %15269 = vmatprep.subr.mxu1 %v15679_v8 }
 0x276   : > { %15255 = vmatpush3.xpose.msk.msra.mxu0 %vm486_vm0, %v2455_v61  ;;  %15256 = vmatprep.mubr.msk.f32.mxu0 %vm15680_vm2, %v15679_v8 }
 0x277   : > { %v14773_v7 = vpop.f32.mrf.mxu0  ;;  %v2701_v10 = vpop.f32.mrf.mxu1  ;;  %15262 = vmatmul.mubr.msk.f32.vlgmr.msra.gmra.mxu1 %vm486_vm0, %v2456_v50  ;;  %15264 = vmatprep.subr.mxu0 %v15679_v8 }
 0x278   : > { %15270 = vmatpush3.xpose.msk.msra.mxu1 %vm486_vm0, %v2458_v11  ;;  %15271 = vmatprep.mubr.msk.f32.mxu1 %vm15680_vm2, %v15679_v8  ;;  %v11961_v44 = vrot.slane %v2701_v10, 6 }
 0x279   : > { %v2628_v22 = vpop.f32.mrf.mxu0  ;;  %v14783_v23 = vpop.f32.mrf.mxu1  ;;  %15257 = vmatmul.mubr.msk.f32.vlgmr.msra.gmra.mxu0 %vm486_vm0, %v2455_v61  ;;  %15279 = vmatprep.subr.mxu1 %v15679_v8 }
 0x27a   : > { %v11958_v31 = vrot.slane %v2628_v22, 7  ;;  %15265 = vmatpush3.xpose.msk.msra.mxu0 %vm486_vm0, %v2457_v27  ;;  %15266 = vmatprep.mubr.msk.f32.mxu0 %vm15680_vm2, %v15679_v8  ;;  %v1668_v22 = vcombine.high %v16826_v0, %v16826_v0  ;;  %v1619_v23 = vcombine.high %v16819_v21, %v16819_v21 }
 0x27b   : > { %v14778_v33 = vpop.f32.mrf.mxu0  ;;  %v2847_v13 = vpop.f32.mrf.mxu1  ;;  %15272 = vmatmul.mubr.msk.f32.vlgmr.msra.gmra.mxu1 %vm486_vm0, %v2458_v11  ;;  %15274 = vmatprep.subr.mxu0 %v15679_v8 }
 0x27c   : > { %v12404_v43 = vsel %vm11965_vm6, %v11958_v31, %v16799_v58  ;;  %15280 = vmatpush3.xpose.msk.msra.mxu1 %vm486_vm0, %v2460_v34  ;;  %15281 = vmatprep.mubr.msk.f32.mxu1 %vm15680_vm2, %v15679_v8  ;;  %v11960_v45 = vsel %vm11959_vm4, %v11958_v31, %v16799_v58  ;;  %v12586_v50 = vsel %vm11968_vm7, %v11958_v31, %v16799_v58  ;;  %v11967_v36 = vrot.slane %v2847_v13, 4 }
 0x27d   : > { %v2774_v46 = vpop.f32.mrf.mxu0  ;;  %v14793_v48 = vpop.f32.mrf.mxu1  ;;  %15267 = vmatmul.mubr.msk.f32.vlgmr.msra.gmra.mxu0 %vm486_vm0, %v2457_v27  ;;  %15289 = vmatprep.subr.mxu1 %v15679_v8  ;;  %v12222_v35 = vsel %vm11962_vm5, %v11958_v31, %v16799_v58  ;;  %v12587_v58 = vsel %vm11971_vm8, %v11961_v44, %v12586_v50  ;;  %v12405_v62 = vsel %vm11968_vm7, %v11961_v44, %v12404_v43  ;;  %v1952_v43 = vld [vmem:[%s15916_s24 + $0x1ac] sm:$0x7] }
 0x27e   : > { %v11964_v51 = vrot.slane %v2774_v46, 5  ;;  %15275 = vmatpush3.xpose.msk.msra.mxu0 %vm486_vm0, %v2459_v49  ;;  %15276 = vmatprep.mubr.msk.f32.mxu0 %vm15680_vm2, %v15679_v8  ;;  %v11963_v63 = vsel %vm11962_vm5, %v11961_v44, %v11960_v45  ;;  %v12223_v17 = vsel %vm11965_vm6, %v11961_v44, %v12222_v35  ;;  %v16898_v31 = vrot.slane %v16850_v42, %v15922_v20 }
 0x27f   : > { %v14788_v56 = vpop.f32.mrf.mxu0  ;;  %v2993_v61 = vpop.f32.mrf.mxu1  ;;  %15282 = vmatmul.mubr.msk.f32.vlgmr.msra.gmra.mxu1 %vm486_vm0, %v2460_v34  ;;  %15284 = vmatprep.subr.mxu0 %v15679_v8  ;;  %v2464_v34 = vsel %vm2357_vm3, %v1615_v32, %v2207_v55 }
 0x280   : > { %15290 = vmatpush3.xpose.msk.msra.mxu1 %vm486_vm0, %v2462_v52  ;;  %v12588_v2 = vsel %vm11974_vm9, %v11964_v51, %v12587_v58  ;;  %15291 = vmatprep.mubr.msk.f32.mxu1 %vm15680_vm2, %v15679_v8  ;;  %v12406_v4 = vsel %vm11971_vm8, %v11964_v51, %v12405_v62  ;;  %v11966_v7 = vsel %vm11965_vm6, %v11964_v51, %v11963_v63  ;;  %v11973_v44 = vrot.slane %v2993_v61, 2  ;;  %v1954_v63 = vld [vmem:[%s15916_s24 + $0x1b4] sm:$0x7] }
 0x281   : > { %v2920_v10 = vpop.f32.mrf.mxu0  ;;  %v14803_v11 = vpop.f32.mrf.mxu1  ;;  %15277 = vmatmul.mubr.msk.f32.vlgmr.msra.gmra.mxu0 %vm486_vm0, %v2459_v49  ;;  %v12589_v16 = vsel %vm11977_vm10, %v11967_v36, %v12588_v2  ;;  %15299 = vmatprep.subr.mxu1 %v15679_v8  ;;  %v12224_v28 = vsel %vm11968_vm7, %v11964_v51, %v12223_v17  ;;  %v12407_v39 = vsel %vm11974_vm9, %v11967_v36, %v12406_v4  ;;  %v1957_v49 = vld [vmem:[%s15916_s24 + $0x1c0] sm:$0x7]  ;;  %v2208_v56 = vrot.slane %v1952_v43, 7  ;;  %v16950_v17 = vld [vmem:[%s15916_s24 + $0x1bc] sm:$0x7] }
 0x282   : > { %v11970_v27 = vrot.slane %v2920_v10, 3  ;;  %12697 = vrot.lane.b32.xlu0 %v12589_v16, %s18232_s12  ;;  %15285 = vmatpush3.xpose.msk.msra.mxu0 %vm486_vm0, %v2461_v12  ;;  %v11969_v45 = vsel %vm11968_vm7, %v11967_v36, %v11966_v7  ;;  %v12225_v48 = vsel %vm11971_vm8, %v11967_v36, %v12224_v28  ;;  %v2463_v51 = vsel %vm2357_vm3, %v16837_v30, %v2206_v19 }
 0x283   : > { %v14798_v33 = vpop.f32.mrf.mxu0  ;;  %v16900_v13 = vpop.f32.mrf.mxu1  ;;  %15292 = vmatmul.mubr.msk.f32.vlgmr.msra.gmra.mxu1 %vm486_vm0, %v2462_v52  ;;  %15286 = vmatprep.mubr.msk.f32.mxu0 %vm15680_vm2, %v15679_v8  ;;  %v1955_v52 = vld [vmem:[%s15916_s24 + $0x1b8] sm:$0x7]  ;;  %v1617_v36 = vcombine.high %v16837_v30, %v16837_v30  ;;  %v1616_v62 = vcombine.high %v16834_v29, %v16834_v29  ;;  %v2213_v2 = vrot.slane %v1957_v49, 7  ;;  %v16944_v10 = vrot.slane %v1619_v23, %v15922_v20 }
 0x284   : > { %15300 = vmatpush3.xpose.msk.msra.mxu1 %vm486_vm0, %v2464_v34  ;;  %v12408_v46 = vsel %vm11977_vm10, %v11970_v27, %v12407_v39  ;;  %15294 = vmatprep.subr.mxu0 %v15679_v8  ;;  %v11972_v1 = vsel %vm11971_vm8, %v11970_v27, %v11969_v45  ;;  %v12226_v35 = vsel %vm11974_vm9, %v11970_v27, %v12225_v48  ;;  %v2211_v6 = vrot.slane %v1955_v52, 7 }
 0x285   : > { %v14813_v32 = vpop.f32.mrf.mxu1  ;;  %12515 = vrot.lane.b32.xlu1 %v12408_v46, %s15683_s17  ;;  %v3066_v50 = vpop.f32.mrf.mxu0  ;;  %15287 = vmatmul.mubr.msk.f32.vlgmr.msra.gmra.mxu0 %vm486_vm0, %v2461_v12  ;;  %v12227_v47 = vsel %vm11977_vm10, %v11973_v44, %v12226_v35  ;;  %v2466_v12 = vsel %vm2357_vm3, %v16834_v29, %v2209_v40  ;;  %v12590_v30 = vsel %vm11959_vm4, %v11973_v44, %v11970_v27  ;;  %v2210_v33 = vrot.slane %v1954_v63, 7  ;;  %v1959_v35 = vld [vmem:[%s15916_s24 + $0x1c8] sm:$0x7] }
 0x286   : > { %v11976_v55 = vrot.slane %v3066_v50, 1  ;;  %15301 = vmatprep.mubr.msk.f32.mxu1 %vm15680_vm2, %v15679_v8  ;;  %15295 = vmatpush3.xpose.msk.msra.mxu0 %vm486_vm0, %v2463_v51  ;;  %v11975_v7 = vsel %vm11974_vm9, %v11973_v44, %v11972_v1  ;;  %v2465_v28 = vsel %vm2357_vm3, %v1617_v36, %v2208_v56  ;;  %v1614_v23 = vrot.slane %v1586_v5, %v15922_v20  ;;  %v1958_v56 = vld [vmem:[%s15916_s24 + $0x1c4] sm:$0x7] }
 0x287   : > { %12333 = vrot.lane.b32.xlu0 %v12227_v47, %s15684_s0  ;;  %v14808_v61 = vpop.f32.mrf.mxu0  ;;  %v3285_v58 = vpop.f32.mrf.mxu1  ;;  %15302 = vmatmul.mubr.msk.f32.vlgmr.msra.gmra.mxu1 %vm486_vm0, %v2464_v34  ;;  %v1634_v34 = vcombine.high %v16850_v42, %v16850_v42  ;;  %v2470_v57 = vsel %vm2357_vm3, %v16898_v31, %v2213_v2  ;;  %v2468_v42 = vsel %vm2357_vm3, %v1616_v62, %v2211_v6  ;;  %v2215_v2 = vrot.slane %v1959_v35, 7 }
 0x288   : > { %v12409_v4 = vsel %vm11959_vm4, %v11976_v55, %v11973_v44  ;;  %15309 = vmatprep.subr.mxu1 %v15679_v8  ;;  %15296 = vmatprep.mubr.msk.f32.mxu0 %vm15680_vm2, %v15679_v8  ;;  %v12591_v29 = vsel %vm11962_vm5, %v11976_v55, %v12590_v30  ;;  %v11978_v19 = vsel %vm11977_vm10, %v11976_v55, %v11975_v7  ;;  %v2212_v44 = vrot.slane %v16950_v17, 7 }
 0x289   : > { %15310 = vmatpush3.xpose.msk.msra.mxu1 %vm486_vm0, %v2466_v12  ;;  %v3212_v11 = vpop.f32.mrf.mxu0  ;;  %v14823_v16 = vpop.f32.mrf.mxu1  ;;  %15297 = vmatmul.mubr.msk.f32.vlgmr.msra.gmra.mxu0 %vm486_vm0, %v2463_v51  ;;  %12206 = vst.msk [vmem:[#allocation2] sm:$0xff] %vm12205_vm11, %v11978_v19  ;;  %v12410_v39 = vsel %vm11962_vm5, %v16900_v13, %v12409_v4  ;;  %v12592_v45 = vsel %vm11965_vm6, %v16900_v13, %v12591_v29  ;;  %v11981_v46 = vrot.slane %v3285_v58, 6  ;;  %v1961_v4 = vld [vmem:[%s15916_s24 + $0x1d0] sm:$0x7]  ;;  %v2214_v17 = vrot.slane %v1958_v56, 7 }
 0x28a   : > { %v11979_v27 = vrot.slane %v3212_v11, 7  ;;  %15304 = vmatprep.subr.mxu0 %v15679_v8  ;;  %15311 = vmatprep.mubr.msk.f32.mxu1 %vm15680_vm2, %v15679_v8  ;;  %v1664_v50 = vcombine.high %v16898_v31, %v16898_v31  ;;  %v12228_v51 = vsel %vm11959_vm4, %v16900_v13, %v11976_v55  ;;  %v2467_v47 = vsel %vm2357_vm3, %v1614_v23, %v2210_v33 }
 0x28b   : > { %15305 = vmatpush3.xpose.msk.msra.mxu0 %vm486_vm0, %v2465_v28  ;;  %v14818_v40 = vpop.f32.mrf.mxu0  ;;  %v3431_v43 = vpop.f32.mrf.mxu1  ;;  %15319 = vmatprep.subr.mxu1 %v15679_v8  ;;  %v1618_v36 = vcombine.high %v1614_v23, %v1614_v23  ;;  %v17007_v6 = vrot.slane %v16826_v0, %v15922_v20 }
 0x28c   : > { %v12411_v5 = vsel %vm11965_vm6, %v11979_v27, %v12410_v39  ;;  %15312 = vmatmul.mubr.msk.f32.vlgmr.msra.gmra.mxu1 %vm486_vm0, %v2466_v12  ;;  %15306 = vmatprep.mubr.msk.f32.mxu0 %vm15680_vm2, %v15679_v8  ;;  %v11980_v48 = vsel %vm11959_vm4, %v11979_v27, %v16900_v13  ;;  %v12593_v32 = vsel %vm11968_vm7, %v11979_v27, %v12592_v45  ;;  %v11985_v58 = vrot.slane %v3431_v43, 4 }
 0x28d   : > { %15320 = vmatpush3.xpose.msk.msra.mxu1 %vm486_vm0, %v2468_v42  ;;  %v3358_v49 = vpop.f32.mrf.mxu0  ;;  %v14833_v1 = vpop.f32.mrf.mxu1  ;;  %15314 = vmatprep.subr.mxu0 %v15679_v8  ;;  %v12229_v61 = vsel %vm11962_vm5, %v11979_v27, %v12228_v51  ;;  %v12594_v13 = vsel %vm11971_vm8, %v11981_v46, %v12593_v32  ;;  %v12412_v55 = vsel %vm11968_vm7, %v11981_v46, %v12411_v5  ;;  %v2217_v5 = vrot.slane %v1961_v4, 7 }
 0x28e   : > { %v11983_v52 = vrot.slane %v3358_v49, 5  ;;  %15307 = vmatmul.mubr.msk.f32.vlgmr.msra.gmra.mxu0 %vm486_vm0, %v2465_v28  ;;  %15321 = vmatprep.mubr.msk.f32.mxu1 %vm15680_vm2, %v15679_v8  ;;  %v11982_v62 = vsel %vm11962_vm5, %v11981_v46, %v11980_v48  ;;  %v2469_v27 = vsel %vm2357_vm3, %v1618_v36, %v2212_v44  ;;  %v17018_v28 = vrot.slane %v1634_v34, %v15922_v20 }
 0x28f   : > { %15315 = vmatpush3.xpose.msk.msra.mxu0 %vm486_vm0, %v2467_v47  ;;  %v14828_v31 = vpop.f32.mrf.mxu0  ;;  %v3577_v12 = vpop.f32.mrf.mxu1  ;;  %15329 = vmatprep.subr.mxu1 %v15679_v8  ;;  %v12230_v23 = vsel %vm11965_vm6, %v11981_v46, %v12229_v61  ;;  %v17028_v43 = vrot.slane %v16944_v10, %v15922_v20  ;;  %v2472_v44 = vsel %vm2357_vm3, %v1664_v50, %v2215_v2  ;;  %v1960_v46 = vld [vmem:[%s15916_s24 + $0x1cc] sm:$0x7]  ;;  %v1963_v50 = vld [vmem:[%s15916_s24 + $0x1d8] sm:$0x7] }
 0x290   : > { %15322 = vmatmul.mubr.msk.f32.vlgmr.msra.gmra.mxu1 %vm486_vm0, %v2468_v42  ;;  %15316 = vmatprep.mubr.msk.f32.mxu0 %vm15680_vm2, %v15679_v8  ;;  %v12595_v63 = vsel %vm11974_vm9, %v11983_v52, %v12594_v13  ;;  %v12413_v30 = vsel %vm11971_vm8, %v11983_v52, %v12412_v55  ;;  %v11984_v7 = vsel %vm11965_vm6, %v11983_v52, %v11982_v62  ;;  %v11989_v35 = vrot.slane %v3577_v12, 2  ;;  %v1965_v55 = vld [vmem:[%s15916_s24 + $0x1e0] sm:$0x7] }
 0x291   : > { %15330 = vmatpush3.xpose.msk.msra.mxu1 %vm486_vm0, %v2470_v57  ;;  %v3504_v29 = vpop.f32.mrf.mxu0  ;;  %v14843_v11 = vpop.f32.mrf.mxu1  ;;  %15324 = vmatprep.subr.mxu0 %v15679_v8  ;;  %v12596_v16 = vsel %vm11977_vm10, %v11985_v58, %v12595_v63  ;;  %v12414_v40 = vsel %vm11974_vm9, %v11985_v58, %v12413_v30  ;;  %v12231_v34 = vsel %vm11968_vm7, %v11983_v52, %v12230_v23  ;;  %v2216_v13 = vrot.slane %v1960_v46, 7 }
 0x292   : > { %v11987_v19 = vrot.slane %v3504_v29, 3  ;;  %15317 = vmatmul.mubr.msk.f32.vlgmr.msra.gmra.mxu0 %vm486_vm0, %v2467_v47  ;;  %15331 = vmatprep.mubr.msk.f32.mxu1 %vm15680_vm2, %v15679_v8  ;;  %v11986_v42 = vsel %vm11968_vm7, %v11985_v58, %v11984_v7  ;;  %v17039_v48 = vrot.slane %v17007_v6, %v15922_v20  ;;  %v1635_v49 = vcombine.high %v16944_v10, %v16944_v10  ;;  %v1962_v47 = vld [vmem:[%s15916_s24 + $0x1d4] sm:$0x7] }
 0x293   : > { %15325 = vmatpush3.xpose.msk.msra.mxu0 %vm486_vm0, %v2469_v27  ;;  %12699 = vrot.lane.b32.xlu1 %v12596_v16, %s18232_s12  ;;  %v14838_v33 = vpop.f32.mrf.mxu0  ;;  %v17023_v39 = vpop.f32.mrf.mxu1  ;;  %v2471_v10 = vsel %vm2357_vm3, %v17018_v28, %v2214_v17  ;;  %v12232_v52 = vsel %vm11971_vm8, %v11985_v58, %v12231_v34  ;;  %v2474_v61 = vsel %vm2357_vm3, %v17028_v43, %v2217_v5  ;;  %v2219_v63 = vrot.slane %v1963_v50, 7 }
 0x294   : > { %15332 = vmatmul.mubr.msk.f32.vlgmr.msra.gmra.mxu1 %vm486_vm0, %v2470_v57  ;;  %15339 = vmatprep.subr.mxu1 %v15679_v8  ;;  %v12415_v45 = vsel %vm11977_vm10, %v11987_v19, %v12414_v40  ;;  %v11988_v1 = vsel %vm11971_vm8, %v11987_v19, %v11986_v42  ;;  %v12233_v31 = vsel %vm11974_vm9, %v11987_v19, %v12232_v52  ;;  %v2218_v11 = vrot.slane %v1962_v47, 7 }
 0x295   : > { %15326 = vmatprep.mubr.msk.f32.mxu0 %vm15680_vm2, %v15679_v8  ;;  %15340 = vmatpush3.xpose.msk.msra.mxu1 %vm486_vm0, %v2472_v44  ;;  %v14853_v57 = vpop.f32.mrf.mxu1  ;;  %v3650_v32 = vpop.f32.mrf.mxu0  ;;  %v1666_v12 = vcombine.high %v17018_v28, %v17018_v28  ;;  %v12597_v62 = vsel %vm11959_vm4, %v11989_v35, %v11987_v19  ;;  %v1665_v58 = vcombine.high %v17028_v43, %v17028_v43  ;;  %v2221_v28 = vrot.slane %v1965_v55, 7  ;;  %v1966_v55 = vld [vmem:[%s15916_s24 + $0x1e4] sm:$0x7] }
 0x296   : > { %15327 = vmatmul.mubr.msk.f32.vlgmr.msra.gmra.mxu0 %vm486_vm0, %v2469_v27  ;;  %15334 = vmatprep.subr.mxu0 %v15679_v8  ;;  %v11991_v51 = vrot.slane %v3650_v32, 1  ;;  %v11990_v2 = vsel %vm11974_vm9, %v11989_v35, %v11988_v1  ;;  %v12234_v17 = vsel %vm11977_vm10, %v11989_v35, %v12233_v31  ;;  %v17079_v27 = vrot.slane %v1635_v49, %v15922_v20  ;;  %v1967_v31 = vld [vmem:[%s15916_s24 + $0x1e8] sm:$0x7] }
 0x297   : > { %12517 = vrot.lane.b32.xlu0 %v12415_v45, %s15683_s17  ;;  %15335 = vmatpush3.xpose.msk.msra.mxu0 %vm486_vm0, %v2471_v10  ;;  %v14848_v36 = vpop.f32.mrf.mxu0  ;;  %v3869_v56 = vpop.f32.mrf.mxu1  ;;  %v17086_v23 = vrot.slane %v1668_v22, %v15922_v20  ;;  %v2473_v33 = vsel %vm2357_vm3, %v1666_v12, %v2216_v13  ;;  %v2476_v34 = vsel %vm2357_vm3, %v1665_v58, %v2219_v63  ;;  %v1964_v22 = vld [vmem:[%s15916_s24 + $0x1dc] sm:$0x7] }
 0x298   : > { %15341 = vmatprep.mubr.msk.f32.mxu1 %vm15680_vm2, %v15679_v8  ;;  %15349 = vmatprep.subr.mxu1 %v15679_v8  ;;  %v12416_v30 = vsel %vm11959_vm4, %v11991_v51, %v11989_v35  ;;  %v12598_v4 = vsel %vm11962_vm5, %v11991_v51, %v12597_v62  ;;  %v11992_v16 = vsel %vm11977_vm10, %v11991_v51, %v11990_v2 }
 0x299   : > { %15342 = vmatmul.mubr.msk.f32.vlgmr.msra.gmra.mxu1 %vm486_vm0, %v2472_v44  ;;  %15336 = vmatprep.mubr.msk.f32.mxu0 %vm15680_vm2, %v15679_v8  ;;  %v14863_v7 = vpop.f32.mrf.mxu1  ;;  %v3796_v29 = vpop.f32.mrf.mxu0  ;;  %12207 = vst.msk [vmem:[#allocation2 + $0x8] sm:$0xff] %vm12205_vm11, %v11992_v16  ;;  %v12417_v5 = vsel %vm11962_vm5, %v17023_v39, %v12416_v30  ;;  %v12599_v42 = vsel %vm11965_vm6, %v17023_v39, %v12598_v4  ;;  %v11995_v44 = vrot.slane %v3869_v56, 6  ;;  %v2220_v56 = vrot.slane %v1964_v22, 7 }
 0x29a   : > { %15350 = vmatpush3.xpose.msk.msra.mxu1 %vm486_vm0, %v2474_v61  ;;  %15337 = vmatmul.mubr.msk.f32.vlgmr.msra.gmra.mxu0 %vm486_vm0, %v2471_v10  ;;  %v11993_v19 = vrot.slane %v3796_v29, 7  ;;  %v1683_v32 = vcombine.high %v17007_v6, %v17007_v6  ;;  %v2475_v35 = vsel %vm2357_vm3, %v17079_v27, %v2218_v11  ;;  %v2478_v10 = vsel %vm2357_vm3, %v17039_v48, %v2221_v28 }
 0x29b   : > { %15344 = vmatprep.subr.mxu0 %v15679_v8  ;;  %12335 = vrot.lane.b32.xlu0 %v12234_v17, %s15684_s0  ;;  %v14858_v40 = vpop.f32.mrf.mxu0  ;;  %v4015_v43 = vpop.f32.mrf.mxu1  ;;  %v12235_v52 = vsel %vm11959_vm4, %v17023_v39, %v11991_v51  ;;  %v1667_v36 = vcombine.high %v17079_v27, %v17079_v27  ;;  %v1713_v4 = vcombine.high %v17039_v48, %v17039_v48  ;;  %v2223_v11 = vrot.slane %v1967_v31, 7 }
 0x29c   : > { %15345 = vmatpush3.xpose.msk.msra.mxu0 %vm486_vm0, %v2473_v33  ;;  %15351 = vmatprep.mubr.msk.f32.mxu1 %vm15680_vm2, %v15679_v8  ;;  %v11994_v45 = vsel %vm11959_vm4, %v11993_v19, %v17023_v39  ;;  %v12418_v46 = vsel %vm11965_vm6, %v11993_v19, %v12417_v5  ;;  %v12600_v57 = vsel %vm11968_vm7, %v11993_v19, %v12599_v42  ;;  %v11999_v12 = vrot.slane %v4015_v43, 4 }
 0x29d   : > { %15352 = vmatmul.mubr.msk.f32.vlgmr.msra.gmra.mxu1 %vm486_vm0, %v2474_v61  ;;  %15359 = vmatprep.subr.mxu1 %v15679_v8  ;;  %v3942_v49 = vpop.f32.mrf.mxu0  ;;  %v14873_v1 = vpop.f32.mrf.mxu1  ;;  %v12601_v61 = vsel %vm11971_vm8, %v11995_v44, %v12600_v57  ;;  %v11996_v13 = vsel %vm11962_vm5, %v11995_v44, %v11994_v45  ;;  %v12419_v51 = vsel %vm11968_vm7, %v11995_v44, %v12418_v46  ;;  %v2222_v28 = vrot.slane %v1966_v55, 7 }
 0x29e   : > { %15346 = vmatprep.mubr.msk.f32.mxu0 %vm15680_vm2, %v15679_v8  ;;  %15360 = vmatpush3.xpose.msk.msra.mxu1 %vm486_vm0, %v2476_v34  ;;  %v11997_v50 = vrot.slane %v3942_v49, 5  ;;  %v12236_v62 = vsel %vm11962_vm5, %v11993_v19, %v12235_v52  ;;  %v17143_v16 = vrot.slane %v17086_v23, %v15922_v20  ;;  %v1705_v17 = vrot.slane %v1683_v32, %v15922_v20 }
 0x29f   : > { %15347 = vmatmul.mubr.msk.f32.vlgmr.msra.gmra.mxu0 %vm486_vm0, %v2473_v33  ;;  %15354 = vmatprep.subr.mxu0 %v15679_v8  ;;  %v14868_v6 = vpop.f32.mrf.mxu0  ;;  %v4161_v47 = vpop.f32.mrf.mxu1  ;;  %v2477_v48 = vsel %vm2357_vm3, %v1667_v36, %v2220_v56  ;;  %v1969_v33 = vld [vmem:[%s15916_s24 + $0x1f0] sm:$0x7]  ;;  %v12237_v5 = vsel %vm11965_vm6, %v11995_v44, %v12236_v62  ;;  %v2480_v44 = vsel %vm2357_vm3, %v1713_v4, %v2223_v11  ;;  %v1971_v36 = vld [vmem:[%s15916_s24 + $0x1f8] sm:$0x7] }
 0x2a0   : > { %15355 = vmatpush3.xpose.msk.msra.mxu0 %vm486_vm0, %v2475_v35  ;;  %15361 = vmatprep.mubr.msk.f32.mxu1 %vm15680_vm2, %v15679_v8  ;;  %v12602_v39 = vsel %vm11974_vm9, %v11997_v50, %v12601_v61  ;;  %v11998_v58 = vsel %vm11965_vm6, %v11997_v50, %v11996_v13  ;;  %v12420_v30 = vsel %vm11971_vm8, %v11997_v50, %v12419_v51  ;;  %v12003_v1 = vrot.slane %v4161_v47, 2 }
 0x2a1   : > { %15362 = vmatmul.mubr.msk.f32.vlgmr.msra.gmra.mxu1 %vm486_vm0, %v2476_v34  ;;  %15369 = vmatprep.subr.mxu1 %v15679_v8  ;;  %v4088_v63 = vpop.f32.mrf.mxu0  ;;  %v14883_v2 = vpop.f32.mrf.mxu1  ;;  %v12603_v29 = vsel %vm11977_vm10, %v11999_v12, %v12602_v39  ;;  %v12000_v40 = vsel %vm11968_vm7, %v11999_v12, %v11998_v58  ;;  %v12421_v43 = vsel %vm11974_vm9, %v11999_v12, %v12420_v30  ;;  %v1968_v34 = vld [vmem:[%s15916_s24 + $0x1ec] sm:$0x7]  ;;  %v2225_v32 = vrot.slane %v1969_v33, 7 }
 0x2a2   : > { %15356 = vmatprep.mubr.msk.f32.mxu0 %vm15680_vm2, %v15679_v8  ;;  %15370 = vmatpush3.xpose.msk.msra.mxu1 %vm486_vm0, %v2478_v10  ;;  %v12001_v7 = vrot.slane %v4088_v63, 3  ;;  %v12238_v49 = vsel %vm11968_vm7, %v11997_v50, %v12237_v5  ;;  %v2479_v50 = vsel %vm2357_vm3, %v1705_v17, %v2222_v28  ;;  %v1715_v6 = vcombine.high %v1705_v17, %v1705_v17  ;;  %v1972_v5 = vld [vmem:[%s15916_s24 + $0x1fc] sm:$0x7] }
 0x2a3   : > { %15357 = vmatmul.mubr.msk.f32.vlgmr.msra.gmra.mxu0 %vm486_vm0, %v2475_v35  ;;  %15364 = vmatprep.subr.mxu0 %v15679_v8  ;;  %v14878_v19 = vpop.f32.mrf.mxu0  ;;  %v17149_v27 = vpop.f32.mrf.mxu1  ;;  %v1684_v35 = vcombine.high %v17086_v23, %v17086_v23  ;;  %v2224_v47 = vrot.slane %v1968_v34, 7  ;;  %v12239_v61 = vsel %vm11971_vm8, %v11999_v12, %v12238_v49  ;;  %v1970_v23 = vld [vmem:[%s15916_s24 + $0x1f4] sm:$0x7]  ;;  %v2482_v12 = vsel %vm2357_vm3, %v17143_v16, %v2225_v32  ;;  %v12769_v49 = vld [vmem:[%s18225_s8 + $0x8] sm:$0xff]  ;;  %s18242_s24 = sshll.u32 %s15827_s18, 3  ;;  %s441_s18 = sand.u32 1, %s15669_s30  }
 0x2a4   : > { %15365 = vmatpush3.xpose.msk.msra.mxu0 %vm486_vm0, %v2477_v48  ;;  %15371 = vmatprep.mubr.msk.f32.mxu1 %vm15680_vm2, %v15679_v8  ;;  %v12002_v22 = vsel %vm11971_vm8, %v12001_v7, %v12000_v40  ;;  %v12422_v45 = vsel %vm11977_vm10, %v12001_v7, %v12421_v43  ;;  %v12604_v56 = vsel %vm11959_vm4, %v12003_v1, %v12001_v7  ;;  %v2227_v63 = vrot.slane %v1971_v36, 7  ;;  %s17864_s22 = scalar_lea.vmem %s18243_s3, %s18242_s24  ;;  %s13908_s24 = scalar_lea.hbm %s18230_s13, %s15817_s26 }
 0x2a5   : > { %12701 = vrot.lane.b32.xlu0 %v12603_v29, %s18232_s12  ;;  %15372 = vmatmul.mubr.msk.f32.vlgmr.msra.gmra.mxu1 %vm486_vm0, %v2478_v10  ;;  %v14893_v42 = vpop.f32.mrf.mxu1  ;;  %v4234_v46 = vpop.f32.mrf.mxu0  ;;  %v12004_v31 = vsel %vm11974_vm9, %v12003_v1, %v12002_v22  ;;  %v12240_v51 = vsel %vm11974_vm9, %v12001_v7, %v12239_v61  ;;  %v2481_v2 = vsel %vm2357_vm3, %v1715_v6, %v2224_v47  ;;  %v2226_v11 = vrot.slane %v1970_v23, 7  ;;  %s13898_s28 = scalar_lea.sflag [#allocation7], %s441_s18 }
 0x2a6   : > { %15379 = vmatprep.subr.mxu1 %v15679_v8  ;;  %15366 = vmatprep.mubr.msk.f32.mxu0 %vm15680_vm2, %v15679_v8  ;;  %v17168_v57 = vrot.slane %v4234_v46, 1  ;;  %v1714_v7 = vcombine.high %v17143_v16, %v17143_v16  ;;  %v1712_v29 = vrot.slane %v1684_v35, %v15922_v20  ;;  %v2228_v6 = vrot.slane %v1972_v5, 7 }
 0x2a7   : > { %15380 = vmatpush3.xpose.msk.msra.mxu1 %vm486_vm0, %v2480_v44  ;;  %15367 = vmatmul.mubr.msk.f32.vlgmr.msra.gmra.mxu0 %vm486_vm0, %v2477_v48  ;;  %v14888_v10 = vpop.f32.mrf.mxu0  ;;  %v4453_v52 = vpop.f32.mrf.mxu1  ;;  %v12241_v48 = vsel %vm11977_vm10, %v12003_v1, %v12240_v51 }
 0x2a8   : > { %15374 = vmatprep.subr.mxu0 %v15679_v8  ;;  %12519 = vrot.lane.b32.xlu1 %v12422_v45, %s15683_s17  ;;  %v12605_v13 = vsel %vm11962_vm5, %v17168_v57, %v12604_v56  ;;  %v12006_v62 = vsel %vm11977_vm10, %v17168_v57, %v12004_v31  ;;  %v12423_v17 = vsel %vm11959_vm4, %v17168_v57, %v12003_v1  ;;  %v12009_v40 = vrot.slane %v4453_v52, 6  ;;  %v12768_v31 = vld [vmem:[%s18225_s8] sm:$0xff] }
 0x2a9   : > { %15375 = vmatpush3.xpose.msk.msra.mxu0 %vm486_vm0, %v2479_v50  ;;  %15381 = vmatprep.mubr.msk.f32.mxu1 %vm15680_vm2, %v15679_v8  ;;  %v14903_v39 = vpop.f32.mrf.mxu1  ;;  %v4380_v55 = vpop.f32.mrf.mxu0  ;;  %12208 = vst.msk [vmem:[#allocation2 + $0x10] sm:$0xff] %vm12205_vm11, %v12006_v62  ;;  %v12606_v19 = vsel %vm11965_vm6, %v17149_v27, %v12605_v13  ;;  %v12424_v34 = vsel %vm11962_vm5, %v17149_v27, %v12423_v17 }
 0x2aa   : > { %15382 = vmatmul.mubr.msk.f32.vlgmr.msra.gmra.mxu1 %vm486_vm0, %v2480_v44  ;;  %15389 = vmatprep.subr.mxu1 %v15679_v8  ;;  %v12007_v58 = vrot.slane %v4380_v55, 7  ;;  %v2484_v22 = vsel %vm2357_vm3, %v1714_v7, %v2227_v63  ;;  %v2483_v42 = vsel %vm2357_vm3, %v1712_v29, %v2226_v11  ;;  %v1716_v52 = vcombine.high %v1712_v29, %v1712_v29 }
 0x2ab   : > { %15376 = vmatprep.mubr.msk.f32.mxu0 %vm15680_vm2, %v15679_v8  ;;  %15390 = vmatpush3.xpose.msk.msra.mxu1 %vm486_vm0, %v2482_v12  ;;  %v14898_v30 = vpop.f32.mrf.mxu0  ;;  %v4599_v4 = vpop.f32.mrf.mxu1  ;;  %v12242_v36 = vsel %vm11959_vm4, %v17149_v27, %v17168_v57 }
 0x2ac   : > { %15377 = vmatmul.mubr.msk.f32.vlgmr.msra.gmra.mxu0 %vm486_vm0, %v2479_v50  ;;  %15384 = vmatprep.subr.mxu0 %v15679_v8  ;;  %v12008_v16 = vsel %vm11959_vm4, %v12007_v58, %v17149_v27  ;;  %v12607_v33 = vsel %vm11968_vm7, %v12007_v58, %v12606_v19  ;;  %v12425_v1 = vsel %vm11965_vm6, %v12007_v58, %v12424_v34  ;;  %v12013_v56 = vrot.slane %v4599_v4, 4 }
 0x2ad   : > { %12337 = vrot.lane.b32.xlu1 %v12241_v48, %s15684_s0  ;;  %15385 = vmatpush3.xpose.msk.msra.mxu0 %vm486_vm0, %v2481_v2  ;;  %v4526_v20 = vpop.f32.mrf.mxu0  ;;  %v14913_v28 = vpop.f32.mrf.mxu1  ;;  %v12010_v44 = vsel %vm11962_vm5, %v12009_v40, %v12008_v16  ;;  %v12608_v32 = vsel %vm11971_vm8, %v12009_v40, %v12607_v33  ;;  %v12243_v23 = vsel %vm11962_vm5, %v12007_v58, %v12242_v36  ;;  %v12971_v48 = vld [vmem:[%s18226_s9 + $0x8] sm:$0xff] }
 0x2ae   : > { %15391 = vmatprep.mubr.msk.f32.mxu1 %vm15680_vm2, %v15679_v8  ;;  %15399 = vmatprep.subr.mxu1 %v15679_v8  ;;  %v12011_v43 = vrot.slane %v4526_v20, 5  ;;  %v12426_v27 = vsel %vm11968_vm7, %v12009_v40, %v12425_v1  ;;  %v2485_v58 = vsel %vm2357_vm3, %v1716_v52, %v2228_v6  ;;  %v12244_v30 = vsel %vm11965_vm6, %v12009_v40, %v12243_v23 }
 0x2af   : > { %15392 = vmatmul.mubr.msk.f32.vlgmr.msra.gmra.mxu1 %vm486_vm0, %v2482_v12  ;;  %15386 = vmatprep.mubr.msk.f32.mxu0 %vm15680_vm2, %v15679_v8  ;;  %v14908_v45 = vpop.f32.mrf.mxu0  ;;  %v4745_v46 = vpop.f32.mrf.mxu1  ;;  %vm12750_vm3 = vcmask 130144  }
 0x2b0   : > { %15400 = vmatpush3.xpose.msk.msra.mxu1 %vm486_vm0, %v2484_v22  ;;  %15387 = vmatmul.mubr.msk.f32.vlgmr.msra.gmra.mxu0 %vm486_vm0, %v2481_v2  ;;  %v12012_v35 = vsel %vm11965_vm6, %v12011_v43, %v12010_v44  ;;  %v12609_v47 = vsel %vm11974_vm9, %v12011_v43, %v12608_v32  ;;  %v12427_v55 = vsel %vm11971_vm8, %v12011_v43, %v12426_v27  ;;  %v12017_v62 = vrot.slane %v4745_v46, 2 }
 0x2b1   : > { %15394 = vmatprep.subr.mxu0 %v15679_v8  ;;  %15401 = vmatprep.mubr.msk.f32.mxu1 %vm15680_vm2, %v15679_v8  ;;  %v4672_v50 = vpop.f32.mrf.mxu0  ;;  %v14923_v10 = vpop.f32.mrf.mxu1  ;;  %v12014_v57 = vsel %vm11968_vm7, %v12013_v56, %v12012_v35  ;;  %v12610_v51 = vsel %vm11977_vm10, %v12013_v56, %v12609_v47  ;;  %v12428_v7 = vsel %vm11974_vm9, %v12013_v56, %v12427_v55 }
 0x2b2   : > { %15395 = vmatpush3.xpose.msk.msra.mxu0 %vm486_vm0, %v2483_v42  ;;  %15409 = vmatprep.subr.mxu1 %v12769_v49  ;;  %v12015_v61 = vrot.slane %v4672_v50, 3  ;;  %v12245_v17 = vsel %vm11968_vm7, %v12011_v43, %v12244_v30 }
 0x2b3   : > { %15402 = vmatmul.mubr.msk.f32.vlgmr.msra.gmra.mxu1 %vm486_vm0, %v2484_v22  ;;  %15396 = vmatprep.mubr.msk.f32.mxu0 %vm15680_vm2, %v15679_v8  ;;  %v14918_v13 = vpop.f32.mrf.mxu0  ;;  %v4891_v39 = vpop.f32.mrf.mxu1  ;;  %v12246_v34 = vsel %vm11971_vm8, %v12013_v56, %v12245_v17 }
 0x2b4   : > { %15410 = vmatpush3.msra.mxu1 %v12769_v49  ;;  %15413 = vmatprep.mubr.msk.f32.mxu1 %vm486_vm0, %v15918_v18  ;;  %v12016_v12 = vsel %vm11971_vm8, %v12015_v61, %v12014_v57  ;;  %v12611_v4 = vsel %vm11959_vm4, %v12017_v62, %v12015_v61  ;;  %v12429_v16 = vsel %vm11977_vm10, %v12015_v61, %v12428_v7 }
 0x2b5   : > { %15397 = vmatmul.mubr.msk.f32.vlgmr.msra.gmra.mxu0 %vm486_vm0, %v2483_v42  ;;  %15404 = vmatprep.subr.mxu0 %v15679_v8  ;;  %v4818_v63 = vpop.f32.mrf.mxu0  ;;  %v14933_v2 = vpop.f32.mrf.mxu1  ;;  %v12018_v20 = vsel %vm11974_vm9, %v12017_v62, %v12016_v12  ;;  %v12247_v22 = vsel %vm11974_vm9, %v12015_v61, %v12246_v34 }
 0x2b6   : > { %15411 = vmatprep.subr.mxu1 %v12768_v31  ;;  %15405 = vmatpush3.xpose.msk.msra.mxu0 %vm486_vm0, %v2485_v58  ;;  %v12019_v18 = vrot.slane %v4818_v63, 1 }
 0x2b7   : > { %15412 = vmatpush3.msra.mxu1 %v12768_v31  ;;  %12703 = vrot.lane.b32.xlu1 %v12610_v51, %s18232_s12  ;;  %v14928_v29 = vpop.f32.mrf.mxu0  ;;  %v5037_v11 = vpop.f32.mrf.mxu1 }
 0x2b8   : > { %15414 = vmatmul.mubr.msk.f32.vlgmr.msra.gmra.mxu1 %vm486_vm0, %v15938_v37  ;;  %15406 = vmatprep.mubr.msk.f32.mxu0 %vm15680_vm2, %v15679_v8  ;;  %v12430_v19 = vsel %vm11959_vm4, %v12019_v18, %v12017_v62  ;;  %v12612_v28 = vsel %vm11962_vm5, %v12019_v18, %v12611_v4  ;;  %v12970_v37 = vld [vmem:[%s18226_s9] sm:$0xff]  ;;  %v12020_v43 = vsel %vm11977_vm10, %v12019_v18, %v12018_v20  ;;  %v12023_v44 = vrot.slane %v5037_v11, 6 }
 0x2b9   : > { %15416 = vmatprep.mubr.msk.f32.mxu1 %vm486_vm0, %v16001_v14  ;;  %15407 = vmatmul.mubr.msk.f32.vlgmr.msra.gmra.mxu0 %vm486_vm0, %v2485_v58  ;;  %v4964_v33 = vpop.f32.mrf.mxu0  ;;  %v14943_v40 = vpop.f32.mrf.mxu1  ;;  %12209 = vst.msk [vmem:[#allocation2 + $0x18] sm:$0xff] %vm12205_vm11, %v12020_v43  ;;  %v12431_v14 = vsel %vm11962_vm5, %v4891_v39, %v12430_v19  ;;  %v12613_v49 = vsel %vm11965_vm6, %v4891_v39, %v12612_v28  ;;  %vm12568_vm2 = vcmask 97344  }
 0x2ba   : > { %v12021_v5 = vrot.slane %v4964_v33, 7  ;;  %15437 = vmatprep.subr.mxu0 %v12971_v48  ;;  %v12249_v1 = vsel %vm11959_vm4, %v4891_v39, %v12019_v18 }
 0x2bb   : > { %12521 = vrot.lane.b32.xlu1 %v12429_v16, %s15683_s17  ;;  %v14938_v42 = vpop.f32.mrf.mxu0  ;;  %v5183_v45 = vpop.f32.mrf.mxu1  ;;  %15438 = vmatpush3.msra.mxu0 %v12971_v48 }
 0x2bc   : > { %15417 = vmatmul.mubr.msk.f32.gmra.mxu1 %vm486_vm0, %v16074_v59  ;;  %v12432_v46 = vsel %vm11965_vm6, %v12021_v5, %v12431_v14  ;;  %15439 = vmatprep.subr.mxu0 %v12970_v37  ;;  %v12022_v32 = vsel %vm11959_vm4, %v12021_v5, %v4891_v39  ;;  %v12614_v10 = vsel %vm11968_vm7, %v12021_v5, %v12613_v49  ;;  %v12027_v47 = vrot.slane %v5183_v45, 4 }
 0x2bd   : > { %15419 = vmatprep.mubr.msk.f32.mxu1 %vm486_vm0, %v16140_v41  ;;  %v5110_v35 = vpop.f32.mrf.mxu0  ;;  %v14953_v50 = vpop.f32.mrf.mxu1  ;;  %v12250_v52 = vsel %vm11962_vm5, %v12021_v5, %v12249_v1  ;;  %v12248_v59 = vsel %vm11977_vm10, %v12017_v62, %v12247_v22  ;;  %15440 = vmatpush3.msra.mxu0 %v12970_v37  ;;  %v12615_v61 = vsel %vm11971_vm8, %v12023_v44, %v12614_v10 }
 0x2be   : > { %v12025_v6 = vrot.slane %v5110_v35, 5  ;;  %v12433_v41 = vsel %vm11968_vm7, %v12023_v44, %v12432_v46  ;;  %v12024_v23 = vsel %vm11962_vm5, %v12023_v44, %v12022_v32  ;;  %v12251_v55 = vsel %vm11965_vm6, %v12023_v44, %v12250_v52 }
 0x2bf   : > { %12339 = vrot.lane.b32.xlu1 %v12248_v59, %s15684_s0  ;;  %v14948_v36 = vpop.f32.mrf.mxu0  ;;  %v5329_v56 = vpop.f32.mrf.mxu1 }
 0x2c0   : > { %15420 = vmatmul.mubr.msk.f32.gmra.mxu1 %vm486_vm0, %v16213_v25  ;;  %v12616_v31 = vsel %vm11974_vm9, %v12025_v6, %v12615_v61  ;;  %v12434_v13 = vsel %vm11971_vm8, %v12025_v6, %v12433_v41  ;;  %v12026_v39 = vsel %vm11965_vm6, %v12025_v6, %v12024_v23  ;;  %v12252_v25 = vsel %vm11968_vm7, %v12025_v6, %v12251_v55 }
 0x2c1   : > { %15422 = vmatprep.mubr.msk.f32.mxu1 %vm486_vm0, %v16279_v3  ;;  %v5256_v27 = vpop.f32.mrf.mxu0  ;;  %v14963_v57 = vpop.f32.mrf.mxu1  ;;  %v12617_v51 = vsel %vm11977_vm10, %v12027_v47, %v12616_v31  ;;  %v12435_v63 = vsel %vm11974_vm9, %v12027_v47, %v12434_v13  ;;  %v12028_v3 = vsel %vm11968_vm7, %v12027_v47, %v12026_v39  ;;  %v12253_v7 = vsel %vm11971_vm8, %v12027_v47, %v12252_v25 }
 0x2c2   : > { %v12029_v62 = vrot.slane %v5256_v27, 3  ;;  %12705 = vrot.lane.b32.xlu0 %v12617_v51, %s18232_s12  ;;  %v12031_v29 = vrot.slane %v5329_v56, 2 }
 0x2c3   : > { %v14958_v12 = vpop.f32.mrf.mxu0  ;;  %v5475_v58 = vpop.f32.mrf.mxu1 }
 0x2c4   : > { %15423 = vmatmul.mubr.msk.f32.gmra.mxu1 %vm486_vm0, %v16352_v54  ;;  %v12436_v2 = vsel %vm11977_vm10, %v12029_v62, %v12435_v63  ;;  %v12030_v18 = vsel %vm11971_vm8, %v12029_v62, %v12028_v3  ;;  %v12254_v17 = vsel %vm11974_vm9, %v12029_v62, %v12253_v7  ;;  %v12618_v19 = vsel %vm11959_vm4, %v12031_v29, %v12029_v62 }
 0x2c5   : > { %15425 = vmatprep.mubr.msk.f32.mxu1 %vm486_vm0, %v16418_v38  ;;  %v5402_v30 = vpop.f32.mrf.mxu0  ;;  %v14973_v4 = vpop.f32.mrf.mxu1  ;;  %v12032_v16 = vsel %vm11974_vm9, %v12031_v29, %v12030_v18  ;;  %v12255_v40 = vsel %vm11977_vm10, %v12031_v29, %v12254_v17 }
 0x2c6   : > { %v12033_v11 = vrot.slane %v5402_v30, 1  ;;  %12523 = vrot.lane.b32.xlu0 %v12436_v2, %s15683_s17 }
 0x2c7   : > { %v14968_v54 = vpop.f32.mrf.mxu0  ;;  %v5621_v48 = vpop.f32.mrf.mxu1 }
 0x2c8   : > { %15426 = vmatmul.mubr.msk.f32.gmra.mxu1 %vm486_vm0, %v16496_v26  ;;  %v12437_v38 = vsel %vm11959_vm4, %v12033_v11, %v12031_v29  ;;  %v12619_v20 = vsel %vm11962_vm5, %v12033_v11, %v12618_v19  ;;  %v12034_v37 = vsel %vm11977_vm10, %v12033_v11, %v12032_v16  ;;  %v12256_v22 = vsel %vm11959_vm4, %v5475_v58, %v12033_v11 }
 0x2c9   : > { %15428 = vmatprep.mubr.msk.f32.mxu1 %vm486_vm0, %v16562_v9  ;;  %v5548_v28 = vpop.f32.mrf.mxu0  ;;  %v14983_v33 = vpop.f32.mrf.mxu1  ;;  %12210 = vst.msk [vmem:[#allocation2 + $0x20] sm:$0xff] %vm12205_vm11, %v12034_v37  ;;  %v12438_v26 = vsel %vm11962_vm5, %v5475_v58, %v12437_v38  ;;  %v12620_v14 = vsel %vm11965_vm6, %v5475_v58, %v12619_v20  ;;  %v12037_v42 = vrot.slane %v5621_v48, 6 }
 0x2ca   : > { %v12035_v43 = vrot.slane %v5548_v28, 7  ;;  %12341 = vrot.lane.b32.xlu0 %v12255_v40, %s15684_s0 }
 0x2cb   : > { %v14978_v5 = vpop.f32.mrf.mxu0  ;;  %v5767_v34 = vpop.f32.mrf.mxu1 }
 0x2cc   : > { %15429 = vmatmul.mubr.msk.f32.gmra.mxu1 %vm486_vm0, %v16635_v60  ;;  %v12439_v9 = vsel %vm11965_vm6, %v12035_v43, %v12438_v26  ;;  %v12036_v45 = vsel %vm11959_vm4, %v12035_v43, %v5475_v58  ;;  %v12621_v1 = vsel %vm11968_vm7, %v12035_v43, %v12620_v14  ;;  %v12257_v44 = vsel %vm11962_vm5, %v12035_v43, %v12256_v22 }
 0x2cd   : > { %15431 = vmatprep.mubr.msk.f32.mxu1 %vm486_vm0, %v16706_v53  ;;  %v5694_v46 = vpop.f32.mrf.mxu0  ;;  %v14993_v49 = vpop.f32.mrf.mxu1  ;;  %v12041_v60 = vrot.slane %v5767_v34, 4  ;;  %v12622_v10 = vsel %vm11971_vm8, %v12037_v42, %v12621_v1  ;;  %v12440_v52 = vsel %vm11968_vm7, %v12037_v42, %v12439_v9  ;;  %v12038_v53 = vsel %vm11962_vm5, %v12037_v42, %v12036_v45 }
 0x2ce   : > { %v12039_v32 = vrot.slane %v5694_v46, 5  ;;  %v12258_v41 = vsel %vm11965_vm6, %v12037_v42, %v12257_v44 }
 0x2cf   : > { %v14988_v35 = vpop.f32.mrf.mxu0  ;;  %v5913_v50 = vpop.f32.mrf.mxu1 }
 0x2d0   : > { %15432 = vmatmul.mubr.msk.f32.gmra.mxu1 %vm486_vm0, %v16751_v24  ;;  %v12623_v59 = vsel %vm11974_vm9, %v12039_v32, %v12622_v10  ;;  %v12441_v6 = vsel %vm11971_vm8, %v12039_v32, %v12440_v52  ;;  %v12040_v47 = vsel %vm11965_vm6, %v12039_v32, %v12038_v53  ;;  %v12259_v24 = vsel %vm11968_vm7, %v12039_v32, %v12258_v41 }
 0x2d1   : > { %15434 = vmatprep.mubr.msk.f32.mxu1 %vm486_vm0, %v16819_v21  ;;  %v5840_v36 = vpop.f32.mrf.mxu0  ;;  %v15003_v56 = vpop.f32.mrf.mxu1  ;;  %v12624_v61 = vsel %vm11977_vm10, %v12041_v60, %v12623_v59  ;;  %v12442_v39 = vsel %vm11974_vm9, %v12041_v60, %v12441_v6  ;;  %v12042_v21 = vsel %vm11968_vm7, %v12041_v60, %v12040_v47  ;;  %v12260_v62 = vsel %vm11971_vm8, %v12041_v60, %v12259_v24 }
 0x2d2   : > { %v12043_v23 = vrot.slane %v5840_v36, 3  ;;  %12707 = vrot.lane.b32.xlu1 %v12624_v61, %s18232_s12  ;;  %v12045_v25 = vrot.slane %v5913_v50, 2 }
 0x2d3   : > { %v14998_v31 = vpop.f32.mrf.mxu0  ;;  %v6059_v13 = vpop.f32.mrf.mxu1 }
 0x2d4   : > { %15435 = vmatmul.mubr.msk.f32.gmra.mxu1 %vm486_vm0, %v16826_v0  ;;  %v12443_v27 = vsel %vm11977_vm10, %v12043_v23, %v12442_v39  ;;  %v12044_v57 = vsel %vm11971_vm8, %v12043_v23, %v12042_v21  ;;  %v12261_v58 = vsel %vm11974_vm9, %v12043_v23, %v12260_v62  ;;  %v12625_v0 = vsel %vm11959_vm4, %v12045_v25, %v12043_v23 }
 0x2d5   : > { %v5986_v51 = vpop.f32.mrf.mxu0  ;;  %v15013_v55 = vpop.f32.mrf.mxu1  ;;  %v12046_v18 = vsel %vm11974_vm9, %v12045_v25, %v12044_v57  ;;  %v12262_v29 = vsel %vm11977_vm10, %v12045_v25, %v12261_v58 }
 0x2d6   : > { %v12047_v12 = vrot.slane %v5986_v51, 1  ;;  %12525 = vrot.lane.b32.xlu1 %v12443_v27, %s15683_s17 }
 0x2d7   : > { %v15008_v63 = vpop.f32.mrf.mxu0  ;;  %v6205_v3 = vpop.f32.mrf.mxu1 }
 0x2d8   : > { %v12444_v2 = vsel %vm11959_vm4, %v12047_v12, %v12045_v25  ;;  %v12626_v30 = vsel %vm11962_vm5, %v12047_v12, %v12625_v0  ;;  %v12048_v11 = vsel %vm11977_vm10, %v12047_v12, %v12046_v18  ;;  %v12263_v20 = vsel %vm11959_vm4, %v6059_v13, %v12047_v12 }
 0x2d9   : > { %v6132_v4 = vpop.f32.mrf.mxu0  ;;  %v15023_v7 = vpop.f32.mrf.mxu1  ;;  %12211 = vst.msk [vmem:[#allocation2 + $0x28] sm:$0xff] %vm12205_vm11, %v12048_v11  ;;  %v12445_v54 = vsel %vm11962_vm5, %v6059_v13, %v12444_v2  ;;  %v12627_v16 = vsel %vm11965_vm6, %v6059_v13, %v12626_v30  ;;  %v12051_v28 = vrot.slane %v6205_v3, 6 }
 0x2da   : > { %v12049_v17 = vrot.slane %v6132_v4, 7  ;;  %12343 = vrot.lane.b32.xlu1 %v12262_v29, %s15684_s0 }
 0x2db   : > { %v15018_v48 = vpop.f32.mrf.mxu0  ;;  %v6351_v19 = vpop.f32.mrf.mxu1 }
 0x2dc   : > { %v12446_v38 = vsel %vm11965_vm6, %v12049_v17, %v12445_v54  ;;  %v12050_v33 = vsel %vm11959_vm4, %v12049_v17, %v6059_v13  ;;  %v12628_v43 = vsel %vm11968_vm7, %v12049_v17, %v12627_v16  ;;  %v12264_v26 = vsel %vm11962_vm5, %v12049_v17, %v12263_v20 }
 0x2dd   : > { %v6278_v40 = vpop.f32.mrf.mxu0  ;;  %v15033_v37 = vpop.f32.mrf.mxu1  ;;  %v12055_v34 = vrot.slane %v6351_v19, 4  ;;  %v12629_v22 = vsel %vm11971_vm8, %v12051_v28, %v12628_v43  ;;  %v12447_v42 = vsel %vm11968_vm7, %v12051_v28, %v12446_v38  ;;  %v12052_v45 = vsel %vm11962_vm5, %v12051_v28, %v12050_v33 }
 0x2de   : > { %v12053_v5 = vrot.slane %v6278_v40, 5  ;;  %v12265_v35 = vsel %vm11965_vm6, %v12051_v28, %v12264_v26 }
 0x2df   : > { %v15028_v9 = vpop.f32.mrf.mxu0  ;;  %v6497_v14 = vpop.f32.mrf.mxu1 }
 0x2e0   : > { %v12630_v46 = vsel %vm11974_vm9, %v12053_v5, %v12629_v22  ;;  %v12448_v49 = vsel %vm11971_vm8, %v12053_v5, %v12447_v42  ;;  %v12054_v1 = vsel %vm11965_vm6, %v12053_v5, %v12052_v45  ;;  %v12266_v10 = vsel %vm11968_vm7, %v12053_v5, %v12265_v35 }
 0x2e1   : > { %v6424_v44 = vpop.f32.mrf.mxu0  ;;  %v15043_v32 = vpop.f32.mrf.mxu1  ;;  %v12631_v60 = vsel %vm11977_vm10, %v12055_v34, %v12630_v46  ;;  %v12449_v59 = vsel %vm11974_vm9, %v12055_v34, %v12448_v49  ;;  %v12056_v6 = vsel %vm11968_vm7, %v12055_v34, %v12054_v1  ;;  %v12267_v41 = vsel %vm11971_vm8, %v12055_v34, %v12266_v10 }
 0x2e2   : > { %v12057_v50 = vrot.slane %v6424_v44, 3  ;;  %12709 = vrot.lane.b32.xlu0 %v12631_v60, %s18232_s12  ;;  %v12059_v23 = vrot.slane %v6497_v14, 2 }
 0x2e3   : > { %v15038_v52 = vpop.f32.mrf.mxu0  ;;  %v6643_v53 = vpop.f32.mrf.mxu1 }
 0x2e4   : > { %v12450_v47 = vsel %vm11977_vm10, %v12057_v50, %v12449_v59  ;;  %v12058_v36 = vsel %vm11971_vm8, %v12057_v50, %v12056_v6  ;;  %v12268_v31 = vsel %vm11974_vm9, %v12057_v50, %v12267_v41  ;;  %v12632_v21 = vsel %vm11959_vm4, %v12059_v23, %v12057_v50 }
 0x2e5   : > { %v6570_v56 = vpop.f32.mrf.mxu0  ;;  %v15053_v61 = vpop.f32.mrf.mxu1  ;;  %v12060_v57 = vsel %vm11974_vm9, %v12059_v23, %v12058_v36  ;;  %v12269_v25 = vsel %vm11977_vm10, %v12059_v23, %v12268_v31 }
 0x2e6   : > { %v12061_v24 = vrot.slane %v6570_v56, 1  ;;  %12527 = vrot.lane.b32.xlu0 %v12450_v47, %s15683_s17 }
 0x2e7   : > { %v15048_v13 = vpop.f32.mrf.mxu0  ;;  %v6789_v39 = vpop.f32.mrf.mxu1 }
 0x2e8   : > { %v12451_v27 = vsel %vm11959_vm4, %v12061_v24, %v12059_v23  ;;  %v12633_v51 = vsel %vm11962_vm5, %v12061_v24, %v12632_v21  ;;  %v12062_v12 = vsel %vm11977_vm10, %v12061_v24, %v12060_v57  ;;  %v12270_v30 = vsel %vm11959_vm4, %v6643_v53, %v12061_v24 }
 0x2e9   : > { %v6716_v55 = vpop.f32.mrf.mxu0  ;;  %v15063_v62 = vpop.f32.mrf.mxu1  ;;  %12212 = vst.msk [vmem:[#allocation2 + $0x30] sm:$0xff] %vm12205_vm11, %v12062_v12  ;;  %v12452_v63 = vsel %vm11962_vm5, %v6643_v53, %v12451_v27  ;;  %v12634_v18 = vsel %vm11965_vm6, %v6643_v53, %v12633_v51  ;;  %v12065_v4 = vrot.slane %v6789_v39, 6 }
 0x2ea   : > { %v12063_v58 = vrot.slane %v6716_v55, 7  ;;  %12345 = vrot.lane.b32.xlu0 %v12269_v25, %s15684_s0 }
 0x2eb   : > { %v15058_v3 = vpop.f32.mrf.mxu0  ;;  %v6935_v0 = vpop.f32.mrf.mxu1 }
 0x2ec   : > { %v12453_v2 = vsel %vm11965_vm6, %v12063_v58, %v12452_v63  ;;  %v12064_v7 = vsel %vm11959_vm4, %v12063_v58, %v6643_v53  ;;  %v12635_v17 = vsel %vm11968_vm7, %v12063_v58, %v12634_v18  ;;  %v12271_v54 = vsel %vm11962_vm5, %v12063_v58, %v12270_v30 }
 0x2ed   : > { %v6862_v29 = vpop.f32.mrf.mxu0  ;;  %v15073_v11 = vpop.f32.mrf.mxu1  ;;  %v12069_v19 = vrot.slane %v6935_v0, 4  ;;  %v12636_v20 = vsel %vm11971_vm8, %v12065_v4, %v12635_v17  ;;  %v12454_v28 = vsel %vm11968_vm7, %v12065_v4, %v12453_v2  ;;  %v12066_v33 = vsel %vm11962_vm5, %v12065_v4, %v12064_v7 }
 0x2ee   : > { %v12067_v48 = vrot.slane %v6862_v29, 5  ;;  %v12272_v9 = vsel %vm11965_vm6, %v12065_v4, %v12271_v54 }
 0x2ef   : > { %v15068_v38 = vpop.f32.mrf.mxu0  ;;  %v7081_v16 = vpop.f32.mrf.mxu1 }
 0x2f0   : > { %v12637_v40 = vsel %vm11974_vm9, %v12067_v48, %v12636_v20  ;;  %v12455_v37 = vsel %vm11971_vm8, %v12067_v48, %v12454_v28  ;;  %v12068_v43 = vsel %vm11965_vm6, %v12067_v48, %v12066_v33  ;;  %v12273_v22 = vsel %vm11968_vm7, %v12067_v48, %v12272_v9 }
 0x2f1   : > { %v7008_v26 = vpop.f32.mrf.mxu0  ;;  %v15083_v5 = vpop.f32.mrf.mxu1  ;;  %v12638_v34 = vsel %vm11977_vm10, %v12069_v19, %v12637_v40  ;;  %v12456_v46 = vsel %vm11974_vm9, %v12069_v19, %v12455_v37  ;;  %v12070_v49 = vsel %vm11968_vm7, %v12069_v19, %v12068_v43  ;;  %v12274_v50 = vsel %vm11971_vm8, %v12069_v19, %v12273_v22 }
 0x2f2   : > { %v12071_v14 = vrot.slane %v7008_v26, 3  ;;  %12711 = vrot.lane.b32.xlu1 %v12638_v34, %s18232_s12  ;;  %v12073_v10 = vrot.slane %v7081_v16, 2 }
 0x2f3   : > { %v15078_v42 = vpop.f32.mrf.mxu0  ;;  %v7227_v45 = vpop.f32.mrf.mxu1 }
 0x2f4   : > { %v12698_v1 = vpop.permute.xlu0 %12697  ;;  %v12457_v44 = vsel %vm11977_vm10, %v12071_v14, %v12456_v46  ;;  %v12072_v32 = vsel %vm11971_vm8, %v12071_v14, %v12070_v49  ;;  %v12275_v53 = vsel %vm11974_vm9, %v12071_v14, %v12274_v50  ;;  %v12639_v6 = vsel %vm11959_vm4, %v12073_v10, %v12071_v14 }
 0x2f5   : > { %v7154_v60 = vpop.f32.mrf.mxu0  ;;  %v15093_v35 = vpop.f32.mrf.mxu1  ;;  %v12074_v36 = vsel %vm11974_vm9, %v12073_v10, %v12072_v32  ;;  %v12276_v24 = vsel %vm11977_vm10, %v12073_v10, %v12275_v53 }
 0x2f6   : > { %v12075_v52 = vrot.slane %v7154_v60, 1  ;;  %12529 = vrot.lane.b32.xlu1 %v12457_v44, %s15683_s17 }
 0x2f7   : > { %v7373_v59 = vpop.f32.mrf.mxu1  ;;  %v15088_v47 = vpop.f32.mrf.mxu0 }
 0x2f8   : > { %v12458_v56 = vsel %vm11959_vm4, %v12075_v52, %v12073_v10  ;;  %v12640_v61 = vsel %vm11962_vm5, %v12075_v52, %v12639_v6  ;;  %v12076_v31 = vsel %vm11977_vm10, %v12075_v52, %v12074_v36  ;;  %v12516_v13 = vpop.permute.xlu1 %12515  ;;  %v12277_v63 = vsel %vm11959_vm4, %v7227_v45, %v12075_v52 }
 0x2f9   : > { %v12334_v41 = vpop.permute.xlu0 %12333  ;;  %v15103_v23 = vpop.f32.mrf.mxu1  ;;  %12213 = vst.msk [vmem:[#allocation2 + $0x38] sm:$0xff] %vm12205_vm11, %v12076_v31  ;;  %v12459_v57 = vsel %vm11962_vm5, %v7227_v45, %v12458_v56  ;;  %v12641_v55 = vsel %vm11965_vm6, %v7227_v45, %v12640_v61  ;;  %v12079_v3 = vrot.slane %v7373_v59, 6 }
 0x2fa   : > { %12385 = vst.msk [vmem:[#allocation2 - $0x1] sm:$0xfe] %vm12384_vm12, %v12334_v41  ;;  %v7300_v39 = vpop.f32.mrf.mxu0  ;;  %12347 = vrot.lane.b32.xlu1 %v12276_v24, %s15684_s0  ;;  %vm13854_vm12 = vcmask 7168  }
 0x2fb   : > { %12567 = vst.msk [vmem:[#allocation2 - $0x2] sm:$0xfc] %vm12566_vm13, %v12516_v13  ;;  %v12077_v21 = vrot.slane %v7300_v39, 7  ;;  %v7519_v27 = vpop.f32.mrf.mxu1 }
 0x2fc   : > { %12749 = vst.msk [vmem:[#allocation2 - $0x3] sm:$0xf8] %vm12748_vm14, %v12698_v1  ;;  %v15098_v51 = vpop.f32.mrf.mxu0  ;;  %v12083_v4 = vrot.slane %v7519_v27, 4 }
 0x2fd   : > { %v12078_v62 = vsel %vm11959_vm4, %v12077_v21, %v7227_v45  ;;  %v12460_v25 = vsel %vm11965_vm6, %v12077_v21, %v12459_v57  ;;  %v15113_v12 = vpop.f32.mrf.mxu1  ;;  %v12642_v58 = vsel %vm11968_vm7, %v12077_v21, %v12641_v55  ;;  %v12278_v2 = vsel %vm11962_vm5, %v12077_v21, %v12277_v63 }
 0x2fe   : > { %v7446_v0 = vpop.f32.mrf.mxu0  ;;  %v12080_v7 = vsel %vm11962_vm5, %v12079_v3, %v12078_v62  ;;  %v12643_v11 = vsel %vm11971_vm8, %v12079_v3, %v12642_v58  ;;  %v12461_v17 = vsel %vm11968_vm7, %v12079_v3, %v12460_v25  ;;  %v12279_v28 = vsel %vm11965_vm6, %v12079_v3, %v12278_v2 }
 0x2ff   : > { %v12081_v18 = vrot.slane %v7446_v0, 5  ;;  %v7665_v30 = vpop.f32.mrf.mxu1 }
 0x300   : > { %v15108_v29 = vpop.f32.mrf.mxu0  ;;  %v12087_v22 = vrot.slane %v7665_v30, 2 }
 0x301   : > { %v12082_v54 = vsel %vm11965_vm6, %v12081_v18, %v12080_v7  ;;  %v15123_v48 = vpop.f32.mrf.mxu1  ;;  %v12644_v19 = vsel %vm11974_vm9, %v12081_v18, %v12643_v11  ;;  %v12462_v38 = vsel %vm11971_vm8, %v12081_v18, %v12461_v17  ;;  %v12280_v37 = vsel %vm11968_vm7, %v12081_v18, %v12279_v28 }
 0x302   : > { %v7592_v16 = vpop.f32.mrf.mxu0  ;;  %v12645_v20 = vsel %vm11977_vm10, %v12083_v4, %v12644_v19  ;;  %v12084_v43 = vsel %vm11968_vm7, %v12083_v4, %v12082_v54  ;;  %v12463_v5 = vsel %vm11974_vm9, %v12083_v4, %v12462_v38  ;;  %v12281_v45 = vsel %vm11971_vm8, %v12083_v4, %v12280_v37 }
 0x303   : > { %v12085_v33 = vrot.slane %v7592_v16, 3  ;;  %12713 = vrot.lane.b32.xlu0 %v12645_v20, %s18232_s12  ;;  %v7811_v40 = vpop.f32.mrf.mxu1 }
 0x304   : > { %v15118_v26 = vpop.f32.mrf.mxu0 }
 0x305   : > { %v12086_v34 = vsel %vm11971_vm8, %v12085_v33, %v12084_v43  ;;  %v15133_v9 = vpop.f32.mrf.mxu1  ;;  %v12464_v14 = vsel %vm11977_vm10, %v12085_v33, %v12463_v5  ;;  %v12282_v1 = vsel %vm11974_vm9, %v12085_v33, %v12281_v45  ;;  %v12646_v44 = vsel %vm11959_vm4, %v12087_v22, %v12085_v33  ;;  %v12700_v51 = vpop.permute.xlu1 %12699 }
 0x306   : > { %v7738_v42 = vpop.f32.mrf.mxu0  ;;  %v12088_v60 = vsel %vm11974_vm9, %v12087_v22, %v12086_v34  ;;  %v12283_v6 = vsel %vm11977_vm10, %v12087_v22, %v12282_v1 }
 0x307   : > { %v12089_v46 = vrot.slane %v7738_v42, 1  ;;  %12531 = vrot.lane.b32.xlu0 %v12464_v14, %s15683_s17  ;;  %v7957_v49 = vpop.f32.mrf.mxu1 }
 0x308   : > { %v15128_v32 = vpop.f32.mrf.mxu0  ;;  %v12093_v27 = vrot.slane %v7957_v49, 6 }
 0x309   : > { %v12465_v35 = vsel %vm11959_vm4, %v12089_v46, %v12087_v22  ;;  %v12647_v50 = vsel %vm11962_vm5, %v12089_v46, %v12646_v44  ;;  %v12518_v10 = vpop.permute.xlu0 %12517  ;;  %v15143_v52 = vpop.f32.mrf.mxu1  ;;  %v12090_v53 = vsel %vm11977_vm10, %v12089_v46, %v12088_v60  ;;  %v12284_v21 = vsel %vm11959_vm4, %v7811_v40, %v12089_v46 }
 0x30a   : > { %v7884_v59 = vpop.f32.mrf.mxu0  ;;  %12214 = vst.msk [vmem:[#allocation2 + $0x40] sm:$0xff] %vm12205_vm11, %v12090_v53  ;;  %v12466_v56 = vsel %vm11962_vm5, %v7811_v40, %v12465_v35  ;;  %v12648_v41 = vsel %vm11965_vm6, %v7811_v40, %v12647_v50 }
 0x30b   : > { %v12091_v47 = vrot.slane %v7884_v59, 7  ;;  %12349 = vrot.lane.b32.xlu0 %v12283_v6, %s15684_s0  ;;  %v8103_v36 = vpop.f32.mrf.mxu1 }
 0x30c   : > { %v15138_v61 = vpop.f32.mrf.mxu0  ;;  %v12097_v12 = vrot.slane %v8103_v36, 4 }
 0x30d   : > { %v12092_v23 = vsel %vm11959_vm4, %v12091_v47, %v7811_v40  ;;  %v12467_v24 = vsel %vm11965_vm6, %v12091_v47, %v12466_v56  ;;  %v12336_v31 = vpop.permute.xlu0 %12335  ;;  %v15153_v13 = vpop.f32.mrf.mxu1  ;;  %v12649_v39 = vsel %vm11968_vm7, %v12091_v47, %v12648_v41  ;;  %v12285_v55 = vsel %vm11962_vm5, %v12091_v47, %v12284_v21 }
 0x30e   : > { %12387 = vst.msk [vmem:[#allocation2 + $0x7] sm:$0xff] %vm12386_vm15, %v12336_v31  ;;  %v8030_v57 = vpop.f32.mrf.mxu0  ;;  %v12094_v58 = vsel %vm11962_vm5, %v12093_v27, %v12092_v23  ;;  %v12650_v3 = vsel %vm11971_vm8, %v12093_v27, %v12649_v39  ;;  %v12468_v0 = vsel %vm11968_vm7, %v12093_v27, %v12467_v24  ;;  %v12286_v11 = vsel %vm11965_vm6, %v12093_v27, %v12285_v55 }
 0x30f   : > { %12569 = vst.msk [vmem:[#allocation2 + $0x6] sm:$0xff] %vm12568_vm2, %v12518_v10  ;;  %v12095_v62 = vrot.slane %v8030_v57, 5  ;;  %v8249_v25 = vpop.f32.mrf.mxu1 }
 0x310   : > { %12751 = vst.msk [vmem:[#allocation2 + $0x5] sm:$0xff] %vm12750_vm3, %v12700_v51  ;;  %v15148_v63 = vpop.f32.mrf.mxu0  ;;  %v12101_v40 = vrot.slane %v8249_v25, 2 }
 0x311   : > { %v12096_v2 = vsel %vm11965_vm6, %v12095_v62, %v12094_v58  ;;  %v15163_v18 = vpop.f32.mrf.mxu1  ;;  %v12651_v30 = vsel %vm11974_vm9, %v12095_v62, %v12650_v3  ;;  %v12469_v4 = vsel %vm11971_vm8, %v12095_v62, %v12468_v0  ;;  %v12287_v48 = vsel %vm11968_vm7, %v12095_v62, %v12286_v11 }
 0x312   : > { %v8176_v7 = vpop.f32.mrf.mxu0  ;;  %v12652_v29 = vsel %vm11977_vm10, %v12097_v12, %v12651_v30  ;;  %v12098_v19 = vsel %vm11968_vm7, %v12097_v12, %v12096_v2  ;;  %v12470_v16 = vsel %vm11974_vm9, %v12097_v12, %v12469_v4  ;;  %v12288_v43 = vsel %vm11971_vm8, %v12097_v12, %v12287_v48 }
 0x313   : > { %v12099_v17 = vrot.slane %v8176_v7, 3  ;;  %12715 = vrot.lane.b32.xlu1 %v12652_v29, %s18232_s12  ;;  %v8395_v54 = vpop.f32.mrf.mxu1 }
 0x314   : > { %v15158_v38 = vpop.f32.mrf.mxu0 }
 0x315   : > { %v12100_v20 = vsel %vm11971_vm8, %v12099_v17, %v12098_v19  ;;  %v15173_v28 = vpop.f32.mrf.mxu1  ;;  %v12471_v33 = vsel %vm11977_vm10, %v12099_v17, %v12470_v16  ;;  %v12289_v9 = vsel %vm11974_vm9, %v12099_v17, %v12288_v43  ;;  %v12653_v14 = vsel %vm11959_vm4, %v12101_v40, %v12099_v17 }
 0x316   : > { %v8322_v37 = vpop.f32.mrf.mxu0  ;;  %v12102_v42 = vsel %vm11974_vm9, %v12101_v40, %v12100_v20  ;;  %v12290_v60 = vsel %vm11977_vm10, %v12101_v40, %v12289_v9 }
 0x317   : > { %v12103_v26 = vrot.slane %v8322_v37, 1  ;;  %v12954_v5 = vld [vmem:[#allocation2] sm:$0xff]  ;;  %12533 = vrot.lane.b32.xlu1 %v12471_v33, %s15683_s17  ;;  %v8541_v34 = vpop.f32.mrf.mxu1  ;;  %v12702_v55 = vpop.permute.xlu0 %12701 }
 0x318   : > { %15441 = vmatprep.mubr.msk.f32.mxu0 %vm486_vm0, %v12954_v5  ;;  %v15168_v22 = vpop.f32.mrf.mxu0  ;;  %v12107_v61 = vrot.slane %v8541_v34, 6 }
 0x319   : > { %v12472_v45 = vsel %vm11959_vm4, %v12103_v26, %v12101_v40  ;;  %v12654_v46 = vsel %vm11962_vm5, %v12103_v26, %v12653_v14  ;;  %v15183_v49 = vpop.f32.mrf.mxu1  ;;  %v12104_v1 = vsel %vm11977_vm10, %v12103_v26, %v12102_v42  ;;  %v12291_v56 = vsel %vm11959_vm4, %v8395_v54, %v12103_v26 }
 0x31a   : > { %v12520_v44 = vpop.permute.xlu1 %12519  ;;  %v8468_v32 = vpop.f32.mrf.mxu0  ;;  %12215 = vst.msk [vmem:[#allocation2 + $0x48] sm:$0xff] %vm12205_vm11, %v12104_v1  ;;  %v12473_v10 = vsel %vm11962_vm5, %v8395_v54, %v12472_v45  ;;  %v12655_v53 = vsel %vm11965_vm6, %v8395_v54, %v12654_v46 }
 0x31b   : > { %v12105_v35 = vrot.slane %v8468_v32, 7  ;;  %12351 = vrot.lane.b32.xlu1 %v12290_v60, %s15684_s0  ;;  %v8687_v50 = vpop.f32.mrf.mxu1 }
 0x31c   : > { %v15178_v52 = vpop.f32.mrf.mxu0  ;;  %v12111_v39 = vrot.slane %v8687_v50, 4 }
 0x31d   : > { %v12106_v59 = vsel %vm11959_vm4, %v12105_v35, %v8395_v54  ;;  %v12474_v6 = vsel %vm11965_vm6, %v12105_v35, %v12473_v10  ;;  %v15193_v47 = vpop.f32.mrf.mxu1  ;;  %v12656_v36 = vsel %vm11968_vm7, %v12105_v35, %v12655_v53  ;;  %v12292_v23 = vsel %vm11962_vm5, %v12105_v35, %v12291_v56 }
 0x31e   : > { %v8614_v41 = vpop.f32.mrf.mxu0  ;;  %v12108_v21 = vsel %vm11962_vm5, %v12107_v61, %v12106_v59  ;;  %v12657_v57 = vsel %vm11971_vm8, %v12107_v61, %v12656_v36  ;;  %v12475_v51 = vsel %vm11968_vm7, %v12107_v61, %v12474_v6  ;;  %v12293_v0 = vsel %vm11965_vm6, %v12107_v61, %v12292_v23 }
 0x31f   : > { %v12338_v24 = vpop.permute.xlu1 %12337  ;;  %v12109_v31 = vrot.slane %v8614_v41, 5  ;;  %v8833_v13 = vpop.f32.mrf.mxu1 }
 0x320   : > { %12388 = vst.msk [vmem:[#allocation2 + $0xf] sm:$0xff] %vm12386_vm15, %v12338_v24  ;;  %v15188_v27 = vpop.f32.mrf.mxu0  ;;  %v12115_v48 = vrot.slane %v8833_v13, 2 }
 0x321   : > { %12570 = vst.msk [vmem:[#allocation2 + $0xe] sm:$0xff] %vm12568_vm2, %v12520_v44  ;;  %v12110_v62 = vsel %vm11965_vm6, %v12109_v31, %v12108_v21  ;;  %v15203_v25 = vpop.f32.mrf.mxu1  ;;  %v12658_v12 = vsel %vm11974_vm9, %v12109_v31, %v12657_v57  ;;  %v12476_v58 = vsel %vm11971_vm8, %v12109_v31, %v12475_v51  ;;  %v12294_v30 = vsel %vm11968_vm7, %v12109_v31, %v12293_v0 }
 0x322   : > { %12752 = vst.msk [vmem:[#allocation2 + $0xd] sm:$0xff] %vm12750_vm3, %v12702_v55  ;;  %v8760_v63 = vpop.f32.mrf.mxu0  ;;  %v12659_v3 = vsel %vm11977_vm10, %v12111_v39, %v12658_v12  ;;  %v12112_v4 = vsel %vm11968_vm7, %v12111_v39, %v12110_v62  ;;  %v12477_v29 = vsel %vm11974_vm9, %v12111_v39, %v12476_v58  ;;  %v12295_v38 = vsel %vm11971_vm8, %v12111_v39, %v12294_v30 }
 0x323   : > { %v12113_v2 = vrot.slane %v8760_v63, 3  ;;  %12717 = vrot.lane.b32.xlu0 %v12659_v3, %s18232_s12  ;;  %v8979_v18 = vpop.f32.mrf.mxu1 }
 0x324   : > { %v15198_v7 = vpop.f32.mrf.mxu0 }
 0x325   : > { %v12114_v11 = vsel %vm11971_vm8, %v12113_v2, %v12112_v4  ;;  %v15213_v17 = vpop.f32.mrf.mxu1  ;;  %v12478_v54 = vsel %vm11977_vm10, %v12113_v2, %v12477_v29  ;;  %v12296_v28 = vsel %vm11974_vm9, %v12113_v2, %v12295_v38  ;;  %v12660_v33 = vsel %vm11959_vm4, %v12115_v48, %v12113_v2 }
 0x326   : > { %v8906_v19 = vpop.f32.mrf.mxu0  ;;  %v12116_v37 = vsel %vm11974_vm9, %v12115_v48, %v12114_v11  ;;  %v12297_v42 = vsel %vm11977_vm10, %v12115_v48, %v12296_v28 }
 0x327   : > { %v12117_v16 = vrot.slane %v8906_v19, 1  ;;  %12535 = vrot.lane.b32.xlu0 %v12478_v54, %s15683_s17  ;;  %v9125_v20 = vpop.f32.mrf.mxu1 }
 0x328   : > { %v15208_v40 = vpop.f32.mrf.mxu0  ;;  %v12121_v53 = vrot.slane %v9125_v20, 6 }
 0x329   : > { %v12704_v43 = vpop.permute.xlu1 %12703  ;;  %v12479_v26 = vsel %vm11959_vm4, %v12117_v16, %v12115_v48  ;;  %v12661_v5 = vsel %vm11962_vm5, %v12117_v16, %v12660_v33  ;;  %v12955_v34 = vld [vmem:[#allocation2 + $0x8] sm:$0xff]  ;;  %v15223_v9 = vpop.f32.mrf.mxu1  ;;  %v12118_v14 = vsel %vm11977_vm10, %v12117_v16, %v12116_v37  ;;  %v12298_v52 = vsel %vm11959_vm4, %v8979_v18, %v12117_v16 }
 0x32a   : > { %15442 = vmatmul.mubr.msk.f32.vlgmr.msra.gmra.mxu0 %vm486_vm0, %v12955_v34  ;;  %v9052_v22 = vpop.f32.mrf.mxu0  ;;  %12216 = vst.msk [vmem:[#allocation2 + $0x50] sm:$0xff] %vm12205_vm11, %v12118_v14  ;;  %v12480_v49 = vsel %vm11962_vm5, %v8979_v18, %v12479_v26  ;;  %v12662_v44 = vsel %vm11965_vm6, %v8979_v18, %v12661_v5 }
 0x32b   : > { %v12119_v45 = vrot.slane %v9052_v22, 7  ;;  %12353 = vrot.lane.b32.xlu0 %v12297_v42, %s15684_s0  ;;  %v9271_v46 = vpop.f32.mrf.mxu1 }
 0x32c   : > { %v15218_v1 = vpop.f32.mrf.mxu0  ;;  %v12125_v56 = vrot.slane %v9271_v46, 4 }
 0x32d   : > { %v12522_v32 = vpop.permute.xlu1 %12521  ;;  %v12120_v60 = vsel %vm11959_vm4, %v12119_v45, %v8979_v18  ;;  %v12481_v35 = vsel %vm11965_vm6, %v12119_v45, %v12480_v49  ;;  %v15233_v50 = vpop.f32.mrf.mxu1  ;;  %v12663_v10 = vsel %vm11968_vm7, %v12119_v45, %v12662_v44  ;;  %v12299_v6 = vsel %vm11962_vm5, %v12119_v45, %v12298_v52 }
 0x32e   : > { %v9198_v59 = vpop.f32.mrf.mxu0  ;;  %v12122_v61 = vsel %vm11962_vm5, %v12121_v53, %v12120_v60  ;;  %v12664_v23 = vsel %vm11971_vm8, %v12121_v53, %v12663_v10  ;;  %v12482_v24 = vsel %vm11968_vm7, %v12121_v53, %v12481_v35  ;;  %v12300_v55 = vsel %vm11965_vm6, %v12121_v53, %v12299_v6 }
 0x32f   : > { %v12123_v47 = vrot.slane %v9198_v59, 5  ;;  %v9417_v36 = vpop.f32.mrf.mxu1 }
 0x330   : > { %v15228_v41 = vpop.f32.mrf.mxu0  ;;  %v12129_v4 = vrot.slane %v9417_v36, 2 }
 0x331   : > { %v12340_v31 = vpop.permute.xlu1 %12339  ;;  %v12124_v13 = vsel %vm11965_vm6, %v12123_v47, %v12122_v61  ;;  %v15243_v39 = vpop.f32.mrf.mxu1  ;;  %v12665_v21 = vsel %vm11974_vm9, %v12123_v47, %v12664_v23  ;;  %v12483_v27 = vsel %vm11971_vm8, %v12123_v47, %v12482_v24  ;;  %v12301_v12 = vsel %vm11968_vm7, %v12123_v47, %v12300_v55 }
 0x332   : > { %12389 = vst.msk [vmem:[#allocation2 + $0x17] sm:$0xff] %vm12386_vm15, %v12340_v31  ;;  %v9344_v57 = vpop.f32.mrf.mxu0  ;;  %v12666_v51 = vsel %vm11977_vm10, %v12125_v56, %v12665_v21  ;;  %v12126_v58 = vsel %vm11968_vm7, %v12125_v56, %v12124_v13  ;;  %v12484_v0 = vsel %vm11974_vm9, %v12125_v56, %v12483_v27  ;;  %v12302_v29 = vsel %vm11971_vm8, %v12125_v56, %v12301_v12 }
 0x333   : > { %12571 = vst.msk [vmem:[#allocation2 + $0x16] sm:$0xff] %vm12568_vm2, %v12522_v32  ;;  %v12127_v62 = vrot.slane %v9344_v57, 3  ;;  %12719 = vrot.lane.b32.xlu1 %v12666_v51, %s18232_s12  ;;  %v9563_v25 = vpop.f32.mrf.mxu1 }
 0x334   : > { %12753 = vst.msk [vmem:[#allocation2 + $0x15] sm:$0xff] %vm12750_vm3, %v12704_v43  ;;  %v15238_v63 = vpop.f32.mrf.mxu0  ;;  %v12706_v3 = vpop.permute.xlu0 %12705 }
 0x335   : > { %v12128_v2 = vsel %vm11971_vm8, %v12127_v62, %v12126_v58  ;;  %v15253_v18 = vpop.f32.mrf.mxu1  ;;  %v12485_v30 = vsel %vm11977_vm10, %v12127_v62, %v12484_v0  ;;  %v12303_v54 = vsel %vm11974_vm9, %v12127_v62, %v12302_v29  ;;  %v12667_v48 = vsel %vm11959_vm4, %v12129_v4, %v12127_v62 }
 0x336   : > { %v9490_v7 = vpop.f32.mrf.mxu0  ;;  %v12130_v16 = vsel %vm11974_vm9, %v12129_v4, %v12128_v2  ;;  %v12304_v43 = vsel %vm11977_vm10, %v12129_v4, %v12303_v54 }
 0x337   : > { %v12131_v11 = vrot.slane %v9490_v7, 1  ;;  %12537 = vrot.lane.b32.xlu1 %v12485_v30, %s15683_s17  ;;  %v9709_v17 = vpop.f32.mrf.mxu1 }
 0x338   : > { %v15248_v19 = vpop.f32.mrf.mxu0  ;;  %v12524_v38 = vpop.permute.xlu0 %12523  ;;  %v12135_v32 = vrot.slane %v9709_v17, 6 }
 0x339   : > { %v12486_v20 = vsel %vm11959_vm4, %v12131_v11, %v12129_v4  ;;  %v12668_v28 = vsel %vm11962_vm5, %v12131_v11, %v12667_v48  ;;  %v15263_v33 = vpop.f32.mrf.mxu1  ;;  %v12132_v40 = vsel %vm11977_vm10, %v12131_v11, %v12130_v16  ;;  %v12305_v44 = vsel %vm11959_vm4, %v9563_v25, %v12131_v11 }
 0x33a   : > { %v9636_v37 = vpop.f32.mrf.mxu0  ;;  %12217 = vst.msk [vmem:[#allocation2 + $0x58] sm:$0xff] %vm12205_vm11, %v12132_v40  ;;  %v12487_v9 = vsel %vm11962_vm5, %v9563_v25, %v12486_v20  ;;  %v12669_v42 = vsel %vm11965_vm6, %v9563_v25, %v12668_v28 }
 0x33b   : > { %v12956_v26 = vld [vmem:[#allocation2 + $0x10] sm:$0xff]  ;;  %v12133_v5 = vrot.slane %v9636_v37, 7  ;;  %12355 = vrot.lane.b32.xlu1 %v12304_v43, %s15684_s0  ;;  %v9855_v34 = vpop.f32.mrf.mxu1 }
 0x33c   : > { %15444 = vmatprep.mubr.msk.f32.mxu0 %vm486_vm0, %v12956_v26  ;;  %v15258_v14 = vpop.f32.mrf.mxu0  ;;  %v12342_v22 = vpop.permute.xlu0 %12341  ;;  %v12139_v52 = vrot.slane %v9855_v34, 4 }
 0x33d   : > { %v12134_v45 = vsel %vm11959_vm4, %v12133_v5, %v9563_v25  ;;  %v12488_v46 = vsel %vm11965_vm6, %v12133_v5, %v12487_v9  ;;  %12390 = vst.msk [vmem:[#allocation2 + $0x1f] sm:$0xff] %vm12386_vm15, %v12342_v22  ;;  %v15273_v49 = vpop.f32.mrf.mxu1  ;;  %v12670_v1 = vsel %vm11968_vm7, %v12133_v5, %v12669_v42  ;;  %v12306_v35 = vsel %vm11962_vm5, %v12133_v5, %v12305_v44 }
 0x33e   : > { %12572 = vst.msk [vmem:[#allocation2 + $0x1e] sm:$0xff] %vm12568_vm2, %v12524_v38  ;;  %v9782_v60 = vpop.f32.mrf.mxu0  ;;  %v12136_v53 = vsel %vm11962_vm5, %v12135_v32, %v12134_v45  ;;  %v12671_v6 = vsel %vm11971_vm8, %v12135_v32, %v12670_v1  ;;  %v12489_v47 = vsel %vm11968_vm7, %v12135_v32, %v12488_v46  ;;  %v12307_v31 = vsel %vm11965_vm6, %v12135_v32, %v12306_v35 }
 0x33f   : > { %12754 = vst.msk [vmem:[#allocation2 + $0x1d] sm:$0xff] %vm12750_vm3, %v12706_v3  ;;  %v12137_v50 = vrot.slane %v9782_v60, 5  ;;  %v10001_v10 = vpop.f32.mrf.mxu1 }
 0x340   : > { %v15268_v59 = vpop.f32.mrf.mxu0  ;;  %v12143_v58 = vrot.slane %v10001_v10, 2 }
 0x341   : > { %v12138_v36 = vsel %vm11965_vm6, %v12137_v50, %v12136_v53  ;;  %v15283_v56 = vpop.f32.mrf.mxu1  ;;  %v12672_v61 = vsel %vm11974_vm9, %v12137_v50, %v12671_v6  ;;  %v12490_v41 = vsel %vm11971_vm8, %v12137_v50, %v12489_v47  ;;  %v12308_v21 = vsel %vm11968_vm7, %v12137_v50, %v12307_v31 }
 0x342   : > { %v9928_v23 = vpop.f32.mrf.mxu0  ;;  %v12673_v24 = vsel %vm11977_vm10, %v12139_v52, %v12672_v61  ;;  %v12140_v27 = vsel %vm11968_vm7, %v12139_v52, %v12138_v36  ;;  %v12491_v55 = vsel %vm11974_vm9, %v12139_v52, %v12490_v41  ;;  %v12309_v0 = vsel %vm11971_vm8, %v12139_v52, %v12308_v21 }
 0x343   : > { %v12141_v13 = vrot.slane %v9928_v23, 3  ;;  %12721 = vrot.lane.b32.xlu0 %v12673_v24, %s18232_s12  ;;  %v10147_v39 = vpop.f32.mrf.mxu1 }
 0x344   : > { %v15278_v57 = vpop.f32.mrf.mxu0  ;;  %v12708_v51 = vpop.permute.xlu1 %12707 }
 0x345   : > { %v12142_v62 = vsel %vm11971_vm8, %v12141_v13, %v12140_v27  ;;  %v15293_v25 = vpop.f32.mrf.mxu1  ;;  %v12492_v12 = vsel %vm11977_vm10, %v12141_v13, %v12491_v55  ;;  %v12310_v30 = vsel %vm11974_vm9, %v12141_v13, %v12309_v0  ;;  %v12674_v11 = vsel %vm11959_vm4, %v12143_v58, %v12141_v13 }
 0x346   : > { %v10074_v63 = vpop.f32.mrf.mxu0  ;;  %v12957_v3 = vld [vmem:[#allocation2 + $0x18] sm:$0xff]  ;;  %v12144_v29 = vsel %vm11974_vm9, %v12143_v58, %v12142_v62  ;;  %v12311_v16 = vsel %vm11977_vm10, %v12143_v58, %v12310_v30 }
 0x347   : > { %v12145_v2 = vrot.slane %v10074_v63, 1  ;;  %12539 = vrot.lane.b32.xlu0 %v12492_v12, %s15683_s17  ;;  %v10293_v18 = vpop.f32.mrf.mxu1  ;;  %15445 = vmatmul.mubr.msk.f32.gmra.mxu0 %vm486_vm0, %v12957_v3 }
 0x348   : > { %v15288_v4 = vpop.f32.mrf.mxu0  ;;  %v12526_v7 = vpop.permute.xlu1 %12525  ;;  %v12149_v9 = vrot.slane %v10293_v18, 6 }
 0x349   : > { %v12493_v17 = vsel %vm11959_vm4, %v12145_v2, %v12143_v58  ;;  %v15303_v54 = vpop.f32.mrf.mxu1  ;;  %v12146_v48 = vsel %vm11977_vm10, %v12145_v2, %v12144_v29  ;;  %v12675_v19 = vsel %vm11962_vm5, %v12145_v2, %v12674_v11  ;;  %v12312_v34 = vsel %vm11959_vm4, %v10147_v39, %v12145_v2 }
 0x34a   : > { %v10220_v38 = vpop.f32.mrf.mxu0  ;;  %12218 = vst.msk [vmem:[#allocation2 + $0x60] sm:$0xff] %vm12205_vm11, %v12146_v48  ;;  %v12494_v28 = vsel %vm11962_vm5, %v10147_v39, %v12493_v17  ;;  %v12676_v5 = vsel %vm11965_vm6, %v10147_v39, %v12675_v19 }
 0x34b   : > { %v12147_v20 = vrot.slane %v10220_v38, 7  ;;  %12357 = vrot.lane.b32.xlu0 %v12311_v16, %s15684_s0 }
 0x34c   : > { %v15298_v33 = vpop.f32.mrf.mxu0  ;;  %v10439_v40 = vpop.f32.mrf.mxu1 }
 0x34d   : > { %v12148_v37 = vsel %vm11959_vm4, %v12147_v20, %v10147_v39  ;;  %v12495_v43 = vsel %vm11965_vm6, %v12147_v20, %v12494_v28  ;;  %v12344_v26 = vpop.permute.xlu1 %12343  ;;  %v12677_v42 = vsel %vm11968_vm7, %v12147_v20, %v12676_v5  ;;  %v12313_v45 = vsel %vm11962_vm5, %v12147_v20, %v12312_v34 }
 0x34e   : > { %12391 = vst.msk [vmem:[#allocation2 + $0x27] sm:$0xff] %vm12386_vm15, %v12344_v26  ;;  %v10366_v14 = vpop.f32.mrf.mxu0  ;;  %v15313_v22 = vpop.f32.mrf.mxu1  ;;  %v12153_v49 = vrot.slane %v10439_v40, 4  ;;  %v12150_v1 = vsel %vm11962_vm5, %v12149_v9, %v12148_v37  ;;  %v12678_v60 = vsel %vm11971_vm8, %v12149_v9, %v12677_v42  ;;  %v12496_v35 = vsel %vm11968_vm7, %v12149_v9, %v12495_v43 }
 0x34f   : > { %12573 = vst.msk [vmem:[#allocation2 + $0x26] sm:$0xff] %vm12568_vm2, %v12526_v7  ;;  %v12151_v46 = vrot.slane %v10366_v14, 5  ;;  %v12314_v47 = vsel %vm11965_vm6, %v12149_v9, %v12313_v45 }
 0x350   : > { %12755 = vst.msk [vmem:[#allocation2 + $0x25] sm:$0xff] %vm12750_vm3, %v12708_v51  ;;  %v15308_v44 = vpop.f32.mrf.mxu0  ;;  %v10585_v32 = vpop.f32.mrf.mxu1 }
 0x351   : > { %v12152_v50 = vsel %vm11965_vm6, %v12151_v46, %v12150_v1  ;;  %v12679_v10 = vsel %vm11974_vm9, %v12151_v46, %v12678_v60  ;;  %v12497_v52 = vsel %vm11971_vm8, %v12151_v46, %v12496_v35  ;;  %v12315_v56 = vsel %vm11968_vm7, %v12151_v46, %v12314_v47 }
 0x352   : > { %v10512_v53 = vpop.f32.mrf.mxu0  ;;  %v15323_v59 = vpop.f32.mrf.mxu1  ;;  %v12680_v6 = vsel %vm11977_vm10, %v12153_v49, %v12679_v10  ;;  %v12154_v61 = vsel %vm11968_vm7, %v12153_v49, %v12152_v50  ;;  %v12498_v24 = vsel %vm11974_vm9, %v12153_v49, %v12497_v52  ;;  %v12157_v21 = vrot.slane %v10585_v32, 2 }
 0x353   : > { %v12155_v36 = vrot.slane %v10512_v53, 3  ;;  %12723 = vrot.lane.b32.xlu1 %v12680_v6, %s18232_s12  ;;  %v12316_v51 = vsel %vm11971_vm8, %v12153_v49, %v12315_v56 }
 0x354   : > { %v15318_v41 = vpop.f32.mrf.mxu0  ;;  %v10731_v23 = vpop.f32.mrf.mxu1 }
 0x355   : > { %v12156_v31 = vsel %vm11971_vm8, %v12155_v36, %v12154_v61  ;;  %v12710_v13 = vpop.permute.xlu0 %12709  ;;  %v12499_v39 = vsel %vm11977_vm10, %v12155_v36, %v12498_v24  ;;  %v12317_v25 = vsel %vm11974_vm9, %v12155_v36, %v12316_v51  ;;  %v12681_v63 = vsel %vm11959_vm4, %v12157_v21, %v12155_v36 }
 0x356   : > { %v10658_v27 = vpop.f32.mrf.mxu0  ;;  %v15333_v57 = vpop.f32.mrf.mxu1  ;;  %v12158_v58 = vsel %vm11974_vm9, %v12157_v21, %v12156_v31  ;;  %v12318_v7 = vsel %vm11977_vm10, %v12157_v21, %v12317_v25 }
 0x357   : > { %v12159_v55 = vrot.slane %v10658_v27, 1  ;;  %12541 = vrot.lane.b32.xlu1 %v12499_v39, %s15683_s17  ;;  %v12958_v62 = vld [vmem:[#allocation2 + $0x20] sm:$0xff] }
 0x358   : > { %v15328_v12 = vpop.f32.mrf.mxu0  ;;  %15447 = vmatprep.mubr.msk.f32.mxu0 %vm486_vm0, %v12958_v62 }
 0x359   : > { %v10877_v3 = vpop.f32.mrf.mxu1  ;;  %v12528_v0 = vpop.permute.xlu0 %12527  ;;  %v12160_v2 = vsel %vm11977_vm10, %v12159_v55, %v12158_v58  ;;  %v12500_v18 = vsel %vm11959_vm4, %v12159_v55, %v12157_v21  ;;  %v12682_v30 = vsel %vm11962_vm5, %v12159_v55, %v12681_v63  ;;  %v12319_v33 = vsel %vm11959_vm4, %v10731_v23, %v12159_v55 }
 0x35a   : > { %v10804_v4 = vpop.f32.mrf.mxu0  ;;  %12219 = vst.msk [vmem:[#allocation2 + $0x68] sm:$0xff] %vm12205_vm11, %v12160_v2  ;;  %v12501_v54 = vsel %vm11962_vm5, %v10731_v23, %v12500_v18  ;;  %v12683_v38 = vsel %vm11965_vm6, %v10731_v23, %v12682_v30  ;;  %v12163_v40 = vrot.slane %v10877_v3, 6 }
 0x35b   : > { %v12161_v29 = vrot.slane %v10804_v4, 7  ;;  %v15343_v11 = vpop.f32.mrf.mxu1  ;;  %12359 = vrot.lane.b32.xlu1 %v12318_v7, %s15684_s0  ;;  %v13199_v4 = vld [vmem:[%s18228_s11 + $0x10] sm:$0xff]  ;;  %v13198_v7 = vld [vmem:[%s18228_s11 + $0x8] sm:$0xff] }
 0x35c   : > { %v15338_v17 = vpop.f32.mrf.mxu0 }
 0x35d   : > { %v11023_v48 = vpop.f32.mrf.mxu1  ;;  %v12346_v19 = vpop.permute.xlu0 %12345  ;;  %v12162_v16 = vsel %vm11959_vm4, %v12161_v29, %v10731_v23  ;;  %v12502_v20 = vsel %vm11965_vm6, %v12161_v29, %v12501_v54  ;;  %v12684_v28 = vsel %vm11968_vm7, %v12161_v29, %v12683_v38  ;;  %v12320_v26 = vsel %vm11962_vm5, %v12161_v29, %v12319_v33 }
 0x35e   : > { %12392 = vst.msk [vmem:[#allocation2 + $0x2f] sm:$0xff] %vm12386_vm15, %v12346_v19  ;;  %v12167_v34 = vrot.slane %v11023_v48, 4  ;;  %v12164_v9 = vsel %vm11962_vm5, %v12163_v40, %v12162_v16  ;;  %v12685_v42 = vsel %vm11971_vm8, %v12163_v40, %v12684_v28  ;;  %v12503_v45 = vsel %vm11968_vm7, %v12163_v40, %v12502_v20  ;;  %v13197_v20 = vld [vmem:[%s18228_s11] sm:$0xff] }
 0x35f   : > { %12574 = vst.msk [vmem:[#allocation2 + $0x2e] sm:$0xff] %vm12568_vm2, %v12528_v0  ;;  %v10950_v37 = vpop.f32.mrf.mxu0  ;;  %v15353_v43 = vpop.f32.mrf.mxu1  ;;  %v12321_v35 = vsel %vm11965_vm6, %v12163_v40, %v12320_v26  ;;  %v13200_v0 = vld [vmem:[%s18228_s11 + $0x18] sm:$0xff] }
 0x360   : > { %12756 = vst.msk [vmem:[#allocation2 + $0x2d] sm:$0xff] %vm12750_vm3, %v12710_v13  ;;  %v12165_v5 = vrot.slane %v10950_v37, 5  ;;  %15465 = vmatprep.subr.mxu1 %v13200_v0 }
 0x361   : > { %v15348_v14 = vpop.f32.mrf.mxu0  ;;  %v11169_v22 = vpop.f32.mrf.mxu1  ;;  %15466 = vmatpush3.msra.mxu1 %v13200_v0 }
 0x362   : > { %v12166_v46 = vsel %vm11965_vm6, %v12165_v5, %v12164_v9  ;;  %v12686_v49 = vsel %vm11974_vm9, %v12165_v5, %v12685_v42  ;;  %v12504_v1 = vsel %vm11971_vm8, %v12165_v5, %v12503_v45  ;;  %v12322_v52 = vsel %vm11968_vm7, %v12165_v5, %v12321_v35  ;;  %15467 = vmatprep.subr.mxu1 %v13199_v4 }
 0x363   : > { %v11096_v44 = vpop.f32.mrf.mxu0  ;;  %v15363_v32 = vpop.f32.mrf.mxu1  ;;  %v12687_v60 = vsel %vm11977_vm10, %v12167_v34, %v12686_v49  ;;  %v12168_v53 = vsel %vm11968_vm7, %v12167_v34, %v12166_v46  ;;  %v12505_v47 = vsel %vm11974_vm9, %v12167_v34, %v12504_v1  ;;  %v12171_v61 = vrot.slane %v11169_v22, 2  ;;  %15468 = vmatpush3.msra.mxu1 %v13199_v4 }
 0x364   : > { %v12169_v50 = vrot.slane %v11096_v44, 3  ;;  %12725 = vrot.lane.b32.xlu0 %v12687_v60, %s18232_s12  ;;  %v12712_v10 = vpop.permute.xlu1 %12711  ;;  %v12323_v31 = vsel %vm11971_vm8, %v12167_v34, %v12322_v52  ;;  %15469 = vmatprep.subr.mxu1 %v13198_v7  ;;  %s442_s12 = scalar_lea.vmem [#allocation6], %s441_s18 }
 0x365   : > { %v15358_v59 = vpop.f32.mrf.mxu0  ;;  %v17677_v6 = vpop.f32.mrf.mxu1  ;;  %15470 = vmatpush3.msra.mxu1 %v13198_v7 }
 0x366   : > { %v12170_v36 = vsel %vm11971_vm8, %v12169_v50, %v12168_v53  ;;  %v12506_v56 = vsel %vm11977_vm10, %v12169_v50, %v12505_v47  ;;  %v12324_v21 = vsel %vm11974_vm9, %v12169_v50, %v12323_v31  ;;  %v12688_v43 = vsel %vm11959_vm4, %v12171_v61, %v12169_v50  ;;  %15471 = vmatprep.subr.mxu1 %v13197_v20 }
 0x367   : > { %v11242_v41 = vpop.f32.mrf.mxu0  ;;  %v15373_v23 = vpop.f32.mrf.mxu1  ;;  %v12959_v24 = vld [vmem:[#allocation2 + $0x28] sm:$0xff]  ;;  %v12172_v57 = vsel %vm11974_vm9, %v12171_v61, %v12170_v36  ;;  %v12325_v62 = vsel %vm11977_vm10, %v12171_v61, %v12324_v21  ;;  %15472 = vmatpush3.msra.mxu1 %v13197_v20 }
 0x368   : > { %v12173_v13 = vrot.slane %v11242_v41, 1  ;;  %12543 = vrot.lane.b32.xlu0 %v12506_v56, %s15683_s17  ;;  %15448 = vmatmul.mubr.msk.f32.gmra.mxu0 %vm486_vm0, %v12959_v24  ;;  %v12530_v39 = vpop.permute.xlu1 %12529 }
 0x369   : > { %v15368_v27 = vpop.f32.mrf.mxu0 }
 0x36a   : > { %v11461_v51 = vpop.f32.mrf.mxu1  ;;  %v12174_v55 = vsel %vm11977_vm10, %v12173_v13, %v12172_v57  ;;  %v12507_v25 = vsel %vm11959_vm4, %v12173_v13, %v12171_v61  ;;  %v12326_v29 = vsel %vm11959_vm4, %v17677_v6, %v12173_v13  ;;  %v12689_v9 = vsel %vm11962_vm5, %v12173_v13, %v12688_v43 }
 0x36b   : > { %12220 = vst.msk [vmem:[#allocation2 + $0x70] sm:$0xff] %vm12205_vm11, %v12174_v55  ;;  %v12508_v18 = vsel %vm11962_vm5, %v17677_v6, %v12507_v25  ;;  %v12177_v48 = vrot.slane %v11461_v51, 6  ;;  %v12690_v52 = vsel %vm11965_vm6, %v17677_v6, %v12689_v9 }
 0x36c   : > { %v11388_v12 = vpop.f32.mrf.mxu0  ;;  %v15383_v58 = vpop.f32.mrf.mxu1  ;;  %12361 = vrot.lane.b32.xlu0 %v12325_v62, %s15684_s0 }
 0x36d   : > { %v12175_v63 = vrot.slane %v11388_v12, 7  ;;  %v12348_v3 = vpop.permute.xlu1 %12347 }
 0x36e   : > { %v15378_v2 = vpop.f32.mrf.mxu0  ;;  %12393 = vst.msk [vmem:[#allocation2 + $0x37] sm:$0xff] %vm12386_vm15, %v12348_v3 }
 0x36f   : > { %v11607_v30 = vpop.f32.mrf.mxu1  ;;  %12575 = vst.msk [vmem:[#allocation2 + $0x36] sm:$0xff] %vm12568_vm2, %v12530_v39  ;;  %v12176_v11 = vsel %vm11959_vm4, %v12175_v63, %v17677_v6  ;;  %v12509_v17 = vsel %vm11965_vm6, %v12175_v63, %v12508_v18  ;;  %v12327_v19 = vsel %vm11962_vm5, %v12175_v63, %v12326_v29  ;;  %v12691_v36 = vsel %vm11968_vm7, %v12175_v63, %v12690_v52 }
 0x370   : > { %12757 = vst.msk [vmem:[#allocation2 + $0x35] sm:$0xff] %vm12750_vm3, %v12712_v10  ;;  %v11534_v54 = vpop.f32.mrf.mxu0  ;;  %v12178_v33 = vsel %vm11962_vm5, %v12177_v48, %v12176_v11  ;;  %v12510_v37 = vsel %vm11968_vm7, %v12177_v48, %v12509_v17  ;;  %v12328_v34 = vsel %vm11965_vm6, %v12177_v48, %v12327_v19  ;;  %v12181_v14 = vrot.slane %v11607_v30, 4 }
 0x371   : > { %v12179_v38 = vrot.slane %v11534_v54, 5  ;;  %v15393_v16 = vpop.f32.mrf.mxu1  ;;  %v12692_v31 = vsel %vm11971_vm8, %v12177_v48, %v12691_v36 }
 0x372   : > { %v15388_v28 = vpop.f32.mrf.mxu0 }
 0x373   : > { %v11753_v40 = vpop.f32.mrf.mxu1  ;;  %v12180_v26 = vsel %vm11965_vm6, %v12179_v38, %v12178_v33  ;;  %v12511_v5 = vsel %vm11971_vm8, %v12179_v38, %v12510_v37  ;;  %v12329_v45 = vsel %vm11968_vm7, %v12179_v38, %v12328_v34  ;;  %v12693_v13 = vsel %vm11974_vm9, %v12179_v38, %v12692_v31  ;;  %v17779_v37 = vld [vmem:[%s18227_s10] ss:$0 sm:$0xff] }
 0x374   : > { %v12182_v1 = vsel %vm11968_vm7, %v12181_v14, %v12180_v26  ;;  %v12512_v32 = vsel %vm11974_vm9, %v12181_v14, %v12511_v5  ;;  %v12330_v10 = vsel %vm11971_vm8, %v12181_v14, %v12329_v45  ;;  %v12185_v53 = vrot.slane %v11753_v40, 2 }
 0x375   : > { %v11680_v22 = vpop.f32.mrf.mxu0  ;;  %v15403_v42 = vpop.f32.mrf.mxu1  ;;  %v12694_v27 = vsel %vm11977_vm10, %v12181_v14, %v12693_v13  ;;  %vm12766_vm6 = vcmask 125024  }
 0x376   : > { %v12183_v46 = vrot.slane %v11680_v22, 3  ;;  %v12714_v49 = vpop.permute.xlu0 %12713 }
 0x377   : > { %v15398_v44 = vpop.f32.mrf.mxu0  ;;  %v12960_v60 = vld [vmem:[#allocation2 + $0x30] sm:$0xff] }
 0x378   : > { %v12184_v35 = vsel %vm11971_vm8, %v12183_v46, %v12182_v1  ;;  %v12513_v50 = vsel %vm11977_vm10, %v12183_v46, %v12512_v32  ;;  %15450 = vmatprep.mubr.msk.f32.mxu0 %vm486_vm0, %v12960_v60  ;;  %v12331_v47 = vsel %vm11974_vm9, %v12183_v46, %v12330_v10  ;;  %v12695_v57 = vsel %vm11959_vm4, %v12185_v53, %v12183_v46  ;;  %v15415_v40 = vpop.f32.mrf.mxu1 }
 0x379   : > { %12545 = vrot.lane.b32.xlu1 %v12513_v50, %s15683_s17  ;;  %v11826_v59 = vpop.f32.mrf.mxu0  ;;  %v12186_v23 = vsel %vm11974_vm9, %v12185_v53, %v12184_v35  ;;  %v12332_v24 = vsel %vm11977_vm10, %v12185_v53, %v12331_v47  ;;  %v12881_v5 = vadd.f32 %v15415_v40, %v17779_v37 }
 0x37a   : > { %v12187_v56 = vrot.slane %v11826_v59, 1  ;;  %v12532_v61 = vpop.permute.xlu0 %12531  ;;  %v12875_v43 = vpop.f32.mrf.mxu1 }
 0x37b   : > { %v15408_v41 = vpop.f32.mrf.mxu0  ;;  %v12876_v9 = vadd.f32 %v17779_v37, %v12875_v43 }
 0x37c   : > { %12365 = vrot.lane.b32.xlu0 %v12187_v56, %s15684_s0  ;;  %v12188_v6 = vsel %vm11977_vm10, %v12187_v56, %v12186_v23  ;;  %v12514_v21 = vsel %vm11959_vm4, %v12187_v56, %v12185_v53  ;;  %v12696_v51 = vsel %vm11962_vm5, %v12187_v56, %v12695_v57  ;;  %vm12402_vm4 = vcmask 57376   ;;  %v15418_v52 = vpop.f32.mrf.mxu1 }
 0x37d   : > { %12363 = vrot.lane.b32.xlu1 %v12332_v24, %s15684_s0  ;;  %12221 = vst.msk [vmem:[#allocation2 + $0x78] sm:$0xff] %vm12205_vm11, %v12188_v6  ;;  %vm12584_vm5 = vcmask 91200   ;;  %v12891_v59 = vadd.f32 %v15418_v52, %v17779_v37 }
 0x37e   : > { %v12350_v39 = vpop.permute.xlu0 %12349  ;;  %v12885_v53 = vpop.f32.mrf.mxu1 }
 0x37f   : > { %12394 = vst.msk [vmem:[#allocation2 + $0x3f] sm:$0xff] %vm12386_vm15, %v12350_v39  ;;  %v12886_v36 = vadd.f32 %v17779_v37, %v12885_v53 }
 0x380   : > { %12576 = vst.msk [vmem:[#allocation2 + $0x3e] sm:$0xff] %vm12568_vm2, %v12532_v61  ;;  %12547 = vrot.lane.b32.xlu0 %v12514_v21, %s15683_s17  ;;  %v15421_v31 = vpop.f32.mrf.mxu1 }
 0x381   : > { %12758 = vst.msk [vmem:[#allocation2 + $0x3d] sm:$0xff] %vm12750_vm3, %v12714_v49  ;;  %12727 = vrot.lane.b32.xlu1 %v12694_v27, %s18241_s23  ;;  %v12901_v13 = vadd.f32 %v15421_v31, %v17779_v37 }
 0x382   : > { %v12895_v6 = vpop.f32.mrf.mxu1 }
 0x383   : > { %v12896_v21 = vadd.f32 %v17779_v37, %v12895_v6  ;;  %v17819_v6 = vld [vmem:[#allocation5] ss:$0 sm:$0xff] }
 0x384   : > { %12729 = vrot.lane.b32.xlu0 %v12696_v51, %s18241_s23  ;;  %s13910_s23 = sshll.u32 %s442_s12, 4  ;;  %s18178_s23 = int_to_ptr.vmem [resolvable:$true] %s13910_s23 }
 0x385   : > { %v12716_v55 = vpop.permute.xlu1 %12715 }
 0x388   : > { %v12961_v62 = vld [vmem:[#allocation2 + $0x38] sm:$0xff] }
 0x389   : > { %15451 = vmatmul.mubr.msk.f32.gmra.mxu0 %vm486_vm0, %v12961_v62  ;;  %v12534_v25 = vpop.permute.xlu1 %12533 }
 0x38d   : > { %v12352_v12 = vpop.permute.xlu1 %12351 }
 0x38e   : > { %12395 = vst.msk [vmem:[#allocation2 + $0x47] sm:$0xff] %vm12386_vm15, %v12352_v12 }
 0x38f   : > { %12577 = vst.msk [vmem:[#allocation2 + $0x46] sm:$0xff] %vm12568_vm2, %v12534_v25  ;;  %v15424_v25 = vpop.f32.mrf.mxu1 }
 0x390   : > { %12759 = vst.msk [vmem:[#allocation2 + $0x45] sm:$0xff] %vm12750_vm3, %v12716_v55 }
 0x391   : > { %v12905_v12 = vpop.f32.mrf.mxu1 }
 0x395   : > { %v12718_v58 = vpop.permute.xlu0 %12717 }
 0x397   : > { %v12962_v63 = vld [vmem:[#allocation2 + $0x40] sm:$0xff] }
 0x398   : > { %15453 = vmatprep.mubr.msk.f32.mxu0 %vm486_vm0, %v12962_v63 }
 0x399   : > { %v12536_v3 = vpop.permute.xlu0 %12535 }
 0x39d   : > { %v12354_v0 = vpop.permute.xlu0 %12353 }
 0x39e   : > { %12396 = vst.msk [vmem:[#allocation2 + $0x4f] sm:$0xff] %vm12386_vm15, %v12354_v0 }
 0x39f   : > { %12578 = vst.msk [vmem:[#allocation2 + $0x4e] sm:$0xff] %vm12568_vm2, %v12536_v3  ;;  %v12906_v3 = vadd.f32 %v17779_v37, %v12905_v12 }
 0x3a0   : > { %12760 = vst.msk [vmem:[#allocation2 + $0x4d] sm:$0xff] %vm12750_vm3, %v12718_v58  ;;  %v12911_v58 = vadd.f32 %v15424_v25, %v17779_v37 }
 0x3a5   : > { %v12720_v2 = vpop.permute.xlu1 %12719 }
 0x3a7   : > { %v12963_v18 = vld [vmem:[#allocation2 + $0x48] sm:$0xff] }
 0x3a8   : > { %15454 = vmatmul.mubr.msk.f32.gmra.mxu0 %vm486_vm0, %v12963_v18 }
 0x3a9   : > { %v12538_v30 = vpop.permute.xlu1 %12537 }
 0x3ad   : > { %v12356_v4 = vpop.permute.xlu1 %12355 }
 0x3ae   : > { %12397 = vst.msk [vmem:[#allocation2 + $0x57] sm:$0xff] %vm12386_vm15, %v12356_v4 }
 0x3af   : > { %12579 = vst.msk [vmem:[#allocation2 + $0x56] sm:$0xff] %vm12568_vm2, %v12538_v30 }
 0x3b0   : > { %12761 = vst.msk [vmem:[#allocation2 + $0x55] sm:$0xff] %vm12750_vm3, %v12720_v2 }
 0x3b5   : > { %v12722_v7 = vpop.permute.xlu0 %12721 }
 0x3b7   : > { %v12964_v29 = vld [vmem:[#allocation2 + $0x50] sm:$0xff] }
 0x3b8   : > { %15456 = vmatprep.mubr.msk.f32.mxu0 %vm486_vm0, %v12964_v29 }
 0x3b9   : > { %v12540_v11 = vpop.permute.xlu0 %12539 }
 0x3bd   : > { %v12358_v17 = vpop.permute.xlu0 %12357 }
 0x3be   : > { %12398 = vst.msk [vmem:[#allocation2 + $0x5f] sm:$0xff] %vm12386_vm15, %v12358_v17 }
 0x3bf   : > { %12580 = vst.msk [vmem:[#allocation2 + $0x5e] sm:$0xff] %vm12568_vm2, %v12540_v11 }
 0x3c0   : > { %12762 = vst.msk [vmem:[#allocation2 + $0x5d] sm:$0xff] %vm12750_vm3, %v12722_v7  ;;  %v15427_v7 = vpop.f32.mrf.mxu1 }
 0x3c1   : > { %v12921_v11 = vadd.f32 %v15427_v7, %v17779_v37 }
 0x3c2   : > { %v12915_v29 = vpop.f32.mrf.mxu1 }
 0x3c5   : > { %v12724_v54 = vpop.permute.xlu1 %12723 }
 0x3c7   : > { %v12965_v48 = vld [vmem:[#allocation2 + $0x58] sm:$0xff] }
 0x3c8   : > { %15457 = vmatmul.mubr.msk.f32.gmra.mxu0 %vm486_vm0, %v12965_v48 }
 0x3c9   : > { %v12542_v19 = vpop.permute.xlu1 %12541 }
 0x3cd   : > { %v12360_v38 = vpop.permute.xlu1 %12359 }
 0x3ce   : > { %12399 = vst.msk [vmem:[#allocation2 + $0x67] sm:$0xff] %vm12386_vm15, %v12360_v38 }
 0x3cf   : > { %12581 = vst.msk [vmem:[#allocation2 + $0x66] sm:$0xff] %vm12568_vm2, %v12542_v19 }
 0x3d0   : > { %12763 = vst.msk [vmem:[#allocation2 + $0x65] sm:$0xff] %vm12750_vm3, %v12724_v54  ;;  %v12916_v54 = vadd.f32 %v17779_v37, %v12915_v29 }
 0x3d6   : > { %v12726_v16 = vpop.permute.xlu0 %12725 }
 0x3d7   : > { %v12966_v20 = vld [vmem:[#allocation2 + $0x60] sm:$0xff] }
 0x3d8   : > { %15459 = vmatprep.mubr.msk.f32.mxu0 %vm486_vm0, %v12966_v20 }
 0x3da   : > { %v12544_v28 = vpop.permute.xlu0 %12543 }
 0x3de   : > { %v12362_v33 = vpop.permute.xlu0 %12361 }
 0x3df   : > { %12400 = vst.msk [vmem:[#allocation2 + $0x6f] sm:$0xff] %vm12386_vm15, %v12362_v33 }
 0x3e0   : > { %12582 = vst.msk [vmem:[#allocation2 + $0x6e] sm:$0xff] %vm12568_vm2, %v12544_v28  ;;  %v15430_v28 = vpop.f32.mrf.mxu1 }
 0x3e1   : > { %12764 = vst.msk [vmem:[#allocation2 + $0x6d] sm:$0xff] %vm12750_vm3, %v12726_v16  ;;  %v12931_v40 = vadd.f32 %v15430_v28, %v17779_v37 }
 0x3e2   : > { %v12925_v33 = vpop.f32.mrf.mxu1 }
 0x3e8   : > { %v12967_v26 = vld [vmem:[#allocation2 + $0x68] sm:$0xff] }
 0x3e9   : > { %15460 = vmatmul.mubr.msk.f32.gmra.mxu0 %vm486_vm0, %v12967_v26  ;;  %v12926_v26 = vadd.f32 %v17779_v37, %v12925_v33 }
 0x3ea   : > { %v15443_v34 = vpop.f32.mrf.mxu0 }
 0x3eb   : > { %v12546_v14 = vpop.permute.xlu1 %12545  ;;  %v13166_v22 = vadd.f32 %v15443_v34, %v12881_v5 }
 0x3ec   : > { %v13086_v42 = vpop.f32.mrf.mxu0 }
 0x3ed   : > { %v13165_v45 = vadd.f32 %v13086_v42, %v12876_v9  ;;  %v13182_v44 = vmax.f32 %v13166_v22, 0.0  ;;  %v15433_v42 = vpop.f32.mrf.mxu1 }
 0x3ee   : > { %v12366_v46 = vpop.permute.xlu0 %12365 }
 0x3ef   : > { %v13181_v49 = vmax.f32 %v13165_v45, 0.0  ;;  %12403 = vst.msk [vmem:[#allocation2 + $0x7f] sm:$0x1] %vm12402_vm4, %v12366_v46  ;;  %v12364_v1 = vpop.permute.xlu1 %12363  ;;  %v12935_v45 = vpop.f32.mrf.mxu1  ;;  %v12941_v46 = vadd.f32 %v15433_v42, %v17779_v37 }
 0x3f0   : > { %12401 = vst.msk [vmem:[#allocation2 + $0x77] sm:$0xff] %vm12386_vm15, %v12364_v1  ;;  %v12936_v1 = vadd.f32 %v17779_v37, %v12935_v45 }
 0x3f1   : > { %12583 = vst.msk [vmem:[#allocation2 + $0x76] sm:$0xff] %vm12568_vm2, %v12546_v14  ;;  %15473 = vmatprep.mubr.msk.f32.mxu1 %vm707_vm1, %v13181_v49 }
 0x3f2   : > { %v12548_v32 = vpop.permute.xlu0 %12547  ;;  %15474 = vmatmul.mubr.msk.f32.vlgmr.msra.gmra.mxu1 %vm707_vm1, %v13182_v44 }
 0x3f3   : > { %12585 = vst.msk [vmem:[#allocation2 + $0x7e] sm:$0x3] %vm12584_vm5, %v12548_v32  ;;  %v12728_v60 = vpop.permute.xlu1 %12727 }
 0x3f4   : > { %12765 = vst.msk [vmem:[#allocation2 + $0x75] sm:$0xff] %vm12750_vm3, %v12728_v60 }
 0x3f6   : > { %v12730_v35 = vpop.permute.xlu0 %12729 }
 0x3f7   : > { %12767 = vst.msk [vmem:[#allocation2 + $0x7d] sm:$0x7] %vm12766_vm6, %v12730_v35 }
 0x3fb   : > { %v12968_v50 = vld [vmem:[#allocation2 + $0x70] sm:$0xff] }
 0x3fc   : > { %15462 = vmatprep.mubr.msk.f32.mxu0 %vm486_vm0, %v12968_v50 }
 0x3fe   : > { %v12969_v10 = vld [vmem:[#allocation2 + $0x78] sm:$0xff] }
 0x3ff   : > { %15463 = vmatmul.mubr.msk.f32.gmra.mxu0 %vm486_vm0, %v12969_v10  ;;  %v15436_v10 = vpop.f32.mrf.mxu1 }
 0x400   : > { %v12951_v53 = vadd.f32 %v15436_v10, %v17779_v37 }
 0x401   : > { %v12945_v52 = vpop.f32.mrf.mxu1 }
 0x407   : > { %v15446_v47 = vpop.f32.mrf.mxu0 }
 0x408   : > { %v13168_v56 = vadd.f32 %v15446_v47, %v12891_v59  ;;  %v12946_v47 = vadd.f32 %v17779_v37, %v12945_v52 }
 0x409   : > { %v13096_v61 = vpop.f32.mrf.mxu0 }
 0x40a   : > { %v13167_v41 = vadd.f32 %v13096_v61, %v12886_v36  ;;  %v13184_v24 = vmax.f32 %v13168_v56, 0.0 }
 0x40c   : > { %v13183_v23 = vmax.f32 %v13167_v41, 0.0 }
 0x40e   : > { %15476 = vmatprep.mubr.msk.f32.mxu1 %vm707_vm1, %v13183_v23 }
 0x40f   : > { %15477 = vmatmul.mubr.msk.f32.gmra.mxu1 %vm707_vm1, %v13184_v24 }
 0x428   : > { %v15449_v39 = vpop.f32.mrf.mxu0 }
 0x429   : > { %v13170_v27 = vadd.f32 %v15449_v39, %v12901_v13 }
 0x42a   : > { %v13106_v57 = vpop.f32.mrf.mxu0 }
 0x42b   : > { %v13169_v51 = vadd.f32 %v13106_v57, %v12896_v21  ;;  %v13186_v62 = vmax.f32 %v13170_v27, 0.0 }
 0x42d   : > { %v13185_v55 = vmax.f32 %v13169_v51, 0.0 }
 0x42f   : > { %15479 = vmatprep.mubr.msk.f32.mxu1 %vm707_vm1, %v13185_v55 }
 0x430   : > { %15480 = vmatmul.mubr.msk.f32.gmra.mxu1 %vm707_vm1, %v13186_v62 }
 0x449   : > { %v15452_v63 = vpop.f32.mrf.mxu0 }
 0x44a   : > { %v13172_v0 = vadd.f32 %v15452_v63, %v12911_v58 }
 0x44b   : > { %v13116_v2 = vpop.f32.mrf.mxu0 }
 0x44c   : > { %v13171_v18 = vadd.f32 %v13116_v2, %v12906_v3  ;;  %v13188_v4 = vmax.f32 %v13172_v0, 0.0 }
 0x44e   : > { %v13187_v30 = vmax.f32 %v13171_v18, 0.0 }
 0x450   : > { %15482 = vmatprep.mubr.msk.f32.mxu1 %vm707_vm1, %v13187_v30 }
 0x451   : > { %15483 = vmatmul.mubr.msk.f32.gmra.mxu1 %vm707_vm1, %v13188_v4 }
 0x468   : > { %v15455_v17 = vpop.f32.mrf.mxu0 }
 0x469   : > { %v13174_v48 = vadd.f32 %v15455_v17, %v12921_v11 }
 0x46a   : > { %v13126_v19 = vpop.f32.mrf.mxu0 }
 0x46b   : > { %v13173_v38 = vadd.f32 %v13126_v19, %v12916_v54  ;;  %v13190_v20 = vmax.f32 %v13174_v48, 0.0 }
 0x46d   : > { %v13189_v16 = vmax.f32 %v13173_v38, 0.0 }
 0x46f   : > { %15485 = vmatprep.mubr.msk.f32.mxu1 %vm707_vm1, %v13189_v16 }
 0x470   : > { %15486 = vmatmul.mubr.msk.f32.gmra.mxu1 %vm707_vm1, %v13190_v20 }
 0x488   : > { %v15458_v43 = vpop.f32.mrf.mxu0 }
 0x489   : > { %v13176_v5 = vadd.f32 %v15458_v43, %v12931_v40 }
 0x48a   : > { %v13136_v34 = vpop.f32.mrf.mxu0 }
 0x48b   : > { %v13175_v9 = vadd.f32 %v13136_v34, %v12926_v26  ;;  %v13192_v22 = vmax.f32 %v13176_v5, 0.0  ;;  %v13404_v34 = vadd.s32 8, %v15910_v15 }
 0x48d   : > { %v13191_v14 = vmax.f32 %v13175_v9, 0.0 }
 0x48f   : > { %15488 = vmatprep.mubr.msk.f32.mxu1 %vm707_vm1, %v13191_v14  ;;  %v17850_v14 = vstv %s15901_s25  ;;  %s15617_s25 = scalar_lea.vmem %s18178_s23, 16 }
 0x490   : > { %15489 = vmatmul.mubr.msk.f32.gmra.mxu1 %vm707_vm1, %v13192_v22  ;;  %v13406_v22 = vadd.s32 24, %v15910_v15  ;;  %p15618_p12 = scmp.ne.s32.totalorder %s18178_s23, %s15617_s25 }
 0x492   : > { %p15619_p13 = pnand %p15618_p12, %p15800_p5 }
 0x494   : > { %p15620_p0 = pneg %p15619_p13 }
 0x4a9   : > { %v15461_v49 = vpop.f32.mrf.mxu0 }
 0x4aa   : > { %v13178_v44 = vadd.f32 %v15461_v49, %v12941_v46  ;;  %v13421_v49 = vadd.s32 %v17850_v14, %v13404_v34 }
 0x4ab   : > { %v13146_v32 = vpop.f32.mrf.mxu0 }
 0x4ac   : > { %v13177_v60 = vadd.f32 %v13146_v32, %v12936_v1  ;;  %v13194_v50 = vmax.f32 %v13178_v44, 0.0  ;;  %v17855_v32 = vstv %s13436_s27 }
 0x4ad   : > { %vm13439_vm0 = vcmp.lt.s32.totalorder %v13421_v49, %v17855_v32 }
 0x4ae   : > { %v13193_v35 = vmax.f32 %v13177_v60, 0.0  ;;  %v13420_v60 = vadd.s32 %v17850_v14, %v15910_v15 }
 0x4b0   : > { %15491 = vmatprep.mubr.msk.f32.mxu1 %vm707_vm1, %v13193_v35  ;;  %v13423_v35 = vadd.s32 %v17850_v14, %v13406_v22 }
 0x4b1   : > { %15492 = vmatmul.mubr.msk.f32.gmra.mxu1 %vm707_vm1, %v13194_v50  ;;  %v13405_v50 = vadd.s32 16, %v15910_v15 }
 0x4b2   : > { %v15475_v24 = vpop.f32.mrf.mxu1  ;;  %vm13441_vm7 = vcmp.lt.s32.totalorder %v13423_v35, %v17855_v32 }
 0x4b3   : > { %v17822_v39 = vadd.f32 %v15475_v24, %v17819_v6 }
 0x4b4   : > { %v13322_v31 = vpop.f32.mrf.mxu1 }
 0x4b5   : > { %v17825_v37 = vadd.f32 %v17819_v6, %v13322_v31  ;;  %v13503_v27 = vand.u32 2147483647, %v17822_v39  ;;  %v13615_v24 = vsub.f32 0.0, %v17822_v39 }
 0x4b7   : > { %v13502_v51 = vand.u32 2147483647, %v17825_v37  ;;  %v13519_v55 = vsub.f32 0.0, %v13503_v27  ;;  %v13614_v27 = vsub.f32 0.0, %v17825_v37 }
 0x4b9   : > { %v13518_v25 = vsub.f32 0.0, %v13502_v51  ;;  %v13536_v58 = vmul.f32 1.442695, %v13519_v55  ;;  %v13408_v51 = vadd.s32 40, %v15910_v15 }
 0x4bb   : > { %v13534_v3 = vmul.f32 1.442695, %v13518_v25  ;;  %15552 = vpow2.f32 %v13536_v58 }
 0x4bd   : > { %15554 = vpow2.f32 %v13534_v3 }
 0x4bf   : > { %v15464_v59 = vpop.f32.mrf.mxu0 }
 0x4c0   : > { %v13180_v36 = vadd.f32 %v15464_v59, %v12951_v53  ;;  %v17873_v59 = vld [vmem:[%s17864_s22 + $0x8] sm:$0xff] }
 0x4c1   : > { %v13156_v56 = vpop.f32.mrf.mxu0 }
 0x4c2   : > { %v13179_v61 = vadd.f32 %v13156_v56, %v12946_v47  ;;  %v13196_v23 = vmax.f32 %v13180_v36, 0.0  ;;  %v17877_v36 = vld [vmem:[%s17864_s22] sm:$0xff]  ;;  %v13422_v56 = vadd.s32 %v17850_v14, %v13405_v50 }
 0x4c3   : > { %v13774_v58 = vsub.f32 1.0, %v17877_v36 }
 0x4c4   : > { %v13195_v41 = vmax.f32 %v13179_v61, 0.0  ;;  %vm13440_vm8 = vcmp.lt.s32.totalorder %v13422_v56, %v17855_v32 }
 0x4c6   : > { %15494 = vmatprep.mubr.msk.f32.mxu1 %vm707_vm1, %v13195_v41 }
 0x4c7   : > { %15495 = vmatmul.mubr.msk.f32.gmra.mxu1 %vm707_vm1, %v13196_v23  ;;  %vm13438_vm1 = vcmp.lt.s32.totalorder %v13420_v60, %v17855_v32  ;;  %v17883_v23 = vsel %vm13439_vm0, 1.0, %v15679_v8  ;;  %v13407_v60 = vadd.s32 32, %v15910_v15 }
 0x4c8   : > { %v15553_v29 = vpop.eup %15552  ;;  %v17893_v25 = vsel %vm13438_vm1, 1.0, %v15679_v8 }
 0x4c9   : > { %v13567_v19 = vadd.f32 1.0, %v15553_v29  ;;  %v17905_v29 = vld [vmem:[%s17864_s22 + $0x18] sm:$0xff] }
 0x4ca   : > { %v15555_v54 = vpop.eup %15554 }
 0x4cb   : > { %v13566_v20 = vadd.f32 1.0, %v15555_v54  ;;  %v17908_v54 = vld [vmem:[%s17864_s22 + $0x10] sm:$0xff] }
 0x4cf   : > { %v15478_v13 = vpop.f32.mrf.mxu1 }
 0x4d0   : > { %v17834_v12 = vadd.f32 %v15478_v13, %v17819_v6 }
 0x4d1   : > { %v13332_v21 = vpop.f32.mrf.mxu1 }
 0x4d2   : > { %v17829_v57 = vadd.f32 %v17819_v6, %v13332_v21  ;;  %v13505_v0 = vand.u32 2147483647, %v17834_v12  ;;  %v13775_v21 = vsub.f32 1.0, %v17873_v59 }
 0x4d4   : > { %v13504_v62 = vand.u32 2147483647, %v17829_v57  ;;  %v13521_v18 = vsub.f32 0.0, %v13505_v0  ;;  %v13695_v0 = vmax.f32 %v17822_v39, 0.0  ;;  %v17913_v39 = vadd.s32 %v17850_v14, %v13408_v51 }
 0x4d6   : > { %v13520_v63 = vsub.f32 0.0, %v13504_v62  ;;  %v13540_v30 = vmul.f32 1.442695, %v13521_v18  ;;  %vm13443_vm9 = vcmp.lt.s32.totalorder %v17913_v39, %v17855_v32  ;;  %v17968_v39 = vld [vmem:[%s17864_s22 + $0x38] sm:$0xff] }
 0x4d8   : > { %v13538_v2 = vmul.f32 1.442695, %v13520_v63  ;;  %v17897_v63 = vsel %vm13441_vm7, 1.0, %v15679_v8 }
 0x4da   : > { %15556 = vpow2.f32 %v13538_v2 }
 0x4db   : > { %15558 = vpow2.f32 %v13540_v30 }
 0x4dc   : > { %15560 = vlog2.f32 %v13567_v19  ;;  %v13630_v19 = vmax.f32 %v13614_v27, 0.0 }
 0x4dd   : > { %15562 = vlog2.f32 %v13566_v20 }
 0x4e7   : > { %v15557_v38 = vpop.eup %15556 }
 0x4e8   : > { %v13568_v40 = vadd.f32 1.0, %v15557_v38  ;;  %v15559_v9 = vpop.eup %15558  ;;  %v13694_v38 = vmax.f32 %v17825_v37, 0.0 }
 0x4e9   : > { %v13569_v1 = vadd.f32 1.0, %v15559_v9  ;;  %v15561_v47 = vpop.eup %15560 }
 0x4ea   : > { %15564 = vlog2.f32 %v13568_v40  ;;  %v15563_v13 = vpop.eup %15562  ;;  %v13585_v62 = vmul.f32 0.6931472, %v15561_v47 }
 0x4f0   : > { %v15481_v4 = vpop.f32.mrf.mxu1 }
 0x4f1   : > { %v17838_v11 = vadd.f32 %v15481_v4, %v17819_v6  ;;  %v13631_v4 = vmax.f32 %v13615_v24, 0.0 }
 0x4f2   : > { %v13342_v7 = vpop.f32.mrf.mxu1 }
 0x4f3   : > { %v17841_v17 = vadd.f32 %v17819_v6, %v13342_v7  ;;  %v13507_v16 = vand.u32 2147483647, %v17838_v11  ;;  %v13583_v7 = vmul.f32 0.6931472, %v15563_v13  ;;  %v13647_v20 = vadd.f32 %v13631_v4, %v13585_v62 }
 0x4f5   : > { %v13506_v28 = vand.u32 2147483647, %v17841_v17  ;;  %v13523_v43 = vsub.f32 0.0, %v13507_v16  ;;  %v13646_v37 = vadd.f32 %v13630_v19, %v13583_v7 }
 0x4f7   : > { %v13522_v26 = vsub.f32 0.0, %v13506_v28  ;;  %v13544_v42 = vmul.f32 1.442695, %v13523_v43  ;;  %v15565_v3 = vpop.eup %15564  ;;  %v13711_v28 = vadd.f32 %v13695_v0, %v13585_v62  ;;  %v13777_v43 = vsub.f32 1.0, %v17905_v29 }
 0x4f8   : > { %v13662_v13 = vsub.f32 0.0, %v13646_v37  ;;  %v13410_v0 = vadd.s32 56, %v15910_v15 }
 0x4f9   : > { %v13542_v45 = vmul.f32 1.442695, %v13522_v26  ;;  %15566 = vpow2.f32 %v13544_v42  ;;  %v13776_v26 = vsub.f32 1.0, %v17908_v54  ;;  %v13710_v42 = vadd.f32 %v13694_v38, %v13583_v7 }
 0x4fa   : > { %v13427_v37 = vadd.s32 %v17850_v14, %v13410_v0 }
 0x4fb   : > { %15568 = vpow2.f32 %v13542_v45  ;;  %v17925_v45 = vsel %vm13440_vm8, 1.0, %v15679_v8  ;;  %v13726_v27 = vsub.f32 0.0, %v13710_v42  ;;  %v13409_v42 = vadd.s32 48, %v15910_v15 }
 0x4fc   : > { %15570 = vlog2.f32 %v13569_v1  ;;  %v13617_v1 = vsub.f32 0.0, %v17834_v12  ;;  %vm13445_vm11 = vcmp.lt.s32.totalorder %v13427_v37, %v17855_v32 }
 0x4fe   : > { %v13633_v7 = vmax.f32 %v13617_v1, 0.0 }
 0x506   : > { %v15567_v22 = vpop.eup %15566 }
 0x507   : > { %v13571_v24 = vadd.f32 1.0, %v15567_v22 }
 0x508   : > { %v15569_v49 = vpop.eup %15568 }
 0x509   : > { %v15571_v50 = vpop.eup %15570  ;;  %v13570_v51 = vadd.f32 1.0, %v15569_v49 }
 0x50a   : > { %v13589_v62 = vmul.f32 0.6931472, %v15571_v50 }
 0x511   : > { %v15484_v48 = vpop.f32.mrf.mxu1 }
 0x512   : > { %v17869_v10 = vadd.f32 %v15484_v48, %v17819_v6  ;;  %v13616_v48 = vsub.f32 0.0, %v17829_v57 }
 0x513   : > { %v13352_v33 = vpop.f32.mrf.mxu1 }
 0x514   : > { %v17846_v5 = vadd.f32 %v17819_v6, %v13352_v33  ;;  %v13509_v61 = vand.u32 2147483647, %v17869_v10  ;;  %v13587_v33 = vmul.f32 0.6931472, %v15565_v3  ;;  %v13697_v3 = vmax.f32 %v17834_v12, 0.0 }
 0x516   : > { %v13508_v46 = vand.u32 2147483647, %v17846_v5  ;;  %v13525_v2 = vsub.f32 0.0, %v13509_v61  ;;  %v13713_v12 = vadd.f32 %v13697_v3, %v13589_v62 }
 0x518   : > { %v13524_v52 = vsub.f32 0.0, %v13508_v46  ;;  %v13548_v34 = vmul.f32 1.442695, %v13525_v2  ;;  %v13632_v46 = vmax.f32 %v13616_v48, 0.0 }
 0x51a   : > { %v13546_v31 = vmul.f32 1.442695, %v13524_v52  ;;  %v13663_v52 = vsub.f32 0.0, %v13647_v20  ;;  %v13648_v47 = vadd.f32 %v13632_v46, %v13587_v33  ;;  %v13678_v20 = vmax.f32 %v13662_v13, -100.0 }
 0x51b   : > { %v13426_v13 = vadd.s32 %v17850_v14, %v13409_v42 }
 0x51c   : > { %15572 = vpow2.f32 %v13546_v31  ;;  %v13664_v19 = vsub.f32 0.0, %v13648_v47  ;;  %v13758_v50 = vmul.f32 %v13678_v20, %v17877_v36 }
 0x51d   : > { %15574 = vpow2.f32 %v13548_v34  ;;  %v13649_v34 = vadd.f32 %v13633_v7, %v13589_v62  ;;  %v17984_v7 = vsel %vm13445_vm11, 1.0, %v15679_v8  ;;  %vm13444_vm13 = vcmp.lt.s32.totalorder %v13426_v13, %v17855_v32 }
 0x51e   : > { %15576 = vlog2.f32 %v13571_v24  ;;  %v13680_v1 = vmax.f32 %v13664_v19, -100.0 }
 0x51f   : > { %15578 = vlog2.f32 %v13570_v51  ;;  %v13665_v47 = vsub.f32 0.0, %v13649_v34 }
 0x530   : > { %v15487_v44 = vpop.f32.mrf.mxu1 }
 0x531   : > { %v17902_v18 = vadd.f32 %v15487_v44, %v17819_v6  ;;  %v13696_v44 = vmax.f32 %v17829_v57, 0.0 }
 0x532   : > { %v13362_v53 = vpop.f32.mrf.mxu1 }
 0x533   : > { %v17890_v55 = vadd.f32 %v17819_v6, %v13362_v53  ;;  %v13511_v9 = vand.u32 2147483647, %v17902_v18  ;;  %v13727_v53 = vsub.f32 0.0, %v13711_v28  ;;  %v13712_v61 = vadd.f32 %v13696_v44, %v13587_v33  ;;  %v15573_v33 = vpop.eup %15572 }
 0x534   : > { %v13742_v28 = vmax.f32 %v13726_v27, -100.0  ;;  %v17972_v27 = vld [vmem:[%s17864_s22 + $0x30] sm:$0xff]  ;;  %v15575_v51 = vpop.eup %15574 }
 0x535   : > { %v13510_v16 = vand.u32 2147483647, %v17890_v55  ;;  %v13527_v31 = vsub.f32 0.0, %v13511_v9  ;;  %v13743_v4 = vmax.f32 %v13727_v53, -100.0  ;;  %v13728_v38 = vsub.f32 0.0, %v13712_v61 }
 0x536   : > { %v13424_v9 = vadd.s32 %v17850_v14, %v13407_v60  ;;  %v13790_v60 = vmul.f32 %v13774_v58, %v13742_v28  ;;  %v13412_v61 = vadd.s32 72, %v15910_v15  ;;  %v13760_v58 = vmul.f32 %v13680_v1, %v17908_v54 }
 0x537   : > { %v13526_v35 = vsub.f32 0.0, %v13510_v16  ;;  %v13552_v16 = vmul.f32 1.442695, %v13527_v31  ;;  %v13791_v49 = vmul.f32 %v13775_v21, %v13743_v4  ;;  %v13744_v44 = vmax.f32 %v13728_v38, -100.0  ;;  %v17958_v21 = vld [vmem:[%s17864_s22 + $0x20] sm:$0xff] }
 0x538   : > { %vm13442_vm10 = vcmp.lt.s32.totalorder %v13424_v9, %v17855_v32  ;;  %v13806_v62 = vadd.f32 %v13790_v60, %v13758_v50  ;;  %v13778_v3 = vsub.f32 1.0, %v17958_v21  ;;  %v13429_v54 = vadd.s32 %v17850_v14, %v13412_v61 }
 0x539   : > { %v13550_v2 = vmul.f32 1.442695, %v13526_v35  ;;  %v17946_v35 = vld [vmem:[%s17864_s22 + $0x28] sm:$0xff]  ;;  %v13792_v31 = vmul.f32 %v13776_v26, %v13744_v44  ;;  %v17978_v4 = vsel %vm13442_vm10, 1.0, %v15679_v8  ;;  %v13780_v19 = vsub.f32 1.0, %v17972_v27 }
 0x53a   : > { %v13779_v24 = vsub.f32 1.0, %v17946_v35  ;;  %v13573_v28 = vadd.f32 1.0, %v15575_v51  ;;  %v13822_v34 = vsub.f32 0.0, %v13806_v62  ;;  %vm13447_vm14 = vcmp.lt.s32.totalorder %v13429_v54, %v17855_v32 }
 0x53b   : > { %15580 = vpow2.f32 %v13550_v2  ;;  %v13681_v2 = vmax.f32 %v13665_v47, -100.0  ;;  %v13808_v20 = vadd.f32 %v13792_v31, %v13760_v58  ;;  %v13618_v1 = vsub.f32 0.0, %v17841_v17 }
 0x53c   : > { %15582 = vpow2.f32 %v13552_v16  ;;  %v13411_v44 = vadd.s32 64, %v15910_v15  ;;  %v18024_v13 = vsel %vm13447_vm14, 1.0, %v15679_v8 }
 0x53d   : > { %v13761_v37 = vmul.f32 %v13681_v2, %v17905_v29  ;;  %v13838_v29 = vmul.f32 %v17893_v25, %v13822_v34  ;;  %v13698_v2 = vmax.f32 %v17841_v17, 0.0 }
 0x550   : > { %v15490_v41 = vpop.f32.mrf.mxu1 }
 0x551   : > { %v17934_v57 = vadd.f32 %v15490_v41, %v17819_v6 }
 0x552   : > { %v13372_v30 = vpop.f32.mrf.mxu1 }
 0x553   : > { %v17917_v40 = vadd.f32 %v17819_v6, %v13372_v30  ;;  %v13679_v30 = vmax.f32 %v13663_v52, -100.0  ;;  %v13513_v41 = vand.u32 2147483647, %v17934_v57  ;;  %v13572_v52 = vadd.f32 1.0, %v15573_v33  ;;  %v15577_v33 = vpop.eup %15576 }
 0x554   : > { %v13593_v47 = vmul.f32 0.6931472, %v15577_v33 }
 0x555   : > { %v13512_v56 = vand.u32 2147483647, %v17917_v40  ;;  %v13759_v22 = vmul.f32 %v13679_v30, %v17873_v59  ;;  %v13529_v53 = vsub.f32 0.0, %v13513_v41  ;;  %v17955_v59 = vsel %vm13443_vm9, 1.0, %v15679_v8 }
 0x557   : > { %v13528_v48 = vsub.f32 0.0, %v13512_v56  ;;  %v13729_v56 = vsub.f32 0.0, %v13713_v12  ;;  %v13807_v36 = vadd.f32 %v13791_v49, %v13759_v22  ;;  %v13556_v0 = vmul.f32 1.442695, %v13529_v53  ;;  %v15579_v22 = vpop.eup %15578 }
 0x558   : > { %v15581_v49 = vpop.eup %15580  ;;  %v13824_v53 = vsub.f32 0.0, %v13808_v20  ;;  %v13591_v51 = vmul.f32 0.6931472, %v15579_v22  ;;  %v18017_v22 = vld [vmem:[%s17864_s22 + $0x48] sm:$0xff] }
 0x559   : > { %v13554_v46 = vmul.f32 1.442695, %v13528_v48  ;;  %v13745_v30 = vmax.f32 %v13729_v56, -100.0  ;;  %v13781_v48 = vsub.f32 1.0, %v17968_v39  ;;  %v13823_v16 = vsub.f32 0.0, %v13807_v36  ;;  %v15583_v56 = vpop.eup %15582 }
 0x55a   : > { %v13574_v62 = vadd.f32 1.0, %v15581_v49  ;;  %v13575_v25 = vadd.f32 1.0, %v15583_v56 }
 0x55b   : > { %15584 = vpow2.f32 %v13554_v46  ;;  %v13793_v42 = vmul.f32 %v13777_v43, %v13745_v30  ;;  %v13619_v46 = vsub.f32 0.0, %v17838_v11  ;;  %v13699_v43 = vmax.f32 %v17838_v11, 0.0 }
 0x55c   : > { %15586 = vlog2.f32 %v13572_v52  ;;  %v13839_v52 = vmul.f32 %v17883_v23, %v13823_v16  ;;  %v13855_v11 = vsel %vm13854_vm12, %v13838_v29, 0.0  ;;  %v13414_v29 = vadd.s32 88, %v15910_v15 }
 0x55d   : > { %15588 = vpow2.f32 %v13556_v0  ;;  %v13809_v58 = vadd.f32 %v13793_v42, %v13761_v37  ;;  %v13635_v31 = vmax.f32 %v13619_v46, 0.0  ;;  %v13634_v0 = vmax.f32 %v13618_v1, 0.0 }
 0x55e   : > { %15590 = vlog2.f32 %v13573_v28  ;;  %v13715_v20 = vadd.f32 %v13699_v43, %v13593_v47  ;;  %v18013_v28 = vsel %vm13444_vm13, 1.0, %v15679_v8  ;;  %v13620_v37 = vsub.f32 0.0, %v17846_v5 }
 0x55f   : > { %v13651_v16 = vadd.f32 %v13635_v31, %v13593_v47  ;;  %v13825_v33 = vsub.f32 0.0, %v13809_v58  ;;  %v13650_v34 = vadd.f32 %v13634_v0, %v13591_v51  ;;  %v18040_v0 = vld [vmem:[%s17864_s22 + $0x50] sm:$0xff] }
 0x560   : > { %v13731_v1 = vsub.f32 0.0, %v13715_v20 }
 0x561   : > { %v13667_v49 = vsub.f32 0.0, %v13651_v16  ;;  %v13841_v54 = vmul.f32 %v17897_v63, %v13825_v33  ;;  %v13666_v47 = vsub.f32 0.0, %v13650_v34  ;;  %v13784_v34 = vsub.f32 1.0, %v18040_v0 }
 0x562   : > { %v13747_v31 = vmax.f32 %v13731_v1, -100.0 }
 0x563   : > { %v13683_v58 = vmax.f32 %v13667_v49, -100.0  ;;  %v13860_v16 = vsel %vm13854_vm12, %v13841_v54, 0.0  ;;  %v13682_v20 = vmax.f32 %v13666_v47, -100.0 }
 0x565   : > { %v13762_v54 = vmul.f32 %v13682_v20, %v17958_v21 }
 0x568   : > { %v15585_v30 = vpop.eup %15584 }
 0x569   : > { %v15587_v17 = vpop.eup %15586  ;;  %v13576_v42 = vadd.f32 1.0, %v15585_v30 }
 0x571   : > { %v15493_v26 = vpop.f32.mrf.mxu1 }
 0x572   : > { %v17989_v38 = vadd.f32 %v15493_v26, %v17819_v6  ;;  %v13840_v26 = vmul.f32 %v17925_v45, %v13824_v53  ;;  %v13856_v45 = vsel %vm13854_vm12, %v13839_v52, 0.0  ;;  %v18030_v52 = vld [vmem:[%s17864_s22 + $0x40] sm:$0xff]  ;;  %v15589_v53 = vpop.eup %15588 }
 0x573   : > { %v13382_v41 = vpop.f32.mrf.mxu1  ;;  %v15591_v63 = vpop.eup %15590 }
 0x574   : > { %v13515_v12 = vand.u32 2147483647, %v17989_v38  ;;  %v17994_v9 = vadd.f32 %v17819_v6, %v13382_v41  ;;  %v13428_v41 = vadd.s32 %v17850_v14, %v13411_v44  ;;  %v13858_v46 = vsel %vm13854_vm12, %v13840_v26, 0.0 }
 0x575   : > { %v13857_v44 = vadd.f32 %v13856_v45, %v13855_v11  ;;  %v13621_v11 = vsub.f32 0.0, %v17869_v10 }
 0x576   : > { %v13531_v50 = vsub.f32 0.0, %v13515_v12  ;;  %v13514_v60 = vand.u32 2147483647, %v17994_v9  ;;  %v13714_v12 = vadd.f32 %v13698_v2, %v13591_v51  ;;  %vm13446_vm15 = vcmp.lt.s32.totalorder %v13428_v41, %v17855_v32 }
 0x577   : > { %v13859_v43 = vadd.f32 %v13858_v46, %v13857_v44  ;;  %v13782_v51 = vsub.f32 1.0, %v18030_v52  ;;  %v13413_v2 = vadd.s32 80, %v15910_v15  ;;  %v18046_v26 = vsel %vm13446_vm15, 1.0, %v15679_v8 }
 0x578   : > { %v13560_v61 = vmul.f32 1.442695, %v13531_v50  ;;  %v13530_v36 = vsub.f32 0.0, %v13514_v60  ;;  %v13595_v50 = vmul.f32 0.6931472, %v15587_v17  ;;  %v13783_v60 = vsub.f32 1.0, %v18017_v22 }
 0x579   : > { %v13730_v56 = vsub.f32 0.0, %v13714_v12  ;;  %v18050_v17 = vadd.f32 %v13860_v16, %v13859_v43  ;;  %v18055_v12 = vadd.s32 %v17850_v14, %v13414_v29  ;;  %v13763_v41 = vmul.f32 %v13683_v58, %v17946_v35 }
 0x57a   : > { %15592 = vpow2.f32 %v13560_v61  ;;  %v13558_v23 = vmul.f32 1.442695, %v13530_v36  ;;  %v13636_v61 = vmax.f32 %v13620_v37, 0.0  ;;  %v13700_v36 = vmax.f32 %v17846_v5, 0.0 }
 0x57b   : > { %v13577_v5 = vadd.f32 1.0, %v15589_v53  ;;  %v13795_v37 = vmul.f32 %v13779_v24, %v13747_v31  ;;  %v18061_v49 = vadd.s32 %v17850_v14, %v13413_v2  ;;  %v13701_v35 = vmax.f32 %v17869_v10, 0.0 }
 0x57c   : > { %15594 = vpow2.f32 %v13558_v23  ;;  %v13652_v23 = vadd.f32 %v13636_v61, %v13595_v50  ;;  %v13716_v30 = vadd.f32 %v13700_v36, %v13595_v50  ;;  %v13622_v43 = vsub.f32 0.0, %v17890_v55 }
 0x57d   : > { %15596 = vlog2.f32 %v13574_v62  ;;  %v18037_v62 = vld [vmem:[%s17864_s22 + $0x58] sm:$0xff]  ;;  %v13811_v31 = vadd.f32 %v13795_v37, %v13763_v41  ;;  %v13623_v16 = vsub.f32 0.0, %v17902_v18  ;;  %vm13449_vm2 = vcmp.lt.s32.totalorder %v18055_v12, %v17855_v32 }
 0x57e   : > { %15598 = vlog2.f32 %v13575_v25  ;;  %v13746_v25 = vmax.f32 %v13730_v56, -100.0  ;;  %v13785_v33 = vsub.f32 1.0, %v18037_v62  ;;  %v13668_v1 = vsub.f32 0.0, %v13652_v23 }
 0x57f   : > { %15600 = vlog2.f32 %v13576_v42  ;;  %v13597_v42 = vmul.f32 0.6931472, %v15591_v63  ;;  %v13732_v44 = vsub.f32 0.0, %v13716_v30  ;;  %v13637_v56 = vmax.f32 %v13621_v11, 0.0 }
 0x580   : > { %15602 = vlog2.f32 %v13577_v5  ;;  %v13794_v47 = vmul.f32 %v13778_v3, %v13746_v25  ;;  %v13684_v21 = vmax.f32 %v13668_v1, -100.0  ;;  %v13638_v11 = vmax.f32 %v13622_v43, 0.0 }
 0x581   : > { %v13653_v2 = vadd.f32 %v13637_v56, %v13597_v42  ;;  %v13717_v63 = vadd.f32 %v13701_v35, %v13597_v42  ;;  %v13748_v3 = vmax.f32 %v13732_v44, -100.0  ;;  %v13703_v43 = vmax.f32 %v17902_v18, 0.0 }
 0x582   : > { %v13810_v10 = vadd.f32 %v13794_v47, %v13762_v54  ;;  %v13764_v44 = vmul.f32 %v13684_v21, %v17972_v27  ;;  %v13624_v54 = vsub.f32 0.0, %v17917_v40  ;;  %v13639_v47 = vmax.f32 %v13623_v16, 0.0 }
 0x583   : > { %v13669_v42 = vsub.f32 0.0, %v13653_v2  ;;  %v13704_v21 = vmax.f32 %v17917_v40, 0.0  ;;  %vm13448_vm3 = vcmp.lt.s32.totalorder %v18061_v49, %v17855_v32 }
 0x587   : > { %v15593_v45 = vpop.eup %15592  ;;  %v15496_v46 = vpop.f32.mrf.mxu1 }
 0x588   : > { %v18064_v50 = vadd.f32 %v15496_v46, %v17819_v6  ;;  %v13579_v61 = vadd.f32 1.0, %v15593_v45  ;;  %v13702_v45 = vmax.f32 %v17890_v55, 0.0 }
 0x589   : > { %v15595_v53 = vpop.eup %15594  ;;  %v13392_v24 = vpop.f32.mrf.mxu1 }
 0x58a   : > { %v15597_v29 = vpop.eup %15596  ;;  %v13578_v36 = vadd.f32 1.0, %v15595_v53  ;;  %v13517_v58 = vand.u32 2147483647, %v18064_v50  ;;  %v18073_v23 = vadd.f32 %v17819_v6, %v13392_v24  ;;  %v13733_v6 = vsub.f32 0.0, %v13717_v63 }
 0x58b   : > { %v15599_v30 = vpop.eup %15598  ;;  %v13599_v20 = vmul.f32 0.6931472, %v15597_v29  ;;  %v13796_v53 = vmul.f32 %v13780_v19, %v13748_v3  ;;  %v13827_v24 = vsub.f32 0.0, %v13811_v31  ;;  %v13826_v29 = vsub.f32 0.0, %v13810_v10 }
 0x58c   : > { %15604 = vlog2.f32 %v13578_v36  ;;  %v13533_v5 = vsub.f32 0.0, %v13517_v58  ;;  %v13516_v25 = vand.u32 2147483647, %v18073_v23  ;;  %v15601_v37 = vpop.eup %15600  ;;  %v13601_v46 = vmul.f32 0.6931472, %v15599_v30  ;;  %v18084_v36 = vld [vmem:[%s17864_s22 + $0x60] sm:$0xff] }
 0x58d   : > { %15606 = vlog2.f32 %v13579_v61  ;;  %v13654_v56 = vadd.f32 %v13638_v11, %v13599_v20  ;;  %v13718_v35 = vadd.f32 %v13702_v45, %v13599_v20  ;;  %v13603_v61 = vmul.f32 0.6931472, %v15601_v37  ;;  %v15603_v3 = vpop.eup %15602 }
 0x58e   : > { %v13564_v41 = vmul.f32 1.442695, %v13533_v5  ;;  %v13532_v1 = vsub.f32 0.0, %v13516_v25  ;;  %v13685_v58 = vmax.f32 %v13669_v42, -100.0  ;;  %v13749_v2 = vmax.f32 %v13733_v6, -100.0 }
 0x58f   : > { %v13655_v63 = vadd.f32 %v13639_v47, %v13601_v46  ;;  %v13812_v27 = vadd.f32 %v13796_v53, %v13764_v44  ;;  %v13625_v19 = vsub.f32 0.0, %v17934_v57  ;;  %v13640_v30 = vmax.f32 %v13624_v54, 0.0 }
 0x590   : > { %15608 = vpow2.f32 %v13564_v41  ;;  %v13562_v55 = vmul.f32 1.442695, %v13532_v1  ;;  %v13719_v5 = vadd.f32 %v13703_v43, %v13601_v46  ;;  %v13670_v16 = vsub.f32 0.0, %v13654_v56 }
 0x591   : > { %v13734_v31 = vsub.f32 0.0, %v13718_v35  ;;  %v13786_v10 = vsub.f32 1.0, %v18084_v36  ;;  %v18090_v18 = vmul.f32 %v17955_v59, %v13827_v24  ;;  %v13656_v20 = vadd.f32 %v13640_v30, %v13603_v61 }
 0x592   : > { %15610 = vpow2.f32 %v13562_v55  ;;  %v13720_v25 = vadd.f32 %v13704_v21, %v13603_v61  ;;  %v13626_v11 = vsub.f32 0.0, %v17994_v9  ;;  %v13842_v45 = vmul.f32 %v17978_v4, %v13826_v29 }
 0x593   : > { %v13765_v41 = vmul.f32 %v13685_v58, %v17968_v39  ;;  %v13797_v40 = vmul.f32 %v13781_v48, %v13749_v2  ;;  %v13671_v37 = vsub.f32 0.0, %v13655_v63  ;;  %v13828_v42 = vsub.f32 0.0, %v13812_v27 }
 0x594   : > { %v13605_v6 = vmul.f32 0.6931472, %v15603_v3  ;;  %v13641_v46 = vmax.f32 %v13625_v19, 0.0  ;;  %v13705_v1 = vmax.f32 %v17934_v57, 0.0  ;;  %v13735_v59 = vsub.f32 0.0, %v13719_v5 }
 0x595   : > { %v13686_v53 = vmax.f32 %v13670_v16, -100.0  ;;  %v13750_v54 = vmax.f32 %v13734_v31, -100.0  ;;  %v13706_v47 = vmax.f32 %v17994_v9, 0.0  ;;  %v13672_v56 = vsub.f32 0.0, %v13656_v20 }
 0x596   : > { %v13736_v35 = vsub.f32 0.0, %v13720_v25  ;;  %v13642_v55 = vmax.f32 %v13626_v11, 0.0  ;;  %v13862_v39 = vsel %vm13854_vm12, %v13842_v45, 0.0  ;;  %v13687_v48 = vmax.f32 %v13671_v37, -100.0 }
 0x597   : > { %v13627_v29 = vsub.f32 0.0, %v17989_v38  ;;  %v13415_v43 = vadd.s32 96, %v15910_v15  ;;  %v13657_v61 = vadd.f32 %v13641_v46, %v13605_v6  ;;  %v13721_v57 = vadd.f32 %v13705_v1, %v13605_v6 }
 0x598   : > { %v13813_v63 = vadd.f32 %v13797_v40, %v13765_v41  ;;  %v13751_v27 = vmax.f32 %v13735_v59, -100.0  ;;  %v13766_v19 = vmul.f32 %v13686_v53, %v18030_v52  ;;  %v13798_v30 = vmul.f32 %v13782_v51, %v13750_v54 }
 0x599   : > { %v15605_v44 = vpop.eup %15604  ;;  %v13844_v21 = vmul.f32 %v18013_v28, %v13828_v42  ;;  %v13688_v3 = vmax.f32 %v13672_v56, -100.0  ;;  %v13752_v5 = vmax.f32 %v13736_v35, -100.0  ;;  %v13767_v31 = vmul.f32 %v13687_v48, %v18017_v22 }
 0x59a   : > { %v13607_v4 = vmul.f32 0.6931472, %v15605_v44  ;;  %v15607_v24 = vpop.eup %15606  ;;  %v13643_v20 = vmax.f32 %v13627_v29, 0.0  ;;  %v13707_v25 = vmax.f32 %v17989_v38, 0.0  ;;  %v13673_v37 = vsub.f32 0.0, %v13657_v61 }
 0x59b   : > { %v13609_v16 = vmul.f32 0.6931472, %v15607_v24  ;;  %v13737_v41 = vsub.f32 0.0, %v13721_v57  ;;  %v13799_v28 = vmul.f32 %v13783_v60, %v13751_v27  ;;  %v13814_v52 = vadd.f32 %v13798_v30, %v13766_v19 }
 0x59c   : > { %v13658_v58 = vadd.f32 %v13642_v55, %v13607_v4  ;;  %v13722_v2 = vadd.f32 %v13706_v47, %v13607_v4  ;;  %v13768_v42 = vmul.f32 %v13688_v3, %v18040_v0  ;;  %v13800_v38 = vmul.f32 %v13784_v34, %v13752_v5 }
 0x59d   : > { %v15609_v9 = vpop.eup %15608  ;;  %v13659_v46 = vadd.f32 %v13643_v20, %v13609_v16  ;;  %v13723_v1 = vadd.f32 %v13707_v25, %v13609_v16  ;;  %v13863_v44 = vadd.f32 %v13862_v39, %v18050_v17  ;;  %v13829_v59 = vsub.f32 0.0, %v13813_v63  ;;  %v13499_v17 = vld [vmem:[%s17864_s22 + $0x68] sm:$0xff]  ;;  %v18138_v63 = vld [vmem:[%s17864_s22 + $0x70] sm:$0xff] }
 0x59e   : > { %v13581_v11 = vadd.f32 1.0, %v15609_v9  ;;  %v13674_v40 = vsub.f32 0.0, %v13658_v58  ;;  %v13738_v6 = vsub.f32 0.0, %v13722_v2  ;;  %v13432_v53 = vadd.s32 %v17850_v14, %v13415_v43 }
 0x59f   : > { %v15611_v45 = vpop.eup %15610  ;;  %v13689_v54 = vmax.f32 %v13673_v37, -100.0  ;;  %v13753_v22 = vmax.f32 %v13737_v41, -100.0  ;;  %v13864_v56 = vsel %vm13854_vm12, %v18090_v18, 0.0  ;;  %v13866_v35 = vsel %vm13854_vm12, %v13844_v21, 0.0 }
 0x5a0   : > { %15612 = vlog2.f32 %v13581_v11  ;;  %v13580_v51 = vadd.f32 1.0, %v15611_v45  ;;  %v13690_v60 = vmax.f32 %v13674_v40, -100.0  ;;  %v13754_v47 = vmax.f32 %v13738_v6, -100.0 }
 0x5a1   : > { %v13830_v0 = vsub.f32 0.0, %v13814_v52  ;;  %v13416_v34 = vadd.s32 104, %v15910_v15  ;;  %v13815_v4 = vadd.f32 %v13799_v28, %v13767_v31  ;;  %v13816_v55 = vadd.f32 %v13800_v38, %v13768_v42  ;;  %v13501_v42 = vld [vmem:[%s17864_s22 + $0x78] sm:$0xff]  ;;  %s15685_s22 = smov [#allocation6]  }
 0x5a2   : > { %15614 = vlog2.f32 %v13580_v51  ;;  %v13675_v24 = vsub.f32 0.0, %v13659_v46  ;;  %v13739_v39 = vsub.f32 0.0, %v13723_v1  ;;  %v13845_v48 = vmul.f32 %v17984_v7, %v13829_v59  ;;  %s15621_s1 = sshll.u32 %s15685_s22, 4  ;;  %s15622_s1 = int_to_ptr.vmem [resolvable:$false] %s15621_s1 }
 0x5a3   : > { %v13865_v29 = vadd.f32 %v13864_v56, %v13863_v44  ;;  %vm13450_vm4 = vcmp.lt.s32.totalorder %v13432_v53, %v17855_v32  ;;  %v14351_v18 = vsel %vm13449_vm2, 1.0, %v15679_v8  ;;  %v13769_v43 = vmul.f32 %v13689_v54, %v18037_v62  ;;  %s15623_s2 = scalar_lea.vmem %s15622_s1, 32  ;;  %p15624_p1 = scmp.lt.s32.totalorder %s18178_s23, %s15622_s1 }
 0x5a4   : > { %v13801_v61 = vmul.f32 %v13785_v33, %v13753_v22  ;;  %v13770_v57 = vmul.f32 %v13690_v60, %v18084_v36  ;;  %v13802_v58 = vmul.f32 %v13786_v10, %v13754_v47  ;;  %v13846_v7 = vmul.f32 %v18046_v26, %v13830_v0  ;;  %p15625_p2 = scmp.lt.s32.totalorder %s15623_s2, %s15617_s25 }
 0x5a5   : > { %v13867_v2 = vadd.f32 %v13866_v35, %v13865_v29  ;;  %v13787_v9 = vsub.f32 1.0, %v13499_v17  ;;  %v13433_v27 = vadd.s32 %v17850_v14, %v13416_v34  ;;  %v13831_v12 = vsub.f32 0.0, %v13815_v4 }
 0x5a6   : > { %v13832_v19 = vsub.f32 0.0, %v13816_v55  ;;  %v13691_v30 = vmax.f32 %v13675_v24, -100.0  ;;  %v13755_v21 = vmax.f32 %v13739_v39, -100.0  ;;  %v13629_v62 = vsub.f32 0.0, %v18064_v50  ;;  %p15626_p3 = por %p15625_p2, %p15624_p1 }
 0x5a7   : > { %v13417_v33 = vadd.s32 112, %v15910_v15  ;;  %v14350_v36 = vsel %vm13448_vm3, 1.0, %v15679_v8  ;;  %v14352_v26 = vsel %vm13450_vm4, 1.0, %v15679_v8  ;;  %v13868_v10 = vsel %vm13854_vm12, %v13845_v48, 0.0 }
 0x5a8   : > { %v13817_v3 = vadd.f32 %v13801_v61, %v13769_v43  ;;  %v13818_v5 = vadd.f32 %v13802_v58, %v13770_v57  ;;  %v13788_v16 = vsub.f32 1.0, %v18138_v63  ;;  %v13628_v31 = vsub.f32 0.0, %v18073_v23  ;;  %p15627_p4 = pnand %p15626_p3, %p15620_p0 }
 0x5a9   : > { %v13418_v20 = vadd.s32 120, %v15910_v15  ;;  %vm13451_vm5 = vcmp.lt.s32.totalorder %v13433_v27, %v17855_v32  ;;  %v13869_v25 = vadd.f32 %v13868_v10, %v13867_v2  ;;  %v13870_v49 = vsel %vm13854_vm12, %v13846_v7, 0.0 }
 0x5aa   : > { %v13847_v45 = vmul.f32 %v18024_v13, %v13831_v12  ;;  %v13771_v37 = vmul.f32 %v13691_v30, %v13499_v17  ;;  %v13803_v41 = vmul.f32 %v13787_v9, %v13755_v21  ;;  %v13848_v40 = vmul.f32 %v14350_v36, %v13832_v19 }
 0x5ab   : > { %v13645_v28 = vmax.f32 %v13629_v62, 0.0  ;;  %v13709_v52 = vmax.f32 %v18064_v50, 0.0  ;;  %v13434_v51 = vadd.s32 %v17850_v14, %v13417_v33  ;;  %v13833_v15 = vsub.f32 0.0, %v13817_v3 }
 0x5ac   : > { %v13708_v46 = vmax.f32 %v18073_v23, 0.0  ;;  %v13834_v1 = vsub.f32 0.0, %v13818_v5  ;;  %v13871_v44 = vadd.f32 %v13870_v49, %v13869_v25  ;;  %v13644_v13 = vmax.f32 %v13628_v31, 0.0 }
 0x5ad   : > { %v15613_v11 = vpop.eup %15612  ;;  %v13789_v22 = vsub.f32 1.0, %v13501_v42  ;;  %v13819_v60 = vadd.f32 %v13803_v41, %v13771_v37  ;;  %v13872_v47 = vsel %vm13854_vm12, %v13847_v45, 0.0  ;;  %v13874_v56 = vsel %vm13854_vm12, %v13848_v40, 0.0 }
 0x5ae   : > { %v13613_v6 = vmul.f32 0.6931472, %v15613_v11  ;;  %v13435_v4 = vadd.s32 %v17850_v14, %v13418_v20  ;;  %v13849_v55 = vmul.f32 %v14351_v18, %v13833_v15  ;;  %v13850_v23 = vmul.f32 %v14352_v26, %v13834_v1 }
 0x5af   : > { %v15615_v38 = vpop.eup %15614  ;;  %v13873_v17 = vadd.f32 %v13872_v47, %v13871_v44  ;;  %v13835_v43 = vsub.f32 0.0, %v13819_v60  ;;  %vm13452_vm6 = vcmp.lt.s32.totalorder %v13434_v51, %v17855_v32  ;;  %v14353_v14 = vsel %vm13451_vm5, 1.0, %v15679_v8 }
 0x5b0   : > { %v13661_v59 = vadd.f32 %v13645_v28, %v13613_v6  ;;  %v13725_v53 = vadd.f32 %v13709_v52, %v13613_v6  ;;  %v13611_v54 = vmul.f32 0.6931472, %v15615_v38  ;;  %vm13453_vm0 = vcmp.lt.s32.totalorder %v13435_v4, %v17855_v32 }
 0x5b1   : > { %v13875_v61 = vadd.f32 %v13874_v56, %v13873_v17  ;;  %v13876_v18 = vsel %vm13854_vm12, %v13849_v55, 0.0  ;;  %v13878_v30 = vsel %vm13854_vm12, %v13850_v23, 0.0  ;;  %v13851_v36 = vmul.f32 %v14353_v14, %v13835_v43 }
 0x5b2   : > { %v13677_v50 = vsub.f32 0.0, %v13661_v59  ;;  %v13741_v35 = vsub.f32 0.0, %v13725_v53  ;;  %v13660_v0 = vadd.f32 %v13644_v13, %v13611_v54  ;;  %v13724_v34 = vadd.f32 %v13708_v46, %v13611_v54 }
 0x5b3   : > { %v13877_v21 = vadd.f32 %v13876_v18, %v13875_v61  ;;  %v14354_v26 = vsel %vm13452_vm6, 1.0, %v15679_v8  ;;  %v14355_v10 = vsel %vm13453_vm0, 1.0, %v15679_v8  ;;  %v13880_v31 = vsel %vm13854_vm12, %v13851_v36, 0.0 }
 0x5b4   : > { %v13693_v24 = vmax.f32 %v13677_v50, -100.0  ;;  %v13757_v39 = vmax.f32 %v13741_v35, -100.0  ;;  %v13676_v48 = vsub.f32 0.0, %v13660_v0  ;;  %v13740_v29 = vsub.f32 0.0, %v13724_v34 }
 0x5b5   : > { %v13879_v3 = vadd.f32 %v13878_v30, %v13877_v21 }
 0x5b6   : > { %v13692_v57 = vmax.f32 %v13676_v48, -100.0  ;;  %v13756_v58 = vmax.f32 %v13740_v29, -100.0  ;;  %v13773_v2 = vmul.f32 %v13693_v24, %v13501_v42  ;;  %v13805_v7 = vmul.f32 %v13789_v22, %v13757_v39 }
 0x5b8   : > { %v13772_v9 = vmul.f32 %v13692_v57, %v18138_v63  ;;  %v13804_v12 = vmul.f32 %v13788_v16, %v13756_v58  ;;  %v13821_v19 = vadd.f32 %v13805_v7, %v13773_v2  ;;  %v13881_v63 = vadd.f32 %v13880_v31, %v13879_v3 }
 0x5ba   : > { %v13820_v62 = vadd.f32 %v13804_v12, %v13772_v9  ;;  %v13837_v33 = vsub.f32 0.0, %v13821_v19 }
 0x5bc   : > { %v13836_v5 = vsub.f32 0.0, %v13820_v62  ;;  %v13853_v27 = vmul.f32 %v14355_v10, %v13837_v33 }
 0x5be   : > { %v13852_v32 = vmul.f32 %v14354_v26, %v13836_v5  ;;  %v13884_v25 = vsel %vm13854_vm12, %v13853_v27, 0.0 }
 0x5c0   : > { %v13882_v16 = vsel %vm13854_vm12, %v13852_v32, 0.0 }
 0x5c1   : > { %v13883_v20 = vadd.f32 %v13882_v16, %v13881_v63 }
 0x5c3   : > { %v13885_v49 = vadd.f32 %v13884_v25, %v13883_v20 }
 0x5c5   : > { %13886 = vadd.xlane.f32.xlu1 %v13885_v49 }
 0x64e   : > { %v13887_v11 = vpop.xlane.xlu1 %13886 }
 0x64f   : > { %v13888_v45 = vrot.slane %v13887_v11, 4 }
 0x651   : > { %v13889_v37 = vadd.f32 %v13888_v45, %v13887_v11 }
 0x653   : > { %v13890_v8 = vrot.slane %v13889_v37, 2 }
 0x655   : > { %v13891_v41 = vadd.f32 %v13890_v8, %v13889_v37 }
 0x657   : > { %v13892_v40 = vrot.slane %v13891_v41, 1 }
 0x659   : > { %v13893_v6 = vadd.f32 %v13892_v40, %v13891_v41 }
 0x65b   : > { %15505 = vpush %v13893_v6 }
 0x68c   : > { %s15506_s17 = spop %15505 }
 0x68d   : > { %v13895_v28 = vstv %s15506_s17 }
 0x68e   : > { %13896 = vst [vmem:[%s442_s12] sm:$0x1] %v13895_v28 }
 0x68f   : > { %15630 = shalt.err (!%p15627_p4)
}
 0x690   : > { %s15631_s3 = scalar_lea.hbm %s13908_s24, 16  ;;  %s15635_s12 = scalar_lea.hbm %s18230_s13, 32 }
 0x691   : > { %p15632_p7 = scmp.ne.s32.totalorder %s13908_s24, %s15631_s3  ;;  %p15636_p10 = scmp.lt.s32.totalorder %s13908_s24, %s18230_s13 }
 0x692   : > { %p15637_p11 = scmp.lt.s32.totalorder %s15635_s12, %s15631_s3 }
 0x693   : > { %p15633_p8 = pnand %p15632_p7, %p15800_p5 }
 0x694   : > { %p15638_p12 = por %p15637_p11, %p15636_p10 }
 0x695   : > { %p15634_p9 = pneg %p15633_p8 }
 0x697   : > { %p15639_p13 = pnand %p15638_p12, %p15634_p9 }
 0x699   : > { %15642 = shalt.err (!%p15639_p13)
}
 0x69a   : > { %15507 = dma.vmem_to_hbm [thread:$0]  (%p15800_p5), %s18178_s23, 16, %s13908_s24, %s13898_s28  }
 0x69b PF: > { %p15513_p0 = scmp.ge.s32.totalorder %s15677_s15, 2  ;;  %s13922_s1 = sand.u32 1, %s15665_s29  }
 0x69c   : > { %s13923_s2 = scalar_lea.sflag [#allocation7], %s13922_s1 }
 0x69d   : > { %p15510_p1 = pnand %p15513_p0, %p15804_p6 }
 0x69f   : > { %p15511_p2 = pneg %p15510_p1 }
 0x6a1   : > { %15660 = dma.done.wait (%p15511_p2), %s13923_s2, 16  }
 0x6a2   : > { %15662 = vsyncadd (%p15511_p2), %s13923_s2, 4294967280  ;;  %p26_p3 = scmp.ge.s32.totalorder %s15787_s16, 4   ;;  %s18244_s29 = smov %s15669_s30 }
 0x6a3   : > { %s18245_s30 = smov %s15673_s14  ;;  %s18246_s14 = smov %s15798_s19 }
 0x6a4   : > { %s18247_s15 = smov %s15787_s16  ;;  %28 = sbr.rel (!%p26_p3) target bundleno = 8 (0x8), region = 109 }
 0x6a9   :  { %13927 = vsyncpa [#allocation7], 1 }
 0x6aa   :  { %13929 = vsyncpa [#allocation7 + $0x1], 1 }

</bundles_post_ra>
